<compile_context>
chip_gen: v5e
topology: v5e:2x2
jax: 0.10.0
libtpu: 0.0.40
codegen_flags: <defaults>
</compile_context>

<pallas_src>
import functools

import jax
import jax.numpy as jnp
from jax.experimental import pallas as pl
from jax.experimental.pallas import tpu as pltpu

LEAKY_SLOPE = 0.01   # PyTorch nn.LeakyReLU default negative_slope
LANE = 128
MIN_TILE_B = 16      # bf16 sublane packing granule
MAX_TILE_B = 512     # large enough to hide per-step overhead, tiny in VMEM


def _round_up(x, m):
    return ((x + m - 1) // m) * m


def _choose_batch_tiling(batch):
    """Pick (tile_b, padded_batch): minimize padding, cap tile at MAX_TILE_B,
    and prefer >=2 grid steps so v7x megacore sharding has work for both TCs."""
    n_tiles = pl.cdiv(batch, MAX_TILE_B)
    if batch >= 2 * MIN_TILE_B:
        n_tiles = max(n_tiles, 2)
    tile_b = _round_up(pl.cdiv(batch, n_tiles), MIN_TILE_B)
    padded_batch = _round_up(batch, tile_b)
    return tile_b, padded_batch


def _leaky_relu(x):
    # Runs in x's dtype (bf16 between hidden layers -> packed VALU on v6e/v7x).
    return jnp.where(x >= 0, x, LEAKY_SLOPE * x)


def _actor_kernel(ma_ref,              # SMEM f32[1]: max_action
                  x_ref,               # (TILE_B, state_dim) bf16
                  w1_ref, b1_ref,
                  w2_ref, b2_ref,
                  w3_ref, b3_ref,
                  w4_ref, b4_ref,
                  w5_ref, b5_ref,      # w5/b5 padded to lane-dense out width
                  o_ref):              # (TILE_B, out_pad) bf16
    max_action = ma_ref[0]

    h = x_ref[...]  # bf16
    for w_ref, b_ref in ((w1_ref, b1_ref), (w2_ref, b2_ref),
                         (w3_ref, b3_ref), (w4_ref, b4_ref)):
        # bf16 x bf16 -> f32 accumulation on the MXU; bias add in f32.
        h = jnp.dot(h, w_ref[...], preferred_element_type=jnp.float32) + b_ref[...]
        # Downcast first, then LeakyReLU in bf16 (cheaper VALU on v6e/v7x).
        h = _leaky_relu(h.astype(jnp.bfloat16))

    h = jnp.dot(h, w5_ref[...], preferred_element_type=jnp.float32) + b5_ref[...]
    o_ref[...] = (max_action * jnp.tanh(h)).astype(o_ref.dtype)


def prepare_actor_params(params):
    """One-time prep: cast weights to bf16, keep biases f32 (shape (1, out)),
    pad the last layer to a lane-dense (multiple of 128) output width."""
    action_dim = params["w5"].shape[1]
    out_pad = _round_up(action_dim, LANE)
    prepared = {}
    for layer in range(1, 6):
        w = jnp.asarray(params[f"w{layer}"], dtype=jnp.bfloat16)
        b = jnp.asarray(params[f"b{layer}"], dtype=jnp.float32)
        if b.ndim == 1:
            b = b[None, :]
        if layer == 5:
            pad = out_pad - w.shape[1]
            if pad:
                w = jnp.pad(w, ((0, 0), (0, pad)))
                b = jnp.pad(b, ((0, 0), (0, pad)))
        prepared[f"w{layer}"] = w
        prepared[f"b{layer}"] = b
    return prepared, action_dim


@functools.partial(jax.jit, static_argnames=("action_dim", "return_padded"))
def actor_forward(state, prepared_params, max_action, action_dim,
                  return_padded=False):
    """Run the Actor MLP on TPU via a batch-tiled Pallas kernel.

    state:            (batch, state_dim) float array
    prepared_params:  output of prepare_actor_params
    max_action:       scalar (traced; no recompile per value)
    return_padded:    if True, return the raw (padded_batch, 128) bf16 slab
                      (lets a fused consumer skip an HBM round trip).
    """
    batch, state_dim = state.shape
    out_pad = prepared_params["w5"].shape[1]

    tile_b, padded_batch = _choose_batch_tiling(batch)

    x = state.astype(jnp.bfloat16)
    if padded_batch != batch:
        x = jnp.pad(x, ((0, padded_batch - batch), (0, 0)))

    ma = jnp.reshape(jnp.asarray(max_action, dtype=jnp.float32), (1,))

    args = [ma, x]
    in_specs = [
        pl.BlockSpec(memory_space=pltpu.MemorySpace.SMEM),       # max_action
        pl.BlockSpec((tile_b, state_dim), lambda i: (i, 0)),     # batch-tiled x
    ]
    for layer in range(1, 6):
        w = prepared_params[f"w{layer}"]
        b = prepared_params[f"b{layer}"]
        args += [w, b]
        # Constant block index -> weights/biases stay resident in VMEM
        # across grid steps (DMA'd once per call / per core).
        in_specs += [
            pl.BlockSpec(w.shape, lambda i: (0, 0)),
            pl.BlockSpec(b.shape, lambda i: (0, 0)),
        ]

    grid = (padded_batch // tile_b,)

    out = pl.pallas_call(
        _actor_kernel,
        out_shape=jax.ShapeDtypeStruct((padded_batch, out_pad), jnp.bfloat16),
        grid_spec=pltpu.PrefetchScalarGridSpec(
            num_scalar_prefetch=0,
            grid=grid,
            in_specs=in_specs,
            out_specs=pl.BlockSpec((tile_b, out_pad), lambda i: (i, 0)),
        ),
        compiler_params=pltpu.CompilerParams(
            dimension_semantics=("parallel",),   # v7x: shard batch tiles over 2 TCs
        ),
    )(*args)

    if return_padded:
        return out
    return out[:batch, :action_dim]


def init_actor_params(key, state_dim, action_dim):
    """Deterministic PyTorch-style (uniform fan-in) init. Weights stored (in, out)."""
    dims = [(state_dim, 512), (512, 512), (512, 512), (512, 256), (256, action_dim)]
    params = {}
    for i, (fan_in, fan_out) in enumerate(dims, start=1):
        key, kw, kb = jax.random.split(key, 3)
        bound = 1.0 / jnp.sqrt(fan_in)
        params[f"w{i}"] = jax.random.uniform(
            kw, (fan_in, fan_out), jnp.float32, minval=-bound, maxval=bound)
        params[f"b{i}"] = jax.random.uniform(
            kb, (1, fan_out), jnp.float32, minval=-bound, maxval=bound)
    return params


def actor_reference_bf16(state, params, max_action):
    """JAX reference using the same bf16-operand / f32-accumulate path and the
    same cast-then-LeakyReLU ordering as the kernel."""
    h = state.astype(jnp.bfloat16)
    for i in range(1, 5):
        h = jnp.dot(h, params[f"w{i}"].astype(jnp.bfloat16),
                    preferred_element_type=jnp.float32) + params[f"b{i}"]
        h = h.astype(jnp.bfloat16)
        h = jnp.where(h >= 0, h, LEAKY_SLOPE * h)
    h = jnp.dot(h, params["w5"].astype(jnp.bfloat16),
                preferred_element_type=jnp.float32) + params["b5"]
    return max_action * jnp.tanh(h)


def actor_reference_f32(state, params, max_action):
    h = state
    for i in range(1, 5):
        h = h @ params[f"w{i}"] + params[f"b{i}"]
        h = jnp.where(h >= 0, h, LEAKY_SLOPE * h)
    h = h @ params["w5"] + params["b5"]
    return max_action * jnp.tanh(h)


if __name__ == "__main__":
    state_dim = 16
    action_dim = 4
    max_action = 2.0

    key = jax.random.PRNGKey(0)
    key, k_state, k_big = jax.random.split(key, 3)
    params = init_actor_params(key, state_dim, action_dim)
    prepared, adim = prepare_actor_params(params)

    # Small batch (single tile path, grid=(1,))
    batch = 8
    state = jax.random.normal(k_state, (batch, state_dim), jnp.float32)
    out = actor_forward(state, prepared, max_action, adim)
    out = jax.block_until_ready(out)
    assert out.shape == (batch, action_dim)

    out_f32 = out.astype(jnp.float32)
    ref_bf16 = actor_reference_bf16(state, params, max_action).astype(jnp.float32)
    ref_f32 = actor_reference_f32(state, params, max_action)
    assert jnp.allclose(out_f32, ref_bf16, atol=2e-2, rtol=2e-2), "mismatch vs bf16 reference"
    assert jnp.allclose(out_f32, ref_f32, atol=1e-1, rtol=1e-1), "mismatch vs f32 reference"

    # Larger batch (exercises padding-minimizing tiling: 384 -> 2 tiles of 192)
    big_batch = 384
    big_state = jax.random.normal(k_big, (big_batch, state_dim), jnp.float32)
    big_out = jax.block_until_ready(
        actor_forward(big_state, prepared, max_action, adim))
    big_ref = actor_reference_bf16(big_state, params, max_action).astype(jnp.float32)
    assert big_out.shape == (big_batch, action_dim)
    assert jnp.allclose(big_out.astype(jnp.float32), big_ref,
                        atol=2e-2, rtol=2e-2), "mismatch (big batch)"

    print("KERNEL_OK")
</pallas_src>

<mosaic_0001>
module attributes {stable_mosaic.version = 11 : i64} {
  func.func @_actor_kernel(%arg0: i32, %arg1: memref<1xf32, #tpu.memory_space<smem>>, %arg2: memref<16x16xbf16, #tpu.memory_space<vmem>>, %arg3: memref<16x512xbf16, #tpu.memory_space<vmem>>, %arg4: memref<1x512xf32, #tpu.memory_space<vmem>>, %arg5: memref<512x512xbf16, #tpu.memory_space<vmem>>, %arg6: memref<1x512xf32, #tpu.memory_space<vmem>>, %arg7: memref<512x512xbf16, #tpu.memory_space<vmem>>, %arg8: memref<1x512xf32, #tpu.memory_space<vmem>>, %arg9: memref<512x256xbf16, #tpu.memory_space<vmem>>, %arg10: memref<1x256xf32, #tpu.memory_space<vmem>>, %arg11: memref<256x128xbf16, #tpu.memory_space<vmem>>, %arg12: memref<1x128xf32, #tpu.memory_space<vmem>>, %arg13: memref<16x128xbf16, #tpu.memory_space<vmem>>) attributes {dimension_semantics = [#tpu.dimension_semantics<parallel>], iteration_bounds = array<i64: 1>, scalar_prefetch = 0 : i64, scratch_operands = 0 : i64, tpu.core_type = #tpu.core_type<tc>, window_params = [{transform_indices = @transform_0, window_bounds = array<i64: 1>}, {transform_indices = @transform_1, window_bounds = array<i64: 16, 16>}, {pipeline_mode = #tpu.pipeline_mode<synchronous>, transform_indices = @transform_2, window_bounds = array<i64: 16, 512>}, {pipeline_mode = #tpu.pipeline_mode<synchronous>, transform_indices = @transform_3, window_bounds = array<i64: 1, 512>}, {pipeline_mode = #tpu.pipeline_mode<synchronous>, transform_indices = @transform_4, window_bounds = array<i64: 512, 512>}, {pipeline_mode = #tpu.pipeline_mode<synchronous>, transform_indices = @transform_5, window_bounds = array<i64: 1, 512>}, {pipeline_mode = #tpu.pipeline_mode<synchronous>, transform_indices = @transform_6, window_bounds = array<i64: 512, 512>}, {pipeline_mode = #tpu.pipeline_mode<synchronous>, transform_indices = @transform_7, window_bounds = array<i64: 1, 512>}, {pipeline_mode = #tpu.pipeline_mode<synchronous>, transform_indices = @transform_8, window_bounds = array<i64: 512, 256>}, {pipeline_mode = #tpu.pipeline_mode<synchronous>, transform_indices = @transform_9, window_bounds = array<i64: 1, 256>}, {pipeline_mode = #tpu.pipeline_mode<synchronous>, transform_indices = @transform_10, window_bounds = array<i64: 256, 128>}, {pipeline_mode = #tpu.pipeline_mode<synchronous>, transform_indices = @transform_11, window_bounds = array<i64: 1, 128>}, {transform_indices = @transform_12, window_bounds = array<i64: 16, 128>}]} {
    %c0 = arith.constant 0 : index
    %0 = memref.load %arg1[%c0] : memref<1xf32, #tpu.memory_space<smem>>
    %c0_0 = arith.constant 0 : index
    %c0_1 = arith.constant 0 : index
    %1 = vector.load %arg2[%c0_0, %c0_1] : memref<16x16xbf16, #tpu.memory_space<vmem>>, vector<16x16xbf16>
    %c0_2 = arith.constant 0 : index
    %c0_3 = arith.constant 0 : index
    %2 = vector.load %arg3[%c0_2, %c0_3] : memref<16x512xbf16, #tpu.memory_space<vmem>>, vector<16x512xbf16>
    %cst = arith.constant dense<0.000000e+00> : vector<16x512xf32>
    %3 = tpu.matmul %1, %2, %cst {dimension_numbers = #tpu.dot_dimension_numbers<[1], [0], [0], [1], [0, 0, 1, 1], [], []>} : vector<16x16xbf16>, vector<16x512xbf16>, vector<16x512xf32> -> vector<16x512xf32>
    %c0_4 = arith.constant 0 : index
    %c0_5 = arith.constant 0 : index
    %4 = vector.load %arg4[%c0_4, %c0_5] : memref<1x512xf32, #tpu.memory_space<vmem>>, vector<1x512xf32>
    %5 = vector.broadcast %4 : vector<1x512xf32> to vector<16x512xf32>
    %6 = arith.addf %3, %5 : vector<16x512xf32>
    %7 = arith.truncf %6 : vector<16x512xf32> to vector<16x512xbf16>
    %cst_6 = arith.constant 0.000000e+00 : bf16
    %8 = vector.broadcast %cst_6 : bf16 to vector<16x512xbf16>
    %9 = arith.cmpf oge, %7, %8 : vector<16x512xbf16>
    %cst_7 = arith.constant 1.000980e-02 : bf16
    %10 = vector.broadcast %cst_7 : bf16 to vector<16x512xbf16>
    %11 = arith.mulf %10, %7 : vector<16x512xbf16>
    %12 = arith.select %9, %7, %11 : vector<16x512xi1>, vector<16x512xbf16>
    %c0_8 = arith.constant 0 : index
    %c0_9 = arith.constant 0 : index
    %13 = vector.load %arg5[%c0_8, %c0_9] : memref<512x512xbf16, #tpu.memory_space<vmem>>, vector<512x512xbf16>
    %cst_10 = arith.constant dense<0.000000e+00> : vector<16x512xf32>
    %14 = tpu.matmul %12, %13, %cst_10 {dimension_numbers = #tpu.dot_dimension_numbers<[1], [0], [0], [1], [0, 0, 1, 1], [], []>} : vector<16x512xbf16>, vector<512x512xbf16>, vector<16x512xf32> -> vector<16x512xf32>
    %c0_11 = arith.constant 0 : index
    %c0_12 = arith.constant 0 : index
    %15 = vector.load %arg6[%c0_11, %c0_12] : memref<1x512xf32, #tpu.memory_space<vmem>>, vector<1x512xf32>
    %16 = vector.broadcast %15 : vector<1x512xf32> to vector<16x512xf32>
    %17 = arith.addf %14, %16 : vector<16x512xf32>
    %18 = arith.truncf %17 : vector<16x512xf32> to vector<16x512xbf16>
    %cst_13 = arith.constant 0.000000e+00 : bf16
    %19 = vector.broadcast %cst_13 : bf16 to vector<16x512xbf16>
    %20 = arith.cmpf oge, %18, %19 : vector<16x512xbf16>
    %cst_14 = arith.constant 1.000980e-02 : bf16
    %21 = vector.broadcast %cst_14 : bf16 to vector<16x512xbf16>
    %22 = arith.mulf %21, %18 : vector<16x512xbf16>
    %23 = arith.select %20, %18, %22 : vector<16x512xi1>, vector<16x512xbf16>
    %c0_15 = arith.constant 0 : index
    %c0_16 = arith.constant 0 : index
    %24 = vector.load %arg7[%c0_15, %c0_16] : memref<512x512xbf16, #tpu.memory_space<vmem>>, vector<512x512xbf16>
    %cst_17 = arith.constant dense<0.000000e+00> : vector<16x512xf32>
    %25 = tpu.matmul %23, %24, %cst_17 {dimension_numbers = #tpu.dot_dimension_numbers<[1], [0], [0], [1], [0, 0, 1, 1], [], []>} : vector<16x512xbf16>, vector<512x512xbf16>, vector<16x512xf32> -> vector<16x512xf32>
    %c0_18 = arith.constant 0 : index
    %c0_19 = arith.constant 0 : index
    %26 = vector.load %arg8[%c0_18, %c0_19] : memref<1x512xf32, #tpu.memory_space<vmem>>, vector<1x512xf32>
    %27 = vector.broadcast %26 : vector<1x512xf32> to vector<16x512xf32>
    %28 = arith.addf %25, %27 : vector<16x512xf32>
    %29 = arith.truncf %28 : vector<16x512xf32> to vector<16x512xbf16>
    %cst_20 = arith.constant 0.000000e+00 : bf16
    %30 = vector.broadcast %cst_20 : bf16 to vector<16x512xbf16>
    %31 = arith.cmpf oge, %29, %30 : vector<16x512xbf16>
    %cst_21 = arith.constant 1.000980e-02 : bf16
    %32 = vector.broadcast %cst_21 : bf16 to vector<16x512xbf16>
    %33 = arith.mulf %32, %29 : vector<16x512xbf16>
    %34 = arith.select %31, %29, %33 : vector<16x512xi1>, vector<16x512xbf16>
    %c0_22 = arith.constant 0 : index
    %c0_23 = arith.constant 0 : index
    %35 = vector.load %arg9[%c0_22, %c0_23] : memref<512x256xbf16, #tpu.memory_space<vmem>>, vector<512x256xbf16>
    %cst_24 = arith.constant dense<0.000000e+00> : vector<16x256xf32>
    %36 = tpu.matmul %34, %35, %cst_24 {dimension_numbers = #tpu.dot_dimension_numbers<[1], [0], [0], [1], [0, 0, 1, 1], [], []>} : vector<16x512xbf16>, vector<512x256xbf16>, vector<16x256xf32> -> vector<16x256xf32>
    %c0_25 = arith.constant 0 : index
    %c0_26 = arith.constant 0 : index
    %37 = vector.load %arg10[%c0_25, %c0_26] : memref<1x256xf32, #tpu.memory_space<vmem>>, vector<1x256xf32>
    %38 = vector.broadcast %37 : vector<1x256xf32> to vector<16x256xf32>
    %39 = arith.addf %36, %38 : vector<16x256xf32>
    %40 = arith.truncf %39 : vector<16x256xf32> to vector<16x256xbf16>
    %cst_27 = arith.constant 0.000000e+00 : bf16
    %41 = vector.broadcast %cst_27 : bf16 to vector<16x256xbf16>
    %42 = arith.cmpf oge, %40, %41 : vector<16x256xbf16>
    %cst_28 = arith.constant 1.000980e-02 : bf16
    %43 = vector.broadcast %cst_28 : bf16 to vector<16x256xbf16>
    %44 = arith.mulf %43, %40 : vector<16x256xbf16>
    %45 = arith.select %42, %40, %44 : vector<16x256xi1>, vector<16x256xbf16>
    %c0_29 = arith.constant 0 : index
    %c0_30 = arith.constant 0 : index
    %46 = vector.load %arg11[%c0_29, %c0_30] : memref<256x128xbf16, #tpu.memory_space<vmem>>, vector<256x128xbf16>
    %cst_31 = arith.constant dense<0.000000e+00> : vector<16x128xf32>
    %47 = tpu.matmul %45, %46, %cst_31 {dimension_numbers = #tpu.dot_dimension_numbers<[1], [0], [0], [1], [0, 0, 1, 1], [], []>} : vector<16x256xbf16>, vector<256x128xbf16>, vector<16x128xf32> -> vector<16x128xf32>
    %c0_32 = arith.constant 0 : index
    %c0_33 = arith.constant 0 : index
    %48 = vector.load %arg12[%c0_32, %c0_33] : memref<1x128xf32, #tpu.memory_space<vmem>>, vector<1x128xf32>
    %49 = vector.broadcast %48 : vector<1x128xf32> to vector<16x128xf32>
    %50 = arith.addf %47, %49 : vector<16x128xf32>
    %51 = math.tanh %50 : vector<16x128xf32>
    %52 = vector.broadcast %0 : f32 to vector<16x128xf32>
    %53 = arith.mulf %52, %51 : vector<16x128xf32>
    %54 = arith.truncf %53 : vector<16x128xf32> to vector<16x128xbf16>
    %c0_34 = arith.constant 0 : index
    %c0_35 = arith.constant 0 : index
    %55 = vector.load %arg13[%c0_34, %c0_35] : memref<16x128xbf16, #tpu.memory_space<vmem>>, vector<16x128xbf16>
    tpu.vector_store %arg13[%c0_34, %c0_35], %54 {strides = array<i32>} : memref<16x128xbf16, #tpu.memory_space<vmem>>, vector<16x128xbf16>,
    return
  }
  func.func @transform_0(%arg0: i32) -> i32 {
    %c0_i32 = arith.constant 0 : i32
    %c0_i32_0 = arith.constant 0 : i32
    return %c0_i32 : i32
  }
  func.func @transform_1(%arg0: i32) -> (i32, i32) {
    %c0_i32 = arith.constant 0 : i32
    %c0_i32_0 = arith.constant 0 : i32
    return %arg0, %c0_i32 : i32, i32
  }
  func.func @transform_2(%arg0: i32) -> (i32, i32) {
    %c0_i32 = arith.constant 0 : i32
    %c0_i32_0 = arith.constant 0 : i32
    %c0_i32_1 = arith.constant 0 : i32
    return %c0_i32, %c0_i32_0 : i32, i32
  }
  func.func @transform_3(%arg0: i32) -> (i32, i32) {
    %c0_i32 = arith.constant 0 : i32
    %c0_i32_0 = arith.constant 0 : i32
    %c0_i32_1 = arith.constant 0 : i32
    return %c0_i32, %c0_i32_0 : i32, i32
  }
  func.func @transform_4(%arg0: i32) -> (i32, i32) {
    %c0_i32 = arith.constant 0 : i32
    %c0_i32_0 = arith.constant 0 : i32
    %c0_i32_1 = arith.constant 0 : i32
    return %c0_i32, %c0_i32_0 : i32, i32
  }
  func.func @transform_5(%arg0: i32) -> (i32, i32) {
    %c0_i32 = arith.constant 0 : i32
    %c0_i32_0 = arith.constant 0 : i32
    %c0_i32_1 = arith.constant 0 : i32
    return %c0_i32, %c0_i32_0 : i32, i32
  }
  func.func @transform_6(%arg0: i32) -> (i32, i32) {
    %c0_i32 = arith.constant 0 : i32
    %c0_i32_0 = arith.constant 0 : i32
    %c0_i32_1 = arith.constant 0 : i32
    return %c0_i32, %c0_i32_0 : i32, i32
  }
  func.func @transform_7(%arg0: i32) -> (i32, i32) {
    %c0_i32 = arith.constant 0 : i32
    %c0_i32_0 = arith.constant 0 : i32
    %c0_i32_1 = arith.constant 0 : i32
    return %c0_i32, %c0_i32_0 : i32, i32
  }
  func.func @transform_8(%arg0: i32) -> (i32, i32) {
    %c0_i32 = arith.constant 0 : i32
    %c0_i32_0 = arith.constant 0 : i32
    %c0_i32_1 = arith.constant 0 : i32
    return %c0_i32, %c0_i32_0 : i32, i32
  }
  func.func @transform_9(%arg0: i32) -> (i32, i32) {
    %c0_i32 = arith.constant 0 : i32
    %c0_i32_0 = arith.constant 0 : i32
    %c0_i32_1 = arith.constant 0 : i32
    return %c0_i32, %c0_i32_0 : i32, i32
  }
  func.func @transform_10(%arg0: i32) -> (i32, i32) {
    %c0_i32 = arith.constant 0 : i32
    %c0_i32_0 = arith.constant 0 : i32
    %c0_i32_1 = arith.constant 0 : i32
    return %c0_i32, %c0_i32_0 : i32, i32
  }
  func.func @transform_11(%arg0: i32) -> (i32, i32) {
    %c0_i32 = arith.constant 0 : i32
    %c0_i32_0 = arith.constant 0 : i32
    %c0_i32_1 = arith.constant 0 : i32
    return %c0_i32, %c0_i32_0 : i32, i32
  }
  func.func @transform_12(%arg0: i32) -> (i32, i32) {
    %c0_i32 = arith.constant 0 : i32
    %c0_i32_0 = arith.constant 0 : i32
    return %arg0, %c0_i32 : i32, i32
  }
}

</mosaic_0001>

<bundles_post_ra>
// kernel: actor_forward.1
= control target key start
LH: loop header
LB: loop body
LE: loop exit
PB: predicated region body
PF: predicated region fallthrough
CT: control target
= control target key end

     0   :  { %18 = vsyncpa [#allocation4], 0  ;;  %s5504_s0 = inlined_call_operand.<no memory space> [shape: f32[1], index: 0, kind: input, shape index: {}]   ;;  %s5505_s1 = inlined_call_operand.vmem [shape: bf16[16,16], index: 1, kind: input, shape index: {}]   ;;  %s5506_s2 = inlined_call_operand.vmem [shape: bf16[16,512], index: 2, kind: input, shape index: {}]   ;;  %s5507_s3 = inlined_call_operand.hbm [shape: f32[1,512], index: 3, kind: input, shape index: {}]   ;;  %s5508_s4 = inlined_call_operand.hbm [shape: bf16[512,512], index: 4, kind: input, shape index: {}]   ;;  %s5509_s5 = inlined_call_operand.hbm [shape: f32[1,512], index: 5, kind: input, shape index: {}]   ;;  %s5510_s6 = inlined_call_operand.hbm [shape: bf16[512,512], index: 6, kind: input, shape index: {}]   ;;  %s5511_s7 = inlined_call_operand.hbm [shape: f32[1,512], index: 7, kind: input, shape index: {}]   ;;  %s5512_s8 = inlined_call_operand.hbm [shape: bf16[512,256], index: 8, kind: input, shape index: {}]   ;;  %s5513_s9 = inlined_call_operand.hbm [shape: f32[1,256], index: 9, kind: input, shape index: {}]   ;;  %s5514_s10 = inlined_call_operand.hbm [shape: bf16[256,128], index: 10, kind: input, shape index: {}]   ;;  %s5515_s11 = inlined_call_operand.vmem [shape: f32[1,128], index: 11, kind: input, shape index: {}]   ;;  %s5516_s12 = inlined_call_operand.vmem [shape: bf16[16,128], index: 12, kind: output, shape index: {}]  }
   0x1   :  { %19 = vsyncpa [#allocation6], 0 }
   0x2   :  { %20 = vsyncpa [#allocation9], 0 }
   0x3   :  { %21 = vsyncpa [#allocation12], 0  ;;  %s44_s23 = sshll.u32 %s5508_s4, 4  ;;  %s45_s23 = int_to_ptr.hbm [resolvable:$true] %s44_s23 }
   0x4   :  { %22 = vsyncpa [#allocation15], 0  ;;  %s5091_s24 = smov [#allocation5]   ;;  %s68_s28 = sshll.u32 %s5510_s6, 4  ;;  %s69_s28 = int_to_ptr.hbm [resolvable:$true] %s68_s28 }
   0x5   :  { %s46_s25 = sshll.u32 %s5091_s24, 4  ;;  %s5092_s29 = smov 256   ;;  %s47_s25 = int_to_ptr.vmem [resolvable:$true] %s46_s25 }
   0x6   :  { %s5093_s30 = smov 16   ;;  %s5094_s13 = smov [#allocation8]  }
   0x7   :  { %52 = dma.hbm_to_vmem [thread:$0]  %s45_s23, 16384, %s47_s25, [#allocation6], %s5092_s29, %s5092_s29, %s5093_s30  }
   0x8   :  { %s70_s14 = sshll.u32 %s5094_s13, 4  ;;  %s92_s17 = sshll.u32 %s5512_s8, 4  ;;  %s71_s14 = int_to_ptr.vmem [resolvable:$true] %s70_s14  ;;  %s93_s17 = int_to_ptr.hbm [resolvable:$true] %s92_s17 }
   0x9   :  { %76 = dma.hbm_to_vmem [thread:$0]  %s69_s28, 16384, %s71_s14, [#allocation9], %s5092_s29, %s5092_s29, %s5093_s30  }
   0xa   :  { %s5095_s4 = smov [#allocation11]   ;;  %s34_s6 = sshll.u32 %s5507_s3, 4  ;;  %s35_s6 = int_to_ptr.hbm [resolvable:$true] %s34_s6 }
   0xb   :  { %s94_s18 = sshll.u32 %s5095_s4, 4  ;;  %s5096_s21 = smov 128   ;;  %s95_s18 = int_to_ptr.vmem [resolvable:$true] %s94_s18 }
   0xc   :  { %s5097_s22 = smov 8   ;;  %s5098_s23 = smov [#allocation3]  }
   0xd   :  { %100 = dma.hbm_to_vmem [thread:$0]  %s93_s17, 8192, %s95_s18, [#allocation12], %s5096_s21, %s5096_s21, %s5097_s22  }
   0xe   :  { %s36_s24 = sshll.u32 %s5098_s23, 4  ;;  %s58_s8 = sshll.u32 %s5509_s5, 4  ;;  %s37_s24 = int_to_ptr.vmem [resolvable:$true] %s36_s24  ;;  %s59_s8 = int_to_ptr.hbm [resolvable:$true] %s58_s8 }
   0xf   :  { %39 = dma.hbm_to_vmem [thread:$0]  %s35_s6, 64, %s37_s24, [#allocation4]  }
  0x10   :  { %s82_s29 = sshll.u32 %s5511_s7, 4  ;;  %s5099_s30 = smov [#allocation7]   ;;  %s83_s29 = int_to_ptr.hbm [resolvable:$true] %s82_s29 }
  0x11   :  { %s60_s13 = sshll.u32 %s5099_s30, 4  ;;  %s5100_s3 = smov [#allocation10]   ;;  %s61_s13 = int_to_ptr.vmem [resolvable:$true] %s60_s13 }
  0x12   :  { %63 = dma.hbm_to_vmem [thread:$0]  %s59_s8, 64, %s61_s13, [#allocation6]  }
  0x13   :  { %s84_s14 = sshll.u32 %s5100_s3, 4  ;;  %s106_s17 = sshll.u32 %s5513_s9, 4  ;;  %s85_s14 = int_to_ptr.vmem [resolvable:$true] %s84_s14  ;;  %s107_s17 = int_to_ptr.hbm [resolvable:$true] %s106_s17 }
  0x14   :  { %87 = dma.hbm_to_vmem [thread:$0]  %s83_s29, 64, %s85_s14, [#allocation9]  }
  0x15   :  { %s116_s18 = sshll.u32 %s5514_s10, 4  ;;  %s5101_s19 = smov [#allocation13]   ;;  %s117_s18 = int_to_ptr.hbm [resolvable:$true] %s116_s18 }
  0x16   :  { %s108_s7 = sshll.u32 %s5101_s19, 4  ;;  %s5102_s20 = smov [#allocation14]   ;;  %s109_s7 = int_to_ptr.vmem [resolvable:$true] %s108_s7 }
  0x17   :  { %111 = dma.hbm_to_vmem [thread:$0]  %s107_s17, 32, %s109_s7, [#allocation12]  }
  0x18   :  { %s118_s6 = sshll.u32 %s5102_s20, 4  ;;  %s5103_s21 = smov 64   ;;  %s119_s6 = int_to_ptr.vmem [resolvable:$true] %s118_s6 }
  0x19   :  { %s5104_s22 = smov 4  }
  0x1a   :  { %124 = dma.hbm_to_vmem [thread:$0]  %s117_s18, 2048, %s119_s6, [#allocation15], %s5103_s21, %s5103_s21, %s5104_s22  }
  0x1b   :  { %5081 = dma.done.wait [#allocation4], 64  }
  0x1c   :  { %5082 = vsyncadd [#allocation4], 4294967232 }
  0x1d   :  { %5083 = dma.done.wait [#allocation6], 16448  }
  0x1e   :  { %5084 = vsyncadd [#allocation6], 4294950848 }
  0x1f   :  { %5085 = dma.done.wait [#allocation9], 16448  }
  0x20   :  { %5086 = vsyncadd [#allocation9], 4294950848 }
  0x21   :  { %5087 = dma.done.wait [#allocation12], 8224  }
  0x22   :  { %5088 = vsyncadd [#allocation12], 4294959072 }
  0x23   :  { %5089 = dma.done.wait [#allocation15], 2048  }
  0x24   :  { %5090 = vsyncadd [#allocation15], 4294965248  ;;  %v3162_v0 = vld [vmem:[%s5506_s2] sm:$0xf]  ;;  %v4527_v1 = vld [vmem:[%s5506_s2 + $0xc] sm:$0xf0] }
  0x25   :  { %v4525_v2 = vld [vmem:[%s5506_s2 + $0x4] sm:$0xf]  ;;  %v3163_v3 = vor.u32 %v4527_v1, %v3162_v0  ;;  %v3164_v4 = vld [vmem:[%s5506_s2 + $0x10] sm:$0xf0]  ;;  %vm202_vm0 = vcmask 130048  }
  0x26   :  { %v5209_v5 = vld [vmem:[%s5505_s1] sm:$0xff]  ;;  %v3170_v6 = vld [vmem:[%s5506_s2 + $0x8] sm:$0xf]  ;;  %v3167_v7 = vor.u32 %v4525_v2, %v3164_v4  ;;  %v4528_v8 = vld [vmem:[%s5506_s2 + $0x14] sm:$0xf0] }
  0x27   :  { %v4526_v9 = vld [vmem:[%s5506_s2 + $0xc] sm:$0xf]  ;;  %v3172_v10 = vld [vmem:[%s5506_s2 + $0x18] sm:$0xf0]  ;;  %213 = vmatpush.bf16.msra.mxu2 %v3163_v3  ;;  %v3171_v11 = vor.u32 %v4528_v8, %v3170_v6  ;;  %v3294_v13 = vld [vmem:[#allocation5 + $0xe0] sm:$0xf] }
  0x28   :  { %v3175_v12 = vor.u32 %v4526_v9, %v3172_v10  ;;  %v4559_v14 = vld [vmem:[#allocation5 + $0xec] sm:$0xf0]  ;;  %v3422_v15 = vld [vmem:[#allocation5 + $0x1e0] sm:$0xf]  ;;  %227 = vmatpush.bf16.msra.mxu3 %v3167_v7 }
  0x29   :  { %v3295_v16 = vor.u32 %v4559_v14, %v3294_v13  ;;  %v4591_v17 = vld [vmem:[#allocation5 + $0x1ec] sm:$0xf0]  ;;  %v3278_v18 = vld [vmem:[#allocation5 + $0xc0] sm:$0xf] }
  0x2a   :  { %v4555_v19 = vld [vmem:[#allocation5 + $0xcc] sm:$0xf0]  ;;  %v3423_v20 = vor.u32 %v4591_v17, %v3422_v15  ;;  %v3406_v21 = vld [vmem:[#allocation5 + $0x1c0] sm:$0xf]  ;;  %3176 = vmatmul.msk.bf16.vlgmr.msra.gmra.mxu2 %vm202_vm0, %v5209_v5 }
  0x2b   :  { %241 = vmatpush.bf16.msrb.mxu2 %v3171_v11  ;;  %v4587_v22 = vld [vmem:[#allocation5 + $0x1cc] sm:$0xf0]  ;;  %1100 = vmatpush.bf16.msra.mxu0 %v3295_v16  ;;  %v3279_v23 = vor.u32 %v4555_v19, %v3278_v18  ;;  %v3262_v25 = vld [vmem:[#allocation5 + $0xa0] sm:$0xf] }
  0x2c   :  { %255 = vmatpush.bf16.msrb.mxu3 %v3175_v12  ;;  %1114 = vmatpush.bf16.msra.mxu1 %v3423_v20  ;;  %v3407_v24 = vor.u32 %v4587_v22, %v3406_v21  ;;  %v4551_v26 = vld [vmem:[#allocation5 + $0xac] sm:$0xf0]  ;;  %v3390_v27 = vld [vmem:[#allocation5 + $0x1a0] sm:$0xf] }
  0x2d   :  { %3177 = vmatmul.msk.bf16.vlgmr.msra.gmra.mxu3 %vm202_vm0, %v5209_v5  ;;  %v4583_v28 = vld [vmem:[#allocation5 + $0x1ac] sm:$0xf0]  ;;  %v3550_v29 = vld [vmem:[#allocation5 + $0x2e0] sm:$0xf]  ;;  %v3263_v30 = vor.u32 %v4551_v26, %v3262_v25  ;;  %v4557_v26 = vld [vmem:[#allocation5 + $0xe4] sm:$0xf] }
  0x2e   :  { %v4623_v31 = vld [vmem:[#allocation5 + $0x2ec] sm:$0xf0]  ;;  %v3678_v32 = vld [vmem:[#allocation5 + $0x3e0] sm:$0xf]  ;;  %v3391_v34 = vor.u32 %v4583_v28, %v3390_v27  ;;  %v4589_v27 = vld [vmem:[#allocation5 + $0x1e4] sm:$0xf] }
  0x2f   :  { %1101 = vmatpush.bf16.msra.mxu0 %v3279_v23  ;;  %v4655_v33 = vld [vmem:[#allocation5 + $0x3ec] sm:$0xf0]  ;;  %v3246_v35 = vld [vmem:[#allocation5 + $0x80] sm:$0xf]  ;;  %v3551_v38 = vor.u32 %v4623_v31, %v3550_v29  ;;  %v3424_v28 = vld [vmem:[#allocation5 + $0x1f0] sm:$0xf0] }
  0x30   :  { %1115 = vmatpush.bf16.msra.mxu1 %v3407_v24  ;;  %v4547_v36 = vld [vmem:[#allocation5 + $0x8c] sm:$0xf0]  ;;  %v3374_v37 = vld [vmem:[#allocation5 + $0x180] sm:$0xf]  ;;  %v3679_v39 = vor.u32 %v4655_v33, %v3678_v32  ;;  %v3427_v32 = vor.u32 %v4589_v27, %v3424_v28  ;;  %v4553_v33 = vld [vmem:[#allocation5 + $0xc4] sm:$0xf] }
  0x31   :  { %v4579_v40 = vld [vmem:[#allocation5 + $0x18c] sm:$0xf0]  ;;  %v3534_v41 = vld [vmem:[#allocation5 + $0x2c0] sm:$0xf]  ;;  %1128 = vmatpush.bf16.msra.mxu2 %v3551_v38  ;;  %v3247_v46 = vor.u32 %v4547_v36, %v3246_v35  ;;  %v4585_v35 = vld [vmem:[#allocation5 + $0x1c4] sm:$0xf] }
  0x32   :  { %v4619_v42 = vld [vmem:[#allocation5 + $0x2cc] sm:$0xf0]  ;;  %1142 = vmatpush.bf16.msra.mxu3 %v3679_v39  ;;  %v3662_v44 = vld [vmem:[#allocation5 + $0x3c0] sm:$0xf]  ;;  %v3375_v50 = vor.u32 %v4579_v40, %v3374_v37  ;;  %v3408_v36 = vld [vmem:[#allocation5 + $0x1d0] sm:$0xf0] }
  0x33   :  { %v3535_v43 = vor.u32 %v4619_v42, %v3534_v41  ;;  %v4651_v45 = vld [vmem:[#allocation5 + $0x3cc] sm:$0xf0]  ;;  %1102 = vmatpush.bf16.msra.mxu0 %v3263_v30  ;;  %v3230_v47 = vld [vmem:[#allocation5 + $0x60] sm:$0xf]  ;;  %v3411_v38 = vor.u32 %v4585_v35, %v3408_v36  ;;  %v3664_v27 = vld [vmem:[#allocation5 + $0x3d0] sm:$0xf0] }
  0x34   :  { %v4543_v48 = vld [vmem:[#allocation5 + $0x6c] sm:$0xf0]  ;;  %v3663_v49 = vor.u32 %v4651_v45, %v3662_v44  ;;  %1116 = vmatpush.bf16.msra.mxu1 %v3391_v34  ;;  %v3518_v51 = vld [vmem:[#allocation5 + $0x2a0] sm:$0xf]  ;;  %v3280_v34 = vld [vmem:[#allocation5 + $0xd0] sm:$0xf0] }
  0x35   :  { %v4615_v52 = vld [vmem:[#allocation5 + $0x2ac] sm:$0xf0]  ;;  %v3646_v53 = vld [vmem:[#allocation5 + $0x3a0] sm:$0xf]  ;;  %1129 = vmatpush.bf16.msra.mxu2 %v3535_v43  ;;  %v3231_v60 = vor.u32 %v4543_v48, %v3230_v47  ;;  %v3283_v37 = vor.u32 %v4553_v33, %v3280_v34  ;;  %v4549_v44 = vld [vmem:[#allocation5 + $0xa4] sm:$0xf] }
  0x36   :  { %v3358_v54 = vld [vmem:[#allocation5 + $0x160] sm:$0xf]  ;;  %v4575_v55 = vld [vmem:[#allocation5 + $0x16c] sm:$0xf0]  ;;  %1143 = vmatpush.bf16.msra.mxu3 %v3663_v49  ;;  %v3519_v57 = vor.u32 %v4615_v52, %v3518_v51  ;;  %v4581_v47 = vld [vmem:[#allocation5 + $0x1a4] sm:$0xf] }
  0x37   :  { %v4647_v56 = vld [vmem:[#allocation5 + $0x3ac] sm:$0xf0]  ;;  %v3502_v59 = vld [vmem:[#allocation5 + $0x280] sm:$0xf]  ;;  %1103 = vmatpush.bf16.msra.mxu0 %v3247_v46  ;;  %v3359_v0 = vor.u32 %v4575_v55, %v3358_v54  ;;  %v3264_v46 = vld [vmem:[#allocation5 + $0xb0] sm:$0xf0] }
  0x38   :  { %v3647_v58 = vor.u32 %v4647_v56, %v3646_v53  ;;  %v4611_v61 = vld [vmem:[#allocation5 + $0x28c] sm:$0xf0]  ;;  %v3630_v62 = vld [vmem:[#allocation5 + $0x380] sm:$0xf]  ;;  %1117 = vmatpush.bf16.msra.mxu1 %v3375_v50  ;;  %v3392_v48 = vld [vmem:[#allocation5 + $0x1b0] sm:$0xf0]  ;;  %v3267_v49 = vor.u32 %v4549_v44, %v3264_v46 }
  0x39   :  { %v4643_v63 = vld [vmem:[#allocation5 + $0x38c] sm:$0xf0]  ;;  %v3214_v1 = vld [vmem:[#allocation5 + $0x40] sm:$0xf]  ;;  %1130 = vmatpush.bf16.msra.mxu2 %v3519_v57  ;;  %v3503_v6 = vor.u32 %v4611_v61, %v3502_v59  ;;  %v3395_v50 = vor.u32 %v4581_v47, %v3392_v48  ;;  %v4545_v56 = vld [vmem:[#allocation5 + $0x84] sm:$0xf] }
  0x3a   :  { %v4539_v2 = vld [vmem:[#allocation5 + $0x4c] sm:$0xf0]  ;;  %v3342_v3 = vld [vmem:[#allocation5 + $0x140] sm:$0xf]  ;;  %1144 = vmatpush.bf16.msra.mxu3 %v3647_v58  ;;  %v3631_v7 = vor.u32 %v4643_v63, %v3630_v62  ;;  %3178 = vmatmul.msk.bf16.vlgmr.msrb.gmra.mxu2 %vm202_vm0, %v5209_v5  ;;  %v3248_v57 = vld [vmem:[#allocation5 + $0x90] sm:$0xf0] }
  0x3b   :  { %v4571_v4 = vld [vmem:[#allocation5 + $0x14c] sm:$0xf0]  ;;  %v3486_v8 = vld [vmem:[#allocation5 + $0x260] sm:$0xf]  ;;  %1104 = vmatpush.bf16.msra.mxu0 %v3231_v60  ;;  %v3215_v9 = vor.u32 %v4539_v2, %v3214_v1  ;;  %v3251_v59 = vor.u32 %v4545_v56, %v3248_v57  ;;  %v4577_v60 = vld [vmem:[#allocation5 + $0x184] sm:$0xf] }
  0x3c   :  { %v4607_v10 = vld [vmem:[#allocation5 + $0x26c] sm:$0xf0]  ;;  %v3614_v11 = vld [vmem:[#allocation5 + $0x360] sm:$0xf]  ;;  %1118 = vmatpush.bf16.msra.mxu1 %v3359_v0  ;;  %v3343_v13 = vor.u32 %v4571_v4, %v3342_v3  ;;  %v3376_v61 = vld [vmem:[#allocation5 + $0x190] sm:$0xf0] }
  0x3d   :  { %v4639_v12 = vld [vmem:[#allocation5 + $0x36c] sm:$0xf0]  ;;  %3179 = vmatmul.msk.bf16.vlgmr.msrb.gmra.mxu3 %vm202_vm0, %v5209_v5  ;;  %v3198_v14 = vld [vmem:[#allocation5 + $0x20] sm:$0xf]  ;;  %1131 = vmatpush.bf16.msra.mxu2 %v3503_v6  ;;  %v3487_v18 = vor.u32 %v4607_v10, %v3486_v8  ;;  %v3296_v5 = vld [vmem:[#allocation5 + $0xf0] sm:$0xf0]  ;;  %v3379_v62 = vor.u32 %v4577_v60, %v3376_v61 }
  0x3e   :  { %v4535_v15 = vld [vmem:[#allocation5 + $0x2c] sm:$0xf0]  ;;  %v3326_v16 = vld [vmem:[#allocation5 + $0x120] sm:$0xf]  ;;  %1145 = vmatpush.bf16.msra.mxu3 %v3631_v7  ;;  %v3615_v19 = vor.u32 %v4639_v12, %v3614_v11  ;;  %v3299_v31 = vor.u32 %v4557_v26, %v3296_v5  ;;  %v4541_v4 = vld [vmem:[#allocation5 + $0x64] sm:$0xf] }
  0x3f   :  { %v4567_v17 = vld [vmem:[#allocation5 + $0x12c] sm:$0xf0]  ;;  %1105 = vmatpush.bf16.msra.mxu0 %v3215_v9  ;;  %v3199_v20 = vor.u32 %v4535_v15, %v3198_v14  ;;  %v3182_v22 = vld [vmem:[#allocation5] sm:$0xf]  ;;  %v3232_v6 = vld [vmem:[#allocation5 + $0x70] sm:$0xf0] }
  0x40   :  { %1119 = vmatpush.bf16.msra.mxu1 %v3343_v13  ;;  %v3327_v21 = vor.u32 %v4567_v17, %v3326_v16  ;;  %v4531_v23 = vld [vmem:[#allocation5 + $0xc] sm:$0xf0]  ;;  %v3310_v24 = vld [vmem:[#allocation5 + $0x100] sm:$0xf]  ;;  %v3235_v8 = vor.u32 %v4541_v4, %v3232_v6  ;;  %v4573_v9 = vld [vmem:[#allocation5 + $0x164] sm:$0xf] }
  0x41   :  { %v4563_v25 = vld [vmem:[#allocation5 + $0x10c] sm:$0xf0]  ;;  %1132 = vmatpush.bf16.msra.mxu2 %v3487_v18  ;;  %v3183_v29 = vor.u32 %v4531_v23, %v3182_v22  ;;  %v3470_v39 = vld [vmem:[#allocation5 + $0x240] sm:$0xf]  ;;  %v3360_v10 = vld [vmem:[#allocation5 + $0x170] sm:$0xf0] }
  0x42   :  { %1146 = vmatpush.bf16.msra.mxu3 %v3615_v19  ;;  %v3311_v30 = vor.u32 %v4563_v25, %v3310_v24  ;;  %v4603_v40 = vld [vmem:[#allocation5 + $0x24c] sm:$0xf0]  ;;  %v3598_v42 = vld [vmem:[#allocation5 + $0x340] sm:$0xf]  ;;  %v4621_v11 = vld [vmem:[#allocation5 + $0x2e4] sm:$0xf]  ;;  %v3363_v12 = vor.u32 %v4573_v9, %v3360_v10 }
  0x43   :  { %1106 = vmatpush.bf16.msra.mxu0 %v3199_v20  ;;  %v3471_v41 = vor.u32 %v4603_v40, %v3470_v39  ;;  %v4635_v43 = vld [vmem:[#allocation5 + $0x34c] sm:$0xf0]  ;;  %v3454_v51 = vld [vmem:[#allocation5 + $0x220] sm:$0xf]  ;;  %v3552_v13 = vld [vmem:[#allocation5 + $0x2f0] sm:$0xf0] }
  0x44   :  { %1120 = vmatpush.bf16.msra.mxu1 %v3327_v21  ;;  %v3599_v45 = vor.u32 %v4635_v43, %v3598_v42  ;;  %v4599_v52 = vld [vmem:[#allocation5 + $0x22c] sm:$0xf0]  ;;  %v3582_v53 = vld [vmem:[#allocation5 + $0x320] sm:$0xf]  ;;  %v4653_v14 = vld [vmem:[#allocation5 + $0x3e4] sm:$0xf]  ;;  %v3555_v16 = vor.u32 %v4621_v11, %v3552_v13 }
  0x45   :  { %1133 = vmatpush.bf16.msra.mxu2 %v3471_v41  ;;  %v3455_v54 = vor.u32 %v4599_v52, %v3454_v51  ;;  %v4631_v55 = vld [vmem:[#allocation5 + $0x32c] sm:$0xf0]  ;;  %v3438_v63 = vld [vmem:[#allocation5 + $0x200] sm:$0xf]  ;;  %v3680_v15 = vld [vmem:[#allocation5 + $0x3f0] sm:$0xf0] }
  0x46   :  { %1147 = vmatpush.bf16.msra.mxu3 %v3599_v45  ;;  %v3583_v58 = vor.u32 %v4631_v55, %v3582_v53  ;;  %v4595_v0 = vld [vmem:[#allocation5 + $0x20c] sm:$0xf0]  ;;  %v3566_v1 = vld [vmem:[#allocation5 + $0x300] sm:$0xf]  ;;  %v3683_v17 = vor.u32 %v4653_v14, %v3680_v15  ;;  %v4537_v18 = vld [vmem:[#allocation5 + $0x44] sm:$0xf] }
  0x47   :  { %1107 = vmatpush.bf16.msra.mxu0 %v3183_v29  ;;  %v3439_v2 = vor.u32 %v4595_v0, %v3438_v63  ;;  %v4627_v3 = vld [vmem:[#allocation5 + $0x30c] sm:$0xf0]  ;;  %v3216_v19 = vld [vmem:[#allocation5 + $0x50] sm:$0xf0]  ;;  %v4569_v20 = vld [vmem:[#allocation5 + $0x144] sm:$0xf] }
  0x48   :  { %1121 = vmatpush.bf16.msra.mxu1 %v3311_v30  ;;  %v3567_v7 = vor.u32 %v4627_v3, %v3566_v1  ;;  %v3219_v21 = vor.u32 %v4537_v18, %v3216_v19  ;;  %v3344_v22 = vld [vmem:[#allocation5 + $0x150] sm:$0xf0]  ;;  %v4617_v23 = vld [vmem:[#allocation5 + $0x2c4] sm:$0xf]  ;;  %v5231_v53 = vld [vmem:[#allocation3] sm:$0xf] }
  0x49   :  { %1134 = vmatpush.bf16.msra.mxu2 %v3455_v54  ;;  %v3536_v24 = vld [vmem:[#allocation5 + $0x2d0] sm:$0xf0]  ;;  %v3347_v25 = vor.u32 %v4569_v20, %v3344_v22  ;;  %v4649_v5 = vld [vmem:[#allocation5 + $0x3c4] sm:$0xf]  ;;  %v169_v60 = vperm.slane %v5231_v53, 0  ;;  %v170_v61 = vperm.slane %v5231_v53, 1 }
  0x4a   :  { %1148 = vmatpush.bf16.msra.mxu3 %v3583_v58  ;;  %v3539_v26 = vor.u32 %v4617_v23, %v3536_v24  ;;  %v3667_v28 = vor.u32 %v4649_v5, %v3664_v27  ;;  %v4533_v29 = vld [vmem:[#allocation5 + $0x24] sm:$0xf]  ;;  %v3200_v30 = vld [vmem:[#allocation5 + $0x30] sm:$0xf0] }
  0x4b   :  { %1156 = vmatpush.bf16.msrb.mxu0 %v3299_v31  ;;  %v4565_v31 = vld [vmem:[#allocation5 + $0x124] sm:$0xf]  ;;  %v3328_v33 = vld [vmem:[#allocation5 + $0x130] sm:$0xf0] }
  0x4c   :  { %1170 = vmatpush.bf16.msrb.mxu1 %v3427_v32  ;;  %v3203_v32 = vor.u32 %v4533_v29, %v3200_v30  ;;  %v4613_v34 = vld [vmem:[#allocation5 + $0x2a4] sm:$0xf]  ;;  %v3520_v35 = vld [vmem:[#allocation5 + $0x2b0] sm:$0xf0]  ;;  %v3331_v36 = vor.u32 %v4565_v31, %v3328_v33  ;;  %v171_v31 = vperm.slane %v5231_v53, 2 }
  0x4d   :  { %1135 = vmatpush.bf16.msra.mxu2 %v3439_v2  ;;  %v3648_v39 = vld [vmem:[#allocation5 + $0x3b0] sm:$0xf0]  ;;  %v4529_v41 = vld [vmem:[#allocation5 + $0x4] sm:$0xf] }
  0x4e   :  { %1149 = vmatpush.bf16.msra.mxu3 %v3567_v7  ;;  %v3184_v42 = vld [vmem:[#allocation5 + $0x10] sm:$0xf0]  ;;  %v4561_v43 = vld [vmem:[#allocation5 + $0x104] sm:$0xf] }
  0x4f   :  { %1157 = vmatpush.bf16.msrb.mxu0 %v3283_v37  ;;  %v3523_v37 = vor.u32 %v4613_v34, %v3520_v35  ;;  %v3187_v44 = vor.u32 %v4529_v41, %v3184_v42  ;;  %v3312_v45 = vld [vmem:[#allocation5 + $0x110] sm:$0xf0]  ;;  %v4609_v46 = vld [vmem:[#allocation5 + $0x284] sm:$0xf] }
  0x50   :  { %1171 = vmatpush.bf16.msrb.mxu1 %v3411_v38  ;;  %v4645_v38 = vld [vmem:[#allocation5 + $0x3a4] sm:$0xf]  ;;  %v3504_v47 = vld [vmem:[#allocation5 + $0x290] sm:$0xf0]  ;;  %v3315_v48 = vor.u32 %v4561_v43, %v3312_v45 }
  0x51   :  { %1184 = vmatpush.bf16.msrb.mxu2 %v3555_v16  ;;  %v3651_v40 = vor.u32 %v4645_v38, %v3648_v39  ;;  %v3632_v51 = vld [vmem:[#allocation5 + $0x390] sm:$0xf0]  ;;  %v4605_v54 = vld [vmem:[#allocation5 + $0x264] sm:$0xf] }
  0x52   :  { %1198 = vmatpush.bf16.msrb.mxu3 %v3683_v17  ;;  %v3488_v55 = vld [vmem:[#allocation5 + $0x270] sm:$0xf0]  ;;  %v4637_v56 = vld [vmem:[#allocation5 + $0x364] sm:$0xf] }
  0x53   :  { %1158 = vmatpush.bf16.msrb.mxu0 %v3267_v49  ;;  %v3507_v49 = vor.u32 %v4609_v46, %v3504_v47  ;;  %v3491_v57 = vor.u32 %v4605_v54, %v3488_v55  ;;  %v3616_v58 = vld [vmem:[#allocation5 + $0x370] sm:$0xf0]  ;;  %v4633_v0 = vld [vmem:[#allocation5 + $0x344] sm:$0xf]  ;;  %v3302_v46 = vld [vmem:[#allocation5 + $0xe8] sm:$0xf] }
  0x54   :  { %1172 = vmatpush.bf16.msrb.mxu1 %v3395_v50  ;;  %v4641_v50 = vld [vmem:[#allocation5 + $0x384] sm:$0xf]  ;;  %v3472_v63 = vld [vmem:[#allocation5 + $0x250] sm:$0xf0]  ;;  %v4560_v47 = vld [vmem:[#allocation5 + $0xf4] sm:$0xf0] }
  0x55   :  { %1185 = vmatpush.bf16.msrb.mxu2 %v3539_v26  ;;  %v3635_v52 = vor.u32 %v4641_v50, %v3632_v51  ;;  %v3600_v2 = vld [vmem:[#allocation5 + $0x350] sm:$0xf0]  ;;  %v4597_v9 = vld [vmem:[#allocation5 + $0x224] sm:$0xf] }
  0x56   :  { %1199 = vmatpush.bf16.msrb.mxu3 %v3667_v28  ;;  %v3603_v4 = vor.u32 %v4633_v0, %v3600_v2  ;;  %v3456_v10 = vld [vmem:[#allocation5 + $0x230] sm:$0xf0]  ;;  %v4629_v11 = vld [vmem:[#allocation5 + $0x324] sm:$0xf]  ;;  %v3414_v0 = vld [vmem:[#allocation5 + $0x1c8] sm:$0xf] }
  0x57   :  { %1159 = vmatpush.bf16.msrb.mxu0 %v3251_v59  ;;  %v3619_v59 = vor.u32 %v4637_v56, %v3616_v58  ;;  %v3584_v13 = vld [vmem:[#allocation5 + $0x330] sm:$0xf0]  ;;  %v4593_v18 = vld [vmem:[#allocation5 + $0x204] sm:$0xf]  ;;  %v3303_v58 = vor.u32 %v4560_v47, %v3302_v46 }
  0x58   :  { %1173 = vmatpush.bf16.msrb.mxu1 %v3379_v62  ;;  %v4601_v62 = vld [vmem:[#allocation5 + $0x244] sm:$0xf]  ;;  %v3587_v15 = vor.u32 %v4629_v11, %v3584_v13  ;;  %v3440_v19 = vld [vmem:[#allocation5 + $0x210] sm:$0xf0]  ;;  %v3398_v13 = vld [vmem:[#allocation5 + $0x1a8] sm:$0xf] }
  0x59   :  { %1186 = vmatpush.bf16.msrb.mxu2 %v3523_v37  ;;  %v3475_v1 = vor.u32 %v4601_v62, %v3472_v63  ;;  %v4625_v20 = vld [vmem:[#allocation5 + $0x304] sm:$0xf]  ;;  %v3568_v22 = vld [vmem:[#allocation5 + $0x310] sm:$0xf0]  ;;  %v3558_v37 = vld [vmem:[#allocation5 + $0x2e8] sm:$0xf] }
  0x5a   :  { %1200 = vmatpush.bf16.msrb.mxu3 %v3651_v40  ;;  %v3571_v26 = vor.u32 %v4625_v20, %v3568_v22 }
  0x5b   :  { %1160 = vmatpush.bf16.msrb.mxu0 %v3235_v8 }
  0x5c   :  { %1174 = vmatpush.bf16.msrb.mxu1 %v3363_v12  ;;  %v3459_v12 = vor.u32 %v4597_v9, %v3456_v10 }
  0x5d   :  { %1187 = vmatpush.bf16.msrb.mxu2 %v3507_v49  ;;  %v4592_v49 = vld [vmem:[#allocation5 + $0x1f4] sm:$0xf0] }
  0x5e   :  { %1201 = vmatpush.bf16.msrb.mxu3 %v3635_v52 }
  0x5f   :  { %1161 = vmatpush.bf16.msrb.mxu0 %v3219_v21  ;;  %v3443_v21 = vor.u32 %v4593_v18, %v3440_v19  ;;  %v4612_v19 = vld [vmem:[#allocation5 + $0x294] sm:$0xf0] }
  0x60   :  { %1175 = vmatpush.bf16.msrb.mxu1 %v3347_v25 }
  0x61   :  { %1188 = vmatpush.bf16.msrb.mxu2 %v3491_v57 }
  0x62   :  { %1202 = vmatpush.bf16.msrb.mxu3 %v3619_v59 }
  0x63   :  { %1162 = vmatpush.bf16.msrb.mxu0 %v3203_v32  ;;  %v172_v32 = vperm.slane %v5231_v53, 3 }
  0x64   :  { %1176 = vmatpush.bf16.msrb.mxu1 %v3331_v36  ;;  %v4576_v36 = vld [vmem:[#allocation5 + $0x174] sm:$0xf0] }
  0x65   :  { %1189 = vmatpush.bf16.msrb.mxu2 %v3475_v1  ;;  %v4588_v1 = vld [vmem:[#allocation5 + $0x1d4] sm:$0xf0] }
  0x66   :  { %1203 = vmatpush.bf16.msrb.mxu3 %v3603_v4 }
  0x67   :  { %1163 = vmatpush.bf16.msrb.mxu0 %v3187_v44 }
  0x68   :  { %1177 = vmatpush.bf16.msrb.mxu1 %v3315_v48  ;;  %v3430_v48 = vld [vmem:[#allocation5 + $0x1e8] sm:$0xf] }
  0x69   :  { %1190 = vmatpush.bf16.msrb.mxu2 %v3459_v12  ;;  %v3431_v59 = vor.u32 %v4592_v49, %v3430_v48  ;;  %v3415_v12 = vor.u32 %v4588_v1, %v3414_v0  ;;  %v3222_v49 = vld [vmem:[#allocation5 + $0x48] sm:$0xf]  ;;  %v4536_v0 = vld [vmem:[#allocation5 + $0x34] sm:$0xf0] }
  0x6a   :  { %1204 = vmatpush.bf16.msrb.mxu3 %v3587_v15 }
  0x6d   :  { %1191 = vmatpush.bf16.msrb.mxu2 %v3443_v21 }
  0x6e   :  { %1205 = vmatpush.bf16.msrb.mxu3 %v3571_v26  ;;  %v4580_v26 = vld [vmem:[#allocation5 + $0x194] sm:$0xf0] }
  0xad   :  { %v215_v3 = vpop.f32.mrf.mxu2 }
  0xae   :  { %v216_v6 = vadd.f32 %v215_v3, %v169_v60 }
  0xb0   :  { %v229_v7 = vpop.f32.mrf.mxu3 }
  0xb1   :  { %v230_v8 = vadd.f32 %v229_v7, %v170_v61  ;;  %v3270_v7 = vld [vmem:[#allocation5 + $0xa8] sm:$0xf] }
  0xb3   :  { %v262_v14 = vpack.c.bf16 %v230_v8, %v216_v6  ;;  %v4552_v8 = vld [vmem:[#allocation5 + $0xb4] sm:$0xf0] }
  0xb5   :  { %v266_v16 = vunpack.c.l.bf16 %v262_v14  ;;  %v267_v17 = vunpack.c.h.bf16 %v262_v14  ;;  %v217_v23 = vpop.f32.mrf.mxu2 }
  0xb6   :  { %v218_v24 = vadd.f32 %v217_v23, %v169_v60  ;;  %v3286_v60 = vld [vmem:[#allocation5 + $0xc8] sm:$0xf] }
  0xb7   :  { %v282_v5 = vmul.f32 0.010009766, %v266_v16  ;;  %v283_v27 = vmul.f32 0.010009766, %v267_v17  ;;  %vm5235_vm1 = vcmp.ge.f32.partialorder %v266_v16, 0.0  ;;  %vm275_vm2 = vcmp.ge.f32.partialorder %v267_v17, 0.0  ;;  %v3254_v23 = vld [vmem:[#allocation5 + $0x88] sm:$0xf] }
  0xb8   :  { %v231_v25 = vpop.f32.mrf.mxu3  ;;  %vm294_vm5 = vmpackc.low %vm275_vm2, %vm5235_vm1  ;;  %v3271_v17 = vor.u32 %v4552_v8, %v3270_v7  ;;  %v4616_v7 = vld [vmem:[#allocation5 + $0x2b4] sm:$0xf0]  ;;  %v3654_v8 = vld [vmem:[#allocation5 + $0x3a8] sm:$0xf] }
  0xb9   :  { %v232_v28 = vadd.f32 %v231_v25, %v170_v61  ;;  %v290_v33 = vpack.c.bf16 %v283_v27, %v282_v5  ;;  %v4556_v61 = vld [vmem:[#allocation5 + $0xd4] sm:$0xf0]  ;;  %v3382_v25 = vld [vmem:[#allocation5 + $0x188] sm:$0xf] }
  0xba   :  { %v3287_v6 = vor.u32 %v4556_v61, %v3286_v60  ;;  %v3206_v61 = vld [vmem:[#allocation5 + $0x28] sm:$0xf] }
  0xbb   :  { %v264_v29 = vpack.c.bf16 %v232_v28, %v218_v24  ;;  %v298_v43 = vsel %vm294_vm5, %v262_v14, %v290_v33  ;;  %v4584_v14 = vld [vmem:[#allocation5 + $0x1b4] sm:$0xf0] }
  0xbc   :  { %v444_v52 = vunpack.c.l.b16 %v298_v43  ;;  %v445_v53 = vunpack.c.h.b16 %v298_v43  ;;  %v3399_v18 = vor.u32 %v4584_v14, %v3398_v13  ;;  %v4548_v24 = vld [vmem:[#allocation5 + $0x94] sm:$0xf0]  ;;  %v3686_v43 = vld [vmem:[#allocation5 + $0x3e8] sm:$0xf] }
  0xbd   :  { %v270_v34 = vunpack.c.l.bf16 %v264_v29  ;;  %v271_v35 = vunpack.c.h.bf16 %v264_v29  ;;  %v243_v40 = vpop.f32.mrf.mxu2  ;;  %v3255_v28 = vor.u32 %v4548_v24, %v3254_v23  ;;  %v4544_v33 = vld [vmem:[#allocation5 + $0x74] sm:$0xf0]  ;;  %v3318_v14 = vld [vmem:[#allocation5 + $0x108] sm:$0xf]  ;;  %v3304_v23 = vld [vmem:[#allocation5 + $0xf8] sm:$0xf0] }
  0xbe   :  { %v244_v41 = vadd.f32 %v243_v40, %v171_v31  ;;  %v4532_v13 = vld [vmem:[#allocation5 + $0x14] sm:$0xf0]  ;;  %v4590_v24 = vld [vmem:[#allocation5 + $0x1ec] sm:$0xf] }
  0xbf   :  { %vm5241_vm3 = vcmp.ge.f32.partialorder %v270_v34, 0.0  ;;  %vm5245_vm4 = vcmp.ge.f32.partialorder %v271_v35, 0.0  ;;  %v286_v38 = vmul.f32 0.010009766, %v270_v34  ;;  %v287_v39 = vmul.f32 0.010009766, %v271_v35  ;;  %v3366_v35 = vld [vmem:[#allocation5 + $0x168] sm:$0xf] }
  0xc0   :  { %v257_v42 = vpop.f32.mrf.mxu3  ;;  %vm296_vm6 = vmpackc.low %vm5245_vm4, %vm5241_vm3  ;;  %v3367_v48 = vor.u32 %v4576_v36, %v3366_v35  ;;  %v4554_v35 = vld [vmem:[#allocation5 + $0xcc] sm:$0xf]  ;;  %v3288_v36 = vld [vmem:[#allocation5 + $0xd8] sm:$0xf0] }
  0xc1   :  { %v292_v44 = vpack.c.bf16 %v287_v39, %v286_v38  ;;  %v258_v45 = vadd.f32 %v257_v42, %v172_v32  ;;  %v4624_v42 = vld [vmem:[#allocation5 + $0x2f4] sm:$0xf0] }
  0xc3   :  { %v300_v50 = vsel %vm296_vm6, %v264_v29, %v292_v44  ;;  %v263_v51 = vpack.c.bf16 %v258_v45, %v244_v41  ;;  %v4656_v44 = vld [vmem:[#allocation5 + $0x3f4] sm:$0xf0] }
  0xc4   :  { %v448_v54 = vunpack.c.l.b16 %v300_v50  ;;  %v449_v55 = vunpack.c.h.b16 %v300_v50  ;;  %v4540_v50 = vld [vmem:[#allocation5 + $0x54] sm:$0xf0] }
  0xc5   :  { %v268_v56 = vunpack.c.l.bf16 %v263_v51  ;;  %v269_v57 = vunpack.c.h.bf16 %v263_v51  ;;  %v245_v2 = vpop.f32.mrf.mxu2 }
  0xc6   :  { %v5255_v62 = vpack.c.b16 %v448_v54, %v444_v52  ;;  %v5257_v63 = vpack.c.b16 %v449_v55, %v445_v53  ;;  %v246_v3 = vadd.f32 %v245_v2, %v171_v31  ;;  %v3383_v31 = vor.u32 %v4580_v26, %v3382_v25  ;;  %v3350_v53 = vld [vmem:[#allocation5 + $0x148] sm:$0xf]  ;;  %v4572_v54 = vld [vmem:[#allocation5 + $0x154] sm:$0xf0]  ;;  %v3432_v25 = vld [vmem:[#allocation5 + $0x1f8] sm:$0xf0] }
  0xc7   :  { %v284_v9 = vmul.f32 0.010009766, %v268_v56  ;;  %v285_v10 = vmul.f32 0.010009766, %v269_v57  ;;  %vm5261_vm7 = vcmp.ge.f32.partialorder %v268_v56, 0.0  ;;  %vm5265_vm8 = vcmp.ge.f32.partialorder %v269_v57, 0.0  ;;  %v3542_v55 = vld [vmem:[#allocation5 + $0x2c8] sm:$0xf] }
  0xc8   :  { %v259_v4 = vpop.f32.mrf.mxu3  ;;  %1108 = vmatmul.bf16.vlgmr.msra.gmra.mxu0 %v5255_v62  ;;  %1122 = vmatmul.bf16.vlgmr.msra.gmra.mxu1 %v5257_v63  ;;  %vm295_vm11 = vmpackc.low %vm5265_vm8, %vm5261_vm7  ;;  %v3687_v52 = vor.u32 %v4656_v44, %v3686_v43  ;;  %v4620_v56 = vld [vmem:[#allocation5 + $0x2d4] sm:$0xf0]  ;;  %v3670_v57 = vld [vmem:[#allocation5 + $0x3c8] sm:$0xf]  ;;  %v3351_v60 = vor.u32 %v4572_v54, %v3350_v53  ;;  %v3291_v43 = vor.u32 %v4554_v35, %v3288_v36 }
  0xc9   :  { %v260_v11 = vadd.f32 %v259_v4, %v172_v32  ;;  %1212 = vmatpush.bf16.msra.mxu0 %v3303_v58  ;;  %1226 = vmatpush.bf16.msra.mxu1 %v3431_v59  ;;  %v291_v20 = vpack.c.bf16 %v285_v10, %v284_v9  ;;  %v3238_v32 = vld [vmem:[#allocation5 + $0x68] sm:$0xf]  ;;  %v4652_v58 = vld [vmem:[#allocation5 + $0x3d4] sm:$0xf0]  ;;  %v3223_v59 = vor.u32 %v4540_v50, %v3222_v49  ;;  %v4550_v49 = vld [vmem:[#allocation5 + $0xac] sm:$0xf] }
  0xca   :  { %v3239_v47 = vor.u32 %v4544_v33, %v3238_v32  ;;  %v3543_v1 = vor.u32 %v4620_v56, %v3542_v55  ;;  %v3671_v2 = vor.u32 %v4652_v58, %v3670_v57  ;;  %v4568_v4 = vld [vmem:[#allocation5 + $0x134] sm:$0xf0]  ;;  %v3207_v10 = vor.u32 %v4536_v0, %v3206_v61  ;;  %v3622_v33 = vld [vmem:[#allocation5 + $0x368] sm:$0xf]  ;;  %v3272_v50 = vld [vmem:[#allocation5 + $0xb8] sm:$0xf0] }
  0xcb   :  { %v265_v15 = vpack.c.bf16 %v260_v11, %v246_v3  ;;  %v299_v29 = vsel %vm295_vm11, %v263_v51, %v291_v20  ;;  %v3559_v51 = vor.u32 %v4624_v42, %v3558_v37  ;;  %v3334_v3 = vld [vmem:[#allocation5 + $0x128] sm:$0xf]  ;;  %v4648_v9 = vld [vmem:[#allocation5 + $0x3b4] sm:$0xf0]  ;;  %v3435_v32 = vor.u32 %v4590_v24, %v3432_v25  ;;  %v4586_v37 = vld [vmem:[#allocation5 + $0x1cc] sm:$0xf] }
  0xcc   :  { %v446_v38 = vunpack.c.l.b16 %v299_v29  ;;  %v447_v39 = vunpack.c.h.b16 %v299_v29  ;;  %v3335_v11 = vor.u32 %v4568_v4, %v3334_v3  ;;  %v3655_v16 = vor.u32 %v4648_v9, %v3654_v8  ;;  %v3638_v20 = vld [vmem:[#allocation5 + $0x388] sm:$0xf]  ;;  %v4604_v42 = vld [vmem:[#allocation5 + $0x254] sm:$0xf0]  ;;  %v4546_v61 = vld [vmem:[#allocation5 + $0x8c] sm:$0xf] }
  0xcd   :  { %v272_v21 = vunpack.c.l.bf16 %v265_v15  ;;  %v273_v22 = vunpack.c.h.bf16 %v265_v15  ;;  %1213 = vmatpush.bf16.msra.mxu0 %v3287_v6  ;;  %1227 = vmatpush.bf16.msra.mxu1 %v3415_v12  ;;  %v3526_v6 = vld [vmem:[#allocation5 + $0x2a8] sm:$0xf]  ;;  %v4600_v56 = vld [vmem:[#allocation5 + $0x234] sm:$0xf0]  ;;  %v3275_v57 = vor.u32 %v4550_v49, %v3272_v50  ;;  %v3256_v0 = vld [vmem:[#allocation5 + $0x98] sm:$0xf0] }
  0xce   :  { %v3190_v12 = vld [vmem:[#allocation5 + $0x8] sm:$0xf]  ;;  %v3259_v9 = vor.u32 %v4546_v61, %v3256_v0  ;;  %v4538_v24 = vld [vmem:[#allocation5 + $0x4c] sm:$0xf]  ;;  %v3224_v25 = vld [vmem:[#allocation5 + $0x58] sm:$0xf0] }
  0xcf   :  { %vm280_vm9 = vcmp.ge.f32.partialorder %v272_v21, 0.0  ;;  %vm281_vm10 = vcmp.ge.f32.partialorder %v273_v22, 0.0  ;;  %v288_v5 = vmul.f32 0.010009766, %v272_v21  ;;  %v289_v27 = vmul.f32 0.010009766, %v273_v22  ;;  %v4644_v21 = vld [vmem:[#allocation5 + $0x394] sm:$0xf0] }
  0xd0   :  { %vm297_vm12 = vmpackc.low %vm281_vm10, %vm280_vm9  ;;  %v4558_v22 = vld [vmem:[#allocation5 + $0xec] sm:$0xf]  ;;  %v3191_v26 = vor.u32 %v4532_v13, %v3190_v12  ;;  %v3494_v29 = vld [vmem:[#allocation5 + $0x268] sm:$0xf] }
  0xd1   :  { %v293_v30 = vpack.c.bf16 %v289_v27, %v288_v5  ;;  %1214 = vmatpush.bf16.msra.mxu0 %v3271_v17  ;;  %1228 = vmatpush.bf16.msra.mxu1 %v3399_v18  ;;  %v4564_v17 = vld [vmem:[#allocation5 + $0x114] sm:$0xf0]  ;;  %v3510_v18 = vld [vmem:[#allocation5 + $0x288] sm:$0xf]  ;;  %v4542_v12 = vld [vmem:[#allocation5 + $0x6c] sm:$0xf] }
  0xd2   :  { %v3319_v5 = vor.u32 %v4564_v17, %v3318_v14  ;;  %v3511_v27 = vor.u32 %v4612_v19, %v3510_v18  ;;  %v3462_v55 = vld [vmem:[#allocation5 + $0x228] sm:$0xf]  ;;  %v3240_v13 = vld [vmem:[#allocation5 + $0x78] sm:$0xf0]  ;;  %v4574_v14 = vld [vmem:[#allocation5 + $0x16c] sm:$0xf] }
  0xd3   :  { %v301_v34 = vsel %vm297_vm12, %v265_v15, %v293_v30  ;;  %v3527_v15 = vor.u32 %v4616_v7, %v3526_v6  ;;  %v4608_v30 = vld [vmem:[#allocation5 + $0x274] sm:$0xf0]  ;;  %v3463_v3 = vor.u32 %v4600_v56, %v3462_v55  ;;  %v3446_v6 = vld [vmem:[#allocation5 + $0x208] sm:$0xf]  ;;  %v3560_v17 = vld [vmem:[#allocation5 + $0x2f8] sm:$0xf0] }
  0xd4   :  { %v450_v40 = vunpack.c.l.b16 %v301_v34  ;;  %v451_v41 = vunpack.c.h.b16 %v301_v34  ;;  %v4640_v34 = vld [vmem:[#allocation5 + $0x374] sm:$0xf0]  ;;  %v3574_v8 = vld [vmem:[#allocation5 + $0x308] sm:$0xf]  ;;  %v4654_v18 = vld [vmem:[#allocation5 + $0x3ec] sm:$0xf] }
  0xd5   :  { %1215 = vmatpush.bf16.msra.mxu0 %v3255_v28  ;;  %1229 = vmatpush.bf16.msra.mxu1 %v3383_v31  ;;  %v3639_v28 = vor.u32 %v4644_v21, %v3638_v20  ;;  %v3307_v31 = vor.u32 %v4558_v22, %v3304_v23  ;;  %v4596_v7 = vld [vmem:[#allocation5 + $0x214] sm:$0xf0]  ;;  %v3688_v19 = vld [vmem:[#allocation5 + $0x3f8] sm:$0xf0]  ;;  %v3243_v22 = vor.u32 %v4542_v12, %v3240_v13  ;;  %v4534_v35 = vld [vmem:[#allocation5 + $0x2c] sm:$0xf] }
  0xd6   :  { %v5273_v45 = vpack.c.b16 %v450_v40, %v446_v38  ;;  %v5275_v46 = vpack.c.b16 %v451_v41, %v447_v39  ;;  %v3416_v38 = vld [vmem:[#allocation5 + $0x1d8] sm:$0xf0]  ;;  %v3495_v39 = vor.u32 %v4608_v30, %v3494_v29  ;;  %v3623_v40 = vor.u32 %v4640_v34, %v3622_v33  ;;  %v3478_v41 = vld [vmem:[#allocation5 + $0x248] sm:$0xf]  ;;  %v4618_v29 = vld [vmem:[#allocation5 + $0x2cc] sm:$0xf] }
  0xd7   :  { %v3419_v44 = vor.u32 %v4586_v37, %v3416_v38  ;;  %v3479_v53 = vor.u32 %v4604_v42, %v3478_v41  ;;  %v3447_v20 = vor.u32 %v4596_v7, %v3446_v6  ;;  %v3544_v30 = vld [vmem:[#allocation5 + $0x2d8] sm:$0xf0]  ;;  %v3227_v33 = vor.u32 %v4538_v24, %v3224_v25  ;;  %v4614_v41 = vld [vmem:[#allocation5 + $0x2ac] sm:$0xf]  ;;  %v3806_v24 = vld [vmem:[#allocation8 + $0xe0] sm:$0xf] }
  0xd8   :  { %1136 = vmatmul.bf16.vlgmr.msra.gmra.mxu2 %v5273_v45  ;;  %1150 = vmatmul.bf16.vlgmr.msra.gmra.mxu3 %v5275_v46  ;;  %v3208_v36 = vld [vmem:[#allocation5 + $0x38] sm:$0xf0]  ;;  %v3547_v37 = vor.u32 %v4618_v29, %v3544_v30  ;;  %v4530_v49 = vld [vmem:[#allocation5 + $0xc] sm:$0xf]  ;;  %v4687_v25 = vld [vmem:[#allocation8 + $0xec] sm:$0xf0] }
  0xd9   :  { %1164 = vmatmul.bf16.vlgmr.msrb.gmra.mxu0 %v5255_v62  ;;  %1178 = vmatmul.bf16.vlgmr.msrb.gmra.mxu1 %v5257_v63  ;;  %v3528_v42 = vld [vmem:[#allocation5 + $0x2b8] sm:$0xf0]  ;;  %v4610_v55 = vld [vmem:[#allocation5 + $0x28c] sm:$0xf]  ;;  %v3790_v29 = vld [vmem:[#allocation8 + $0xc0] sm:$0xf] }
  0xda   :  { %1216 = vmatpush.bf16.msra.mxu0 %v3239_v47  ;;  %1230 = vmatpush.bf16.msra.mxu1 %v3367_v48  ;;  %v3606_v47 = vld [vmem:[#allocation5 + $0x348] sm:$0xf]  ;;  %v4636_v48 = vld [vmem:[#allocation5 + $0x354] sm:$0xf0]  ;;  %v3192_v50 = vld [vmem:[#allocation5 + $0x18] sm:$0xf0] }
  0xdb   :  { %1240 = vmatpush.bf16.msra.mxu2 %v3559_v51  ;;  %1254 = vmatpush.bf16.msra.mxu3 %v3687_v52  ;;  %v4582_v51 = vld [vmem:[#allocation5 + $0x1ac] sm:$0xf]  ;;  %v3400_v52 = vld [vmem:[#allocation5 + $0x1b8] sm:$0xf0]  ;;  %v3607_v54 = vor.u32 %v4636_v48, %v3606_v47  ;;  %v3211_v47 = vor.u32 %v4534_v35, %v3208_v36  ;;  %v4683_v30 = vld [vmem:[#allocation8 + $0xcc] sm:$0xf0] }
  0xdc   :  { %v3403_v58 = vor.u32 %v4582_v51, %v3400_v52  ;;  %v3531_v51 = vor.u32 %v4614_v41, %v3528_v42  ;;  %v3512_v56 = vld [vmem:[#allocation5 + $0x298] sm:$0xf0]  ;;  %v4679_v35 = vld [vmem:[#allocation8 + $0xac] sm:$0xf0]  ;;  %v3886_v41 = vld [vmem:[#allocation8 + $0x180] sm:$0xf] }
  0xdd   :  { %v3515_v61 = vor.u32 %v4610_v55, %v3512_v56  ;;  %v3854_v55 = vld [vmem:[#allocation8 + $0x140] sm:$0xf] }
  0xde   :  { %1217 = vmatpush.bf16.msra.mxu0 %v3223_v59  ;;  %1231 = vmatpush.bf16.msra.mxu1 %v3351_v60  ;;  %v3590_v59 = vld [vmem:[#allocation5 + $0x328] sm:$0xf]  ;;  %v4632_v60 = vld [vmem:[#allocation5 + $0x334] sm:$0xf0] }
  0xdf   :  { %1241 = vmatpush.bf16.msra.mxu2 %v3543_v1  ;;  %1255 = vmatpush.bf16.msra.mxu3 %v3671_v2  ;;  %v4578_v1 = vld [vmem:[#allocation5 + $0x18c] sm:$0xf]  ;;  %v3384_v2 = vld [vmem:[#allocation5 + $0x198] sm:$0xf0]  ;;  %v3591_v4 = vor.u32 %v4632_v60, %v3590_v59  ;;  %v3195_v59 = vor.u32 %v4530_v49, %v3192_v50  ;;  %v3870_v49 = vld [vmem:[#allocation8 + $0x160] sm:$0xf] }
  0xe2   :  { %1218 = vmatpush.bf16.msra.mxu0 %v3207_v10  ;;  %1232 = vmatpush.bf16.msra.mxu1 %v3335_v11  ;;  %v3387_v10 = vor.u32 %v4578_v1, %v3384_v2  ;;  %v4628_v11 = vld [vmem:[#allocation5 + $0x314] sm:$0xf0]  ;;  %v4606_v1 = vld [vmem:[#allocation5 + $0x26c] sm:$0xf]  ;;  %v3496_v2 = vld [vmem:[#allocation5 + $0x278] sm:$0xf0] }
  0xe3   :  { %1242 = vmatpush.bf16.msra.mxu2 %v3527_v15  ;;  %1256 = vmatpush.bf16.msra.mxu3 %v3655_v16  ;;  %v3368_v15 = vld [vmem:[#allocation5 + $0x178] sm:$0xf0]  ;;  %v4622_v16 = vld [vmem:[#allocation5 + $0x2ec] sm:$0xf]  ;;  %v3575_v21 = vor.u32 %v4628_v11, %v3574_v8  ;;  %v3499_v6 = vor.u32 %v4606_v1, %v3496_v2  ;;  %v4695_v1 = vld [vmem:[#allocation8 + $0x12c] sm:$0xf0] }
  0xe4   :  { %v3371_v23 = vor.u32 %v4574_v14, %v3368_v15  ;;  %v4602_v8 = vld [vmem:[#allocation5 + $0x24c] sm:$0xf]  ;;  %v3608_v11 = vld [vmem:[#allocation5 + $0x358] sm:$0xf0] }
  0xe5   :  { %v4598_v14 = vld [vmem:[#allocation5 + $0x22c] sm:$0xf]  ;;  %v3464_v15 = vld [vmem:[#allocation5 + $0x238] sm:$0xf0] }
  0xe6   :  { %1219 = vmatpush.bf16.msra.mxu0 %v3191_v26  ;;  %1233 = vmatpush.bf16.msra.mxu1 %v3319_v5  ;;  %v3563_v26 = vor.u32 %v4622_v16, %v3560_v17  ;;  %v3691_v5 = vor.u32 %v4654_v18, %v3688_v19  ;;  %v4630_v16 = vld [vmem:[#allocation5 + $0x32c] sm:$0xf]  ;;  %v3592_v17 = vld [vmem:[#allocation5 + $0x338] sm:$0xf0]  ;;  %v3467_v18 = vor.u32 %v4598_v14, %v3464_v15  ;;  %v3936_v14 = vld [vmem:[#allocation8 + $0x1f0] sm:$0xf0] }
  0xe7   :  { %1243 = vmatpush.bf16.msra.mxu2 %v3511_v27  ;;  %1257 = vmatpush.bf16.msra.mxu3 %v3639_v28  ;;  %v4570_v27 = vld [vmem:[#allocation5 + $0x14c] sm:$0xf]  ;;  %v3352_v28 = vld [vmem:[#allocation5 + $0x158] sm:$0xf0]  ;;  %v3595_v19 = vor.u32 %v4630_v16, %v3592_v17  ;;  %v4681_v16 = vld [vmem:[#allocation8 + $0xc4] sm:$0xf] }
  0xe8   :  { %1192 = vmatmul.bf16.vlgmr.msrb.gmra.mxu2 %v5273_v45  ;;  %1206 = vmatmul.bf16.vlgmr.msrb.gmra.mxu3 %v5275_v46  ;;  %v3355_v34 = vor.u32 %v4570_v27, %v3352_v28  ;;  %v4719_v27 = vld [vmem:[#allocation8 + $0x1ec] sm:$0xf0]  ;;  %v3792_v17 = vld [vmem:[#allocation8 + $0xd0] sm:$0xf0] }
  0xe9   :  { %1220 = vmatmul.bf16.vlgmr.msra.gmra.mxu0 %v5255_v62  ;;  %1234 = vmatmul.bf16.vlgmr.msra.gmra.mxu1 %v5257_v63 }
  0xea   :  { %1268 = vmatpush.bf16.msrb.mxu0 %v3307_v31  ;;  %1282 = vmatpush.bf16.msrb.mxu1 %v3435_v32  ;;  %v4650_v31 = vld [vmem:[#allocation5 + $0x3cc] sm:$0xf]  ;;  %v3672_v32 = vld [vmem:[#allocation5 + $0x3d8] sm:$0xf0] }
  0xeb   :  { %1244 = vmatpush.bf16.msra.mxu2 %v3495_v39  ;;  %1258 = vmatpush.bf16.msra.mxu3 %v3623_v40  ;;  %v3675_v38 = vor.u32 %v4650_v31, %v3672_v32  ;;  %v4566_v39 = vld [vmem:[#allocation5 + $0x12c] sm:$0xf]  ;;  %v3336_v40 = vld [vmem:[#allocation5 + $0x138] sm:$0xf0]  ;;  %v3918_v31 = vld [vmem:[#allocation8 + $0x1c0] sm:$0xf]  ;;  %v3791_v32 = vor.u32 %v4683_v30, %v3790_v29 }
  0xec   :  { %v3339_v48 = vor.u32 %v4566_v39, %v3336_v40  ;;  %v3758_v39 = vld [vmem:[#allocation8 + $0x80] sm:$0xf]  ;;  %v4675_v40 = vld [vmem:[#allocation8 + $0x8c] sm:$0xf0]  ;;  %v4705_v29 = vld [vmem:[#allocation8 + $0x184] sm:$0xf] }
  0xed   :  { %v3759_v42 = vor.u32 %v4675_v40, %v3758_v39 }
  0xee   :  { %1269 = vmatpush.bf16.msrb.mxu0 %v3291_v43  ;;  %1283 = vmatpush.bf16.msrb.mxu1 %v3419_v44  ;;  %v4646_v43 = vld [vmem:[#allocation5 + $0x3ac] sm:$0xf]  ;;  %v3656_v44 = vld [vmem:[#allocation5 + $0x3b8] sm:$0xf0] }
  0xef   :  { %1245 = vmatpush.bf16.msra.mxu2 %v3479_v53  ;;  %1259 = vmatpush.bf16.msra.mxu3 %v3607_v54  ;;  %v3659_v52 = vor.u32 %v4646_v43, %v3656_v44  ;;  %v4562_v53 = vld [vmem:[#allocation5 + $0x10c] sm:$0xf]  ;;  %v3320_v54 = vld [vmem:[#allocation5 + $0x118] sm:$0xf0]  ;;  %v4707_v43 = vld [vmem:[#allocation8 + $0x18c] sm:$0xf0] }
  0xf0   :  { %v3323_v60 = vor.u32 %v4562_v53, %v3320_v54  ;;  %v3887_v44 = vor.u32 %v4707_v43, %v3886_v41  ;;  %v3726_v53 = vld [vmem:[#allocation8 + $0x40] sm:$0xf]  ;;  %v4667_v54 = vld [vmem:[#allocation8 + $0x4c] sm:$0xf0]  ;;  %v4701_v41 = vld [vmem:[#allocation8 + $0x164] sm:$0xf] }
  0xf1   :  { %v3727_v56 = vor.u32 %v4667_v54, %v3726_v53  ;;  %v5297_v43 = vld [vmem:[#allocation7] sm:$0xf]  ;;  %v4779_v53 = vld [vmem:[#allocation8 + $0x3cc] sm:$0xf0]  ;;  %v4665_v54 = vld [vmem:[#allocation8 + $0x44] sm:$0xf] }
  0xf2   :  { %1270 = vmatpush.bf16.msrb.mxu0 %v3275_v57  ;;  %1284 = vmatpush.bf16.msrb.mxu1 %v3403_v58  ;;  %v4642_v57 = vld [vmem:[#allocation5 + $0x38c] sm:$0xf]  ;;  %v3640_v58 = vld [vmem:[#allocation5 + $0x398] sm:$0xf0] }
  0xf3   :  { %1246 = vmatpush.bf16.msra.mxu2 %v3463_v3  ;;  %1260 = vmatpush.bf16.msra.mxu3 %v3591_v4  ;;  %v3643_v0 = vor.u32 %v4642_v57, %v3640_v58  ;;  %v4638_v3 = vld [vmem:[#allocation5 + $0x36c] sm:$0xf]  ;;  %v3624_v4 = vld [vmem:[#allocation5 + $0x378] sm:$0xf0]  ;;  %v4699_v57 = vld [vmem:[#allocation8 + $0x14c] sm:$0xf0] }
  0xf4   :  { %v3627_v7 = vor.u32 %v4638_v3, %v3624_v4  ;;  %v3855_v58 = vor.u32 %v4699_v57, %v3854_v55  ;;  %v3694_v3 = vld [vmem:[#allocation8] sm:$0xf]  ;;  %v4659_v4 = vld [vmem:[#allocation8 + $0xc] sm:$0xf0]  ;;  %v3728_v55 = vld [vmem:[#allocation8 + $0x50] sm:$0xf0] }
  0xf5   :  { %v3731_v57 = vor.u32 %v4665_v54, %v3728_v55 }
  0xf6   :  { %1271 = vmatpush.bf16.msrb.mxu0 %v3259_v9  ;;  %1285 = vmatpush.bf16.msrb.mxu1 %v3387_v10  ;;  %v3480_v9 = vld [vmem:[#allocation5 + $0x258] sm:$0xf0]  ;;  %v4634_v10 = vld [vmem:[#allocation5 + $0x34c] sm:$0xf] }
  0xf7   :  { %1247 = vmatpush.bf16.msra.mxu2 %v3447_v20  ;;  %1261 = vmatpush.bf16.msra.mxu3 %v3575_v21  ;;  %v3483_v12 = vor.u32 %v4602_v8, %v3480_v9  ;;  %v3611_v13 = vor.u32 %v4634_v10, %v3608_v11  ;;  %v4594_v20 = vld [vmem:[#allocation5 + $0x20c] sm:$0xf]  ;;  %v3448_v21 = vld [vmem:[#allocation5 + $0x218] sm:$0xf0]  ;;  %v4691_v8 = vld [vmem:[#allocation8 + $0x10c] sm:$0xf0] }
  0xf8   :  { %v4685_v9 = vld [vmem:[#allocation8 + $0xe4] sm:$0xf]  ;;  %v3808_v10 = vld [vmem:[#allocation8 + $0xf0] sm:$0xf0] }
  0xfa   :  { %1272 = vmatpush.bf16.msrb.mxu0 %v3243_v22  ;;  %1286 = vmatpush.bf16.msrb.mxu1 %v3371_v23  ;;  %v4626_v22 = vld [vmem:[#allocation5 + $0x30c] sm:$0xf]  ;;  %v3576_v23 = vld [vmem:[#allocation5 + $0x318] sm:$0xf0] }
  0xfb   :  { %1296 = vmatpush.bf16.msrb.mxu2 %v3563_v26  ;;  %1310 = vmatpush.bf16.msrb.mxu3 %v3691_v5  ;;  %v3934_v26 = vld [vmem:[#allocation8 + $0x1e0] sm:$0xf]  ;;  %v3807_v5 = vor.u32 %v4687_v25, %v3806_v24  ;;  %v3904_v25 = vld [vmem:[#allocation8 + $0x1b0] sm:$0xf0] }
  0xfc   :  { %1248 = vmatmul.bf16.vlgmr.msra.gmra.mxu2 %v5273_v45  ;;  %1262 = vmatmul.bf16.vlgmr.msra.gmra.mxu3 %v5275_v46  ;;  %v3935_v28 = vor.u32 %v4719_v27, %v3934_v26  ;;  %v4673_v27 = vld [vmem:[#allocation8 + $0x84] sm:$0xf] }
  0xfe   :  { %1273 = vmatpush.bf16.msrb.mxu0 %v3227_v33  ;;  %1287 = vmatpush.bf16.msrb.mxu1 %v3355_v34  ;;  %v4715_v33 = vld [vmem:[#allocation8 + $0x1cc] sm:$0xf0]  ;;  %v3774_v34 = vld [vmem:[#allocation8 + $0xa0] sm:$0xf] }
  0xff   :  { %1297 = vmatpush.bf16.msrb.mxu2 %v3547_v37  ;;  %1311 = vmatpush.bf16.msrb.mxu3 %v3675_v38  ;;  %v3919_v36 = vor.u32 %v4715_v33, %v3918_v31  ;;  %v3902_v37 = vld [vmem:[#allocation8 + $0x1a0] sm:$0xf]  ;;  %v3888_v31 = vld [vmem:[#allocation8 + $0x190] sm:$0xf0] }
 0x102   :  { %1274 = vmatpush.bf16.msrb.mxu0 %v3211_v47  ;;  %1288 = vmatpush.bf16.msrb.mxu1 %v3339_v48  ;;  %v3742_v47 = vld [vmem:[#allocation8 + $0x60] sm:$0xf]  ;;  %v4671_v48 = vld [vmem:[#allocation8 + $0x6c] sm:$0xf0] }
 0x103   :  { %1298 = vmatpush.bf16.msrb.mxu2 %v3531_v51  ;;  %1312 = vmatpush.bf16.msrb.mxu3 %v3659_v52  ;;  %v3743_v50 = vor.u32 %v4671_v48, %v3742_v47  ;;  %v4703_v51 = vld [vmem:[#allocation8 + $0x16c] sm:$0xf0] }
 0x104   :  { %v3871_v52 = vor.u32 %v4703_v51, %v3870_v49  ;;  %v4046_v49 = vld [vmem:[#allocation8 + $0x2c0] sm:$0xf] }
 0x105   :  { %v4174_v51 = vld [vmem:[#allocation8 + $0x3c0] sm:$0xf] }
 0x106   :  { %1275 = vmatpush.bf16.msrb.mxu0 %v3195_v59  ;;  %1289 = vmatpush.bf16.msrb.mxu1 %v3323_v60  ;;  %v3710_v59 = vld [vmem:[#allocation8 + $0x20] sm:$0xf]  ;;  %v4663_v60 = vld [vmem:[#allocation8 + $0x2c] sm:$0xf0] }
 0x107   :  { %1299 = vmatpush.bf16.msrb.mxu2 %v3515_v61  ;;  %1313 = vmatpush.bf16.msrb.mxu3 %v3643_v0  ;;  %v3838_v61 = vld [vmem:[#allocation8 + $0x120] sm:$0xf]  ;;  %v3711_v0 = vor.u32 %v4663_v60, %v3710_v59  ;;  %v3856_v59 = vld [vmem:[#allocation8 + $0x150] sm:$0xf0]  ;;  %v432_v60 = vperm.slane %v5297_v43, 0 }
 0x108   :  { %v3839_v2 = vor.u32 %v4695_v1, %v3838_v61  ;;  %v4030_v1 = vld [vmem:[#allocation8 + $0x2a0] sm:$0xf] }
 0x109   :  { %1276 = vmatmul.bf16.vlgmr.msrb.gmra.mxu0 %v5255_v62  ;;  %1290 = vmatmul.bf16.vlgmr.msrb.gmra.mxu1 %v5257_v63  ;;  %v3451_v62 = vor.u32 %v4594_v20, %v3448_v21  ;;  %v3579_v63 = vor.u32 %v4626_v22, %v3576_v23  ;;  %v3795_v20 = vor.u32 %v4681_v16, %v3792_v17  ;;  %v3920_v21 = vld [vmem:[#allocation8 + $0x1d0] sm:$0xf0]  ;;  %v4677_v23 = vld [vmem:[#allocation8 + $0xa4] sm:$0xf] }
 0x10a   :  { %2162 = vmatpush.bf16.msra.mxu0 %v3807_v5  ;;  %2176 = vmatpush.bf16.msra.mxu1 %v3935_v28  ;;  %v3760_v28 = vld [vmem:[#allocation8 + $0x90] sm:$0xf0] }
 0x10b   :  { %1300 = vmatpush.bf16.msrb.mxu2 %v3499_v6  ;;  %1314 = vmatpush.bf16.msrb.mxu3 %v3627_v7  ;;  %v3822_v6 = vld [vmem:[#allocation8 + $0x100] sm:$0xf]  ;;  %v3695_v7 = vor.u32 %v4659_v4, %v3694_v3  ;;  %v3763_v30 = vor.u32 %v4673_v27, %v3760_v28  ;;  %v4689_v27 = vld [vmem:[#allocation8 + $0x104] sm:$0xf]  ;;  %v3824_v28 = vld [vmem:[#allocation8 + $0x110] sm:$0xf0] }
 0x10c   :  { %v3823_v11 = vor.u32 %v4691_v8, %v3822_v6  ;;  %v4158_v3 = vld [vmem:[#allocation8 + $0x3a0] sm:$0xf]  ;;  %v4775_v6 = vld [vmem:[#allocation8 + $0x3ac] sm:$0xf0]  ;;  %v3712_v8 = vld [vmem:[#allocation8 + $0x30] sm:$0xf0] }
 0x10e   :  { %2163 = vmatpush.bf16.msra.mxu0 %v3791_v32  ;;  %2177 = vmatpush.bf16.msra.mxu1 %v3919_v36  ;;  %v3891_v32 = vor.u32 %v4705_v29, %v3888_v31  ;;  %v4190_v36 = vld [vmem:[#allocation8 + $0x3e0] sm:$0xf] }
 0x10f   :  { %1301 = vmatpush.bf16.msrb.mxu2 %v3483_v12  ;;  %1315 = vmatpush.bf16.msrb.mxu3 %v3611_v13  ;;  %v3811_v12 = vor.u32 %v4685_v9, %v3808_v10  ;;  %v4717_v13 = vld [vmem:[#allocation8 + $0x1e4] sm:$0xf]  ;;  %v4159_v10 = vor.u32 %v4775_v6, %v4158_v3  ;;  %v3998_v31 = vld [vmem:[#allocation8 + $0x260] sm:$0xf] }
 0x110   :  { %v3939_v15 = vor.u32 %v4717_v13, %v3936_v14  ;;  %v3840_v13 = vld [vmem:[#allocation8 + $0x130] sm:$0xf0]  ;;  %v433_v14 = vperm.slane %v5297_v43, 1 }
 0x113   :  { %1302 = vmatpush.bf16.msrb.mxu2 %v3467_v18  ;;  %1316 = vmatpush.bf16.msrb.mxu3 %v3595_v19  ;;  %v4713_v18 = vld [vmem:[#allocation8 + $0x1c4] sm:$0xf] }
 0x114   :  { %v3923_v22 = vor.u32 %v4713_v18, %v3920_v21  ;;  %v4014_v18 = vld [vmem:[#allocation8 + $0x280] sm:$0xf] }
 0x115   :  { %v4142_v21 = vld [vmem:[#allocation8 + $0x380] sm:$0xf] }
 0x117   :  { %1303 = vmatpush.bf16.msrb.mxu2 %v3451_v62  ;;  %1317 = vmatpush.bf16.msrb.mxu3 %v3579_v63  ;;  %v3776_v62 = vld [vmem:[#allocation8 + $0xb0] sm:$0xf0]  ;;  %v4709_v63 = vld [vmem:[#allocation8 + $0x1a4] sm:$0xf] }
 0x118   :  { %v3779_v24 = vor.u32 %v4677_v23, %v3776_v62  ;;  %v3907_v26 = vor.u32 %v4709_v63, %v3904_v25  ;;  %v4771_v62 = vld [vmem:[#allocation8 + $0x38c] sm:$0xf0]  ;;  %v4657_v63 = vld [vmem:[#allocation8 + $0x4] sm:$0xf] }
 0x119   :  { %v4143_v25 = vor.u32 %v4771_v62, %v4142_v21  ;;  %v4192_v62 = vld [vmem:[#allocation8 + $0x3f0] sm:$0xf0] }
 0x11a   :  { %1304 = vmatmul.bf16.vlgmr.msrb.gmra.mxu2 %v5273_v45  ;;  %1318 = vmatmul.bf16.vlgmr.msrb.gmra.mxu3 %v5275_v46  ;;  %v4711_v45 = vld [vmem:[#allocation8 + $0x1ac] sm:$0xf0]  ;;  %v3775_v46 = vor.u32 %v4679_v35, %v3774_v34  ;;  %v4062_v34 = vld [vmem:[#allocation8 + $0x2e0] sm:$0xf] }
 0x11b   :  { %v3903_v38 = vor.u32 %v4711_v45, %v3902_v37  ;;  %v4751_v35 = vld [vmem:[#allocation8 + $0x2ec] sm:$0xf0] }
 0x11c   :  { %2164 = vmatpush.bf16.msra.mxu0 %v3775_v46  ;;  %v4063_v37 = vor.u32 %v4751_v35, %v4062_v34  ;;  %v4783_v45 = vld [vmem:[#allocation8 + $0x3ec] sm:$0xf0]  ;;  %v4669_v46 = vld [vmem:[#allocation8 + $0x64] sm:$0xf]  ;;  %v4126_v34 = vld [vmem:[#allocation8 + $0x360] sm:$0xf] }
 0x11d   :  { %2178 = vmatpush.bf16.msra.mxu1 %v3903_v38  ;;  %v3744_v38 = vld [vmem:[#allocation8 + $0x70] sm:$0xf0]  ;;  %v4191_v39 = vor.u32 %v4783_v45, %v4190_v36 }
 0x11e   :  { %v3747_v40 = vor.u32 %v4669_v46, %v3744_v38  ;;  %2190 = vmatpush.bf16.msra.mxu2 %v4063_v37  ;;  %v4767_v37 = vld [vmem:[#allocation8 + $0x36c] sm:$0xf0] }
 0x11f   :  { %2204 = vmatpush.bf16.msra.mxu3 %v4191_v39  ;;  %v4127_v45 = vor.u32 %v4767_v37, %v4126_v34  ;;  %v4032_v37 = vld [vmem:[#allocation8 + $0x2b0] sm:$0xf0] }
 0x120   :  { %2165 = vmatpush.bf16.msra.mxu0 %v3759_v42  ;;  %v3872_v42 = vld [vmem:[#allocation8 + $0x170] sm:$0xf0] }
 0x121   :  { %2179 = vmatpush.bf16.msra.mxu1 %v3887_v44  ;;  %v3875_v48 = vor.u32 %v4701_v41, %v3872_v42  ;;  %v4731_v41 = vld [vmem:[#allocation8 + $0x24c] sm:$0xf0]  ;;  %v4110_v42 = vld [vmem:[#allocation8 + $0x340] sm:$0xf] }
 0x124   :  { %2166 = vmatpush.bf16.msra.mxu0 %v3743_v50  ;;  %v4747_v50 = vld [vmem:[#allocation8 + $0x2cc] sm:$0xf0] }
 0x125   :  { %2180 = vmatpush.bf16.msra.mxu1 %v3871_v52  ;;  %v4047_v52 = vor.u32 %v4747_v50, %v4046_v49 }
 0x127   :  { %2191 = vmatpush.bf16.msra.mxu2 %v4047_v52  ;;  %v4763_v52 = vld [vmem:[#allocation8 + $0x34c] sm:$0xf0] }
 0x128   :  { %2167 = vmatpush.bf16.msra.mxu0 %v3727_v56  ;;  %v4175_v56 = vor.u32 %v4779_v53, %v4174_v51  ;;  %v4111_v53 = vor.u32 %v4763_v52, %v4110_v42  ;;  %v3814_v52 = vld [vmem:[#allocation8 + $0xe8] sm:$0xf] }
 0x129   :  { %2181 = vmatpush.bf16.msra.mxu1 %v3855_v58  ;;  %v4697_v58 = vld [vmem:[#allocation8 + $0x144] sm:$0xf] }
 0x12a   :  { %2205 = vmatpush.bf16.msra.mxu3 %v4175_v56  ;;  %v3966_v56 = vld [vmem:[#allocation8 + $0x220] sm:$0xf] }
 0x12c   :  { %2168 = vmatpush.bf16.msra.mxu0 %v3711_v0  ;;  %v3859_v0 = vor.u32 %v4697_v58, %v3856_v59  ;;  %v4094_v58 = vld [vmem:[#allocation8 + $0x320] sm:$0xf] }
 0x12d   :  { %2182 = vmatpush.bf16.msra.mxu1 %v3839_v2  ;;  %v4743_v2 = vld [vmem:[#allocation8 + $0x2ac] sm:$0xf0] }
 0x12e   :  { %v4031_v4 = vor.u32 %v4743_v2, %v4030_v1  ;;  %2206 = vmatpush.bf16.msra.mxu3 %v4159_v10  ;;  %v4759_v1 = vld [vmem:[#allocation8 + $0x32c] sm:$0xf0]  ;;  %v4078_v10 = vld [vmem:[#allocation8 + $0x300] sm:$0xf] }
 0x12f   :  { %v4095_v3 = vor.u32 %v4759_v1, %v4094_v58  ;;  %v4769_v58 = vld [vmem:[#allocation8 + $0x384] sm:$0xf] }
 0x130   :  { %2169 = vmatpush.bf16.msra.mxu0 %v3695_v7  ;;  %v4661_v7 = vld [vmem:[#allocation8 + $0x24] sm:$0xf]  ;;  %2192 = vmatpush.bf16.msra.mxu2 %v4031_v4 }
 0x131   :  { %2183 = vmatpush.bf16.msra.mxu1 %v3823_v11  ;;  %v3715_v11 = vor.u32 %v4661_v7, %v3712_v8  ;;  %v3950_v8 = vld [vmem:[#allocation8 + $0x200] sm:$0xf] }
 0x132   :  { %2207 = vmatpush.bf16.msra.mxu3 %v4143_v25  ;;  %v4745_v25 = vld [vmem:[#allocation8 + $0x2c4] sm:$0xf] }
 0x134   :  { %2218 = vmatpush.bf16.msrb.mxu0 %v3811_v12  ;;  %v4693_v12 = vld [vmem:[#allocation8 + $0x124] sm:$0xf] }
 0x135   :  { %2232 = vmatpush.bf16.msrb.mxu1 %v3939_v15  ;;  %v3843_v17 = vor.u32 %v4693_v12, %v3840_v13 }
 0x136   :  { %2208 = vmatpush.bf16.msra.mxu3 %v4127_v45  ;;  %v4773_v45 = vld [vmem:[#allocation8 + $0x3a4] sm:$0xf] }
 0x138   :  { %2219 = vmatpush.bf16.msrb.mxu0 %v3795_v20  ;;  %v4739_v20 = vld [vmem:[#allocation8 + $0x28c] sm:$0xf0] }
 0x139   :  { %2233 = vmatpush.bf16.msrb.mxu1 %v3923_v22  ;;  %v4015_v23 = vor.u32 %v4739_v20, %v4014_v18  ;;  %v4064_v18 = vld [vmem:[#allocation8 + $0x2f0] sm:$0xf0] }
 0x13a   :  { %2209 = vmatpush.bf16.msra.mxu3 %v4111_v53  ;;  %v3942_v53 = vld [vmem:[#allocation8 + $0x1e8] sm:$0xf] }
 0x13b   :  { %2193 = vmatpush.bf16.msra.mxu2 %v4015_v23  ;;  %v4781_v23 = vld [vmem:[#allocation8 + $0x3e4] sm:$0xf] }
 0x13c   :  { %2220 = vmatpush.bf16.msrb.mxu0 %v3779_v24  ;;  %v3696_v24 = vld [vmem:[#allocation8 + $0x10] sm:$0xf0] }
 0x13d   :  { %2234 = vmatpush.bf16.msrb.mxu1 %v3907_v26  ;;  %v3699_v26 = vor.u32 %v4657_v63, %v3696_v24  ;;  %v4195_v24 = vor.u32 %v4781_v23, %v4192_v62  ;;  %v4680_v62 = vld [vmem:[#allocation8 + $0xb4] sm:$0xf0] }
 0x13e   :  { %2210 = vmatpush.bf16.msra.mxu3 %v4095_v3  ;;  %v4144_v3 = vld [vmem:[#allocation8 + $0x390] sm:$0xf0] }
 0x140   :  { %2221 = vmatpush.bf16.msrb.mxu0 %v3763_v30  ;;  %v3827_v30 = vor.u32 %v4689_v27, %v3824_v28  ;;  %v4777_v27 = vld [vmem:[#allocation8 + $0x3c4] sm:$0xf] }
 0x141   :  { %2235 = vmatpush.bf16.msrb.mxu1 %v3891_v32  ;;  %v4735_v32 = vld [vmem:[#allocation8 + $0x26c] sm:$0xf0] }
 0x142   :  { %v3999_v36 = vor.u32 %v4735_v32, %v3998_v31 }
 0x144   :  { %2222 = vmatpush.bf16.msrb.mxu0 %v3747_v40  ;;  %2194 = vmatpush.bf16.msra.mxu2 %v3999_v36  ;;  %v3982_v40 = vld [vmem:[#allocation8 + $0x240] sm:$0xf]  ;;  %v4741_v36 = vld [vmem:[#allocation8 + $0x2a4] sm:$0xf] }
 0x145   :  { %v5291_v19 = vpop.f32.mrf.mxu0  ;;  %v5293_v5 = vpop.f32.mrf.mxu1  ;;  %2236 = vmatpush.bf16.msrb.mxu1 %v3875_v48  ;;  %v3983_v51 = vor.u32 %v4731_v41, %v3982_v40  ;;  %v4160_v41 = vld [vmem:[#allocation8 + $0x3b0] sm:$0xf0] }
 0x146   :  { %v1110_v22 = vadd.f32 %v5291_v19, %v432_v60 }
 0x148   :  { %2223 = vmatpush.bf16.msrb.mxu0 %v3731_v57  ;;  %v1124_v35 = vadd.f32 %v5293_v5, %v1110_v22  ;;  %2195 = vmatpush.bf16.msra.mxu2 %v3983_v51  ;;  %v4727_v57 = vld [vmem:[#allocation8 + $0x22c] sm:$0xf0] }
 0x149   :  { %2237 = vmatpush.bf16.msrb.mxu1 %v3859_v0  ;;  %v3967_v0 = vor.u32 %v4727_v57, %v3966_v56  ;;  %v4737_v56 = vld [vmem:[#allocation8 + $0x284] sm:$0xf]  ;;  %v4016_v57 = vld [vmem:[#allocation8 + $0x290] sm:$0xf0] }
 0x14c   :  { %2224 = vmatpush.bf16.msrb.mxu0 %v3715_v11  ;;  %2196 = vmatpush.bf16.msra.mxu2 %v3967_v0  ;;  %v4755_v11 = vld [vmem:[#allocation8 + $0x30c] sm:$0xf0] }
 0x14d   :  { %v5295_v33 = vpop.f32.mrf.mxu0  ;;  %v5304_v61 = vpop.f32.mrf.mxu1  ;;  %2238 = vmatpush.bf16.msrb.mxu1 %v3843_v17  ;;  %v4749_v17 = vld [vmem:[#allocation8 + $0x2e4] sm:$0xf] }
 0x14e   :  { %v1112_v5 = vadd.f32 %v5295_v33, %v432_v60  ;;  %v4067_v22 = vor.u32 %v4749_v17, %v4064_v18  ;;  %v4128_v18 = vld [vmem:[#allocation8 + $0x370] sm:$0xf0] }
 0x150   :  { %2225 = vmatpush.bf16.msrb.mxu0 %v3699_v26  ;;  %v1126_v2 = vadd.f32 %v5304_v61, %v1112_v5  ;;  %v4048_v26 = vld [vmem:[#allocation8 + $0x2d0] sm:$0xf0]  ;;  %v4688_v5 = vld [vmem:[#allocation8 + $0xf4] sm:$0xf0] }
 0x151   :  { %2239 = vmatpush.bf16.msrb.mxu1 %v3827_v30  ;;  %v4176_v30 = vld [vmem:[#allocation8 + $0x3d0] sm:$0xf0] }
 0x152   :  { %v4179_v34 = vor.u32 %v4777_v27, %v4176_v30  ;;  %v3984_v27 = vld [vmem:[#allocation8 + $0x250] sm:$0xf0] }
 0x153   :  { %v4112_v30 = vld [vmem:[#allocation8 + $0x350] sm:$0xf0] }
 0x156   :  { %v1165_v9 = vpop.f32.mrf.mxu0  ;;  %v1179_v19 = vpop.f32.mrf.mxu1 }
 0x157   :  { %v1166_v29 = vadd.f32 %v1165_v9, %v433_v14  ;;  %v4723_v9 = vld [vmem:[#allocation8 + $0x20c] sm:$0xf0] }
 0x158   :  { %v3951_v13 = vor.u32 %v4723_v9, %v3950_v8  ;;  %v4684_v8 = vld [vmem:[#allocation8 + $0xd4] sm:$0xf0]  ;;  %v3926_v9 = vld [vmem:[#allocation8 + $0x1c8] sm:$0xf] }
 0x159   :  { %v1180_v46 = vadd.f32 %v1179_v19, %v1166_v29  ;;  %v4051_v29 = vor.u32 %v4745_v25, %v4048_v26  ;;  %v4729_v26 = vld [vmem:[#allocation8 + $0x244] sm:$0xf] }
 0x15a   :  { %2197 = vmatpush.bf16.msra.mxu2 %v3951_v13  ;;  %v4000_v13 = vld [vmem:[#allocation8 + $0x270] sm:$0xf0] }
 0x15b   :  { %v5299_v44 = vpop.f32.mrf.mxu2  ;;  %v5301_v47 = vpop.f32.mrf.mxu3 }
 0x15c   :  { %v1138_v38 = vadd.f32 %v5299_v44, %v1124_v35 }
 0x15e   :  { %v1167_v48 = vpop.f32.mrf.mxu0  ;;  %v1152_v54 = vadd.f32 %v5301_v47, %v1138_v38  ;;  %v1181_v4 = vpop.f32.mrf.mxu1  ;;  %2246 = vmatpush.bf16.msrb.mxu2 %v4067_v22  ;;  %v434_v38 = vperm.slane %v5297_v43, 2 }
 0x15f   :  { %v1168_v44 = vadd.f32 %v1167_v48, %v433_v14  ;;  %v4079_v14 = vor.u32 %v4755_v11, %v4078_v10  ;;  %v4035_v48 = vor.u32 %v4741_v36, %v4032_v37  ;;  %v4716_v10 = vld [vmem:[#allocation8 + $0x1d4] sm:$0xf0]  ;;  %v4725_v37 = vld [vmem:[#allocation8 + $0x224] sm:$0xf] }
 0x160   :  { %v4708_v36 = vld [vmem:[#allocation8 + $0x194] sm:$0xf0] }
 0x161   :  { %v1182_v33 = vadd.f32 %v1181_v4, %v1168_v44  ;;  %2211 = vmatpush.bf16.msra.mxu3 %v4079_v14  ;;  %v3815_v4 = vor.u32 %v4688_v5, %v3814_v52  ;;  %v4765_v14 = vld [vmem:[#allocation8 + $0x364] sm:$0xf]  ;;  %v4672_v5 = vld [vmem:[#allocation8 + $0x74] sm:$0xf0] }
 0x162   :  { %2247 = vmatpush.bf16.msrb.mxu2 %v4051_v29  ;;  %v4131_v22 = vor.u32 %v4765_v14, %v4128_v18  ;;  %v3987_v29 = vor.u32 %v4729_v26, %v3984_v27  ;;  %v4664_v18 = vld [vmem:[#allocation8 + $0x34] sm:$0xf0] }
 0x163   :  { %v5307_v15 = vpop.f32.mrf.mxu2  ;;  %v5309_v16 = vpop.f32.mrf.mxu3 }
 0x164   :  { %v1140_v47 = vadd.f32 %v5307_v15, %v1126_v2  ;;  %v4019_v2 = vor.u32 %v4737_v56, %v4016_v57  ;;  %v3952_v56 = vld [vmem:[#allocation8 + $0x210] sm:$0xf0]  ;;  %v4753_v57 = vld [vmem:[#allocation8 + $0x304] sm:$0xf] }
 0x165   :  { %2260 = vmatpush.bf16.msrb.mxu3 %v4195_v24 }
 0x166   :  { %v1154_v63 = vadd.f32 %v5309_v16, %v1140_v47  ;;  %2248 = vmatpush.bf16.msrb.mxu2 %v4035_v48  ;;  %v5353_v11 = vpop.f32.mrf.mxu1 }
 0x169   :  { %2261 = vmatpush.bf16.msrb.mxu3 %v4179_v34 }
 0x16a   :  { %2249 = vmatpush.bf16.msrb.mxu2 %v4019_v2 }
 0x16b   :  { %v1193_v39 = vpop.f32.mrf.mxu2  ;;  %v1207_v50 = vpop.f32.mrf.mxu3 }
 0x16c   :  { %v1194_v49 = vadd.f32 %v1193_v39, %v1180_v46  ;;  %v4757_v46 = vld [vmem:[#allocation8 + $0x324] sm:$0xf] }
 0x16e   :  { %v1208_v55 = vadd.f32 %v1207_v50, %v1194_v49  ;;  %v4163_v49 = vor.u32 %v4773_v45, %v4160_v41  ;;  %v5343_v50 = vpop.f32.mrf.mxu0  ;;  %v3968_v45 = vld [vmem:[#allocation8 + $0x230] sm:$0xf0]  ;;  %v5364_v41 = vpop.f32.mrf.mxu1 }
 0x170   :  { %v1324_v59 = vpack.c.bf16 %v1208_v55, %v1152_v54  ;;  %v4720_v54 = vld [vmem:[#allocation8 + $0x1f4] sm:$0xf0]  ;;  %2262 = vmatpush.bf16.msrb.mxu3 %v4163_v49 }
 0x172   :  { %v1328_v6 = vunpack.c.l.bf16 %v1324_v59  ;;  %v1329_v7 = vunpack.c.h.bf16 %v1324_v59 }
 0x173   :  { %v1195_v60 = vpop.f32.mrf.mxu2  ;;  %v1209_v21 = vpop.f32.mrf.mxu3 }
 0x174   :  { %v1196_v12 = vadd.f32 %v1195_v60, %v1182_v33  ;;  %v1344_v61 = vmul.f32 0.010009766, %v1328_v6  ;;  %v1345_v20 = vmul.f32 0.010009766, %v1329_v7  ;;  %vm5323_vm13 = vcmp.ge.f32.partialorder %v1328_v6, 0.0 }
 0x175   :  { %vm5327_vm14 = vcmp.ge.f32.partialorder %v1329_v7, 0.0  ;;  %v3943_v6 = vor.u32 %v4720_v54, %v3942_v53  ;;  %v3798_v7 = vld [vmem:[#allocation8 + $0xc8] sm:$0xf]  ;;  %v4147_v33 = vor.u32 %v4769_v58, %v4144_v3  ;;  %v4704_v54 = vld [vmem:[#allocation8 + $0x174] sm:$0xf0]  ;;  %v1222_v58 = vadd.f32 %v5343_v50, %v434_v38 }
 0x176   :  { %v1210_v15 = vadd.f32 %v1209_v21, %v1196_v12  ;;  %v1352_v16 = vpack.c.bf16 %v1345_v20, %v1344_v61  ;;  %vm1356_vm15 = vmpackc.low %vm5327_vm14, %vm5323_vm13  ;;  %v4733_v12 = vld [vmem:[#allocation8 + $0x264] sm:$0xf]  ;;  %v3799_v61 = vor.u32 %v4684_v8, %v3798_v7  ;;  %v3927_v20 = vor.u32 %v4716_v10, %v3926_v9  ;;  %v3782_v21 = vld [vmem:[#allocation8 + $0xa8] sm:$0xf]  ;;  %v5359_v24 = vpop.f32.mrf.mxu0 }
 0x177   :  { %2263 = vmatpush.bf16.msrb.mxu3 %v4147_v33  ;;  %v4003_v17 = vor.u32 %v4733_v12, %v4000_v13  ;;  %v3783_v31 = vor.u32 %v4680_v62, %v3782_v21  ;;  %v3878_v53 = vld [vmem:[#allocation8 + $0x168] sm:$0xf]  ;;  %v4668_v33 = vld [vmem:[#allocation8 + $0x54] sm:$0xf0]  ;;  %v1236_v50 = vadd.f32 %v5353_v11, %v1222_v58  ;;  %v3784_v58 = vld [vmem:[#allocation8 + $0xb8] sm:$0xf0] }
 0x178   :  { %v1326_v28 = vpack.c.bf16 %v1210_v15, %v1154_v63  ;;  %v1360_v42 = vsel %vm1356_vm15, %v1324_v59, %v1352_v16  ;;  %v3910_v63 = vld [vmem:[#allocation8 + $0x1a8] sm:$0xf]  ;;  %v4712_v15 = vld [vmem:[#allocation8 + $0x1b4] sm:$0xf0] }
 0x179   :  { %v1506_v55 = vunpack.c.l.b16 %v1360_v42  ;;  %v1507_v59 = vunpack.c.h.b16 %v1360_v42  ;;  %2250 = vmatpush.bf16.msrb.mxu2 %v4003_v17  ;;  %v3911_v32 = vor.u32 %v4712_v15, %v3910_v63  ;;  %v3766_v16 = vld [vmem:[#allocation8 + $0x88] sm:$0xf]  ;;  %v435_v42 = vperm.slane %v5297_v43, 3  ;;  %v4700_v9 = vld [vmem:[#allocation8 + $0x154] sm:$0xf0] }
 0x17a   :  { %v1332_v35 = vunpack.c.l.bf16 %v1326_v28  ;;  %v1333_v19 = vunpack.c.h.bf16 %v1326_v28  ;;  %v3862_v8 = vld [vmem:[#allocation8 + $0x148] sm:$0xf] }
 0x17b   :  { %2264 = vmatpush.bf16.msrb.mxu3 %v4131_v22  ;;  %v3863_v14 = vor.u32 %v4700_v9, %v3862_v8  ;;  %v3718_v17 = vld [vmem:[#allocation8 + $0x28] sm:$0xf] }
 0x17c   :  { %vm5335_vm0 = vcmp.ge.f32.partialorder %v1332_v35, 0.0  ;;  %vm5339_vm1 = vcmp.ge.f32.partialorder %v1333_v19, 0.0  ;;  %v1348_v39 = vmul.f32 0.010009766, %v1332_v35  ;;  %v1349_v40 = vmul.f32 0.010009766, %v1333_v19  ;;  %v4676_v35 = vld [vmem:[#allocation8 + $0x94] sm:$0xf0] }
 0x17d   :  { %vm1358_vm2 = vmpackc.low %vm5339_vm1, %vm5335_vm0  ;;  %v3894_v19 = vld [vmem:[#allocation8 + $0x188] sm:$0xf]  ;;  %2251 = vmatpush.bf16.msrb.mxu2 %v3987_v29  ;;  %v3767_v48 = vor.u32 %v4676_v35, %v3766_v16  ;;  %v3719_v27 = vor.u32 %v4664_v18, %v3718_v17  ;;  %v4660_v29 = vld [vmem:[#allocation8 + $0x14] sm:$0xf0] }
 0x17e   :  { %v1354_v51 = vpack.c.bf16 %v1349_v40, %v1348_v39  ;;  %v3971_v39 = vor.u32 %v4725_v37, %v3968_v45  ;;  %v4096_v40 = vld [vmem:[#allocation8 + $0x330] sm:$0xf0]  ;;  %v3895_v49 = vor.u32 %v4708_v36, %v3894_v19  ;;  %v4686_v16 = vld [vmem:[#allocation8 + $0xec] sm:$0xf]  ;;  %v3944_v36 = vld [vmem:[#allocation8 + $0x1f8] sm:$0xf0] }
 0x17f   :  { %v5357_v23 = vpop.f32.mrf.mxu2  ;;  %v5361_v25 = vpop.f32.mrf.mxu3  ;;  %v4099_v52 = vor.u32 %v4757_v46, %v4096_v40  ;;  %v4718_v19 = vld [vmem:[#allocation8 + $0x1ec] sm:$0xf] }
 0x180   :  { %v1362_v44 = vsel %vm1358_vm2, %v1326_v28, %v1354_v51  ;;  %v4761_v28 = vld [vmem:[#allocation8 + $0x344] sm:$0xf]  ;;  %v3750_v51 = vld [vmem:[#allocation8 + $0x68] sm:$0xf]  ;;  %v1250_v21 = vadd.f32 %v5357_v23, %v1236_v50  ;;  %v3816_v23 = vld [vmem:[#allocation8 + $0xf8] sm:$0xf0]  ;;  %v3947_v40 = vor.u32 %v4718_v19, %v3944_v36 }
 0x181   :  { %v1510_v0 = vunpack.c.l.b16 %v1362_v44  ;;  %v1511_v1 = vunpack.c.h.b16 %v1362_v44  ;;  %v4115_v34 = vor.u32 %v4761_v28, %v4112_v30  ;;  %2252 = vmatpush.bf16.msrb.mxu2 %v3971_v39  ;;  %v4721_v44 = vld [vmem:[#allocation8 + $0x204] sm:$0xf]  ;;  %v3751_v3 = vor.u32 %v4672_v5, %v3750_v51  ;;  %v3702_v28 = vld [vmem:[#allocation8 + $0x8] sm:$0xf]  ;;  %v4714_v51 = vld [vmem:[#allocation8 + $0x1cc] sm:$0xf] }
 0x182   :  { %v1224_v30 = vadd.f32 %v5359_v24, %v434_v38  ;;  %v3703_v46 = vor.u32 %v4660_v29, %v3702_v28  ;;  %v3819_v38 = vor.u32 %v4686_v16, %v3816_v23  ;;  %v4706_v50 = vld [vmem:[#allocation8 + $0x18c] sm:$0xf]  ;;  %v4784_v16 = vld [vmem:[#allocation8 + $0x3f4] sm:$0xf0] }
 0x183   :  { %v5349_v47 = vpack.c.b16 %v1510_v0, %v1506_v55  ;;  %v5351_v60 = vpack.c.b16 %v1511_v1, %v1507_v59  ;;  %2265 = vmatpush.bf16.msrb.mxu3 %v4115_v34  ;;  %v3955_v0 = vor.u32 %v4721_v44, %v3952_v56  ;;  %v4080_v1 = vld [vmem:[#allocation8 + $0x310] sm:$0xf0]  ;;  %v1264_v34 = vadd.f32 %v5361_v25, %v1250_v21  ;;  %v3800_v25 = vld [vmem:[#allocation8 + $0xd8] sm:$0xf0]  ;;  %v4678_v56 = vld [vmem:[#allocation8 + $0xac] sm:$0xf] }
 0x184   :  { %v4083_v7 = vor.u32 %v4753_v57, %v4080_v1  ;;  %v1238_v24 = vadd.f32 %v5364_v41, %v1224_v30  ;;  %v3912_v1 = vld [vmem:[#allocation8 + $0x1b8] sm:$0xf0]  ;;  %v3787_v8 = vor.u32 %v4678_v56, %v3784_v58  ;;  %v4670_v21 = vld [vmem:[#allocation8 + $0x6c] sm:$0xf]  ;;  %v4070_v30 = vld [vmem:[#allocation8 + $0x2e8] sm:$0xf] }
 0x185   :  { %2170 = vmatmul.bf16.vlgmr.msra.gmra.mxu0 %v5349_v47  ;;  %2184 = vmatmul.bf16.vlgmr.msra.gmra.mxu1 %v5351_v60  ;;  %v4666_v19 = vld [vmem:[#allocation8 + $0x4c] sm:$0xf]  ;;  %v4038_v58 = vld [vmem:[#allocation8 + $0x2a8] sm:$0xf] }
 0x186   :  { %2274 = vmatpush.bf16.msra.mxu0 %v3815_v4  ;;  %2288 = vmatpush.bf16.msra.mxu1 %v3943_v6  ;;  %v1277_v55 = vpop.f32.mrf.mxu0  ;;  %v3879_v4 = vor.u32 %v4704_v54, %v3878_v53  ;;  %v3734_v6 = vld [vmem:[#allocation8 + $0x48] sm:$0xf]  ;;  %v1291_v12 = vpop.f32.mrf.mxu1 }
 0x187   :  { %2266 = vmatpush.bf16.msrb.mxu3 %v4099_v52  ;;  %v5368_v59 = vpop.f32.mrf.mxu2  ;;  %v5370_v2 = vpop.f32.mrf.mxu3  ;;  %2253 = vmatpush.bf16.msrb.mxu2 %v3955_v0  ;;  %v1278_v10 = vadd.f32 %v1277_v55, %v435_v42  ;;  %v3735_v13 = vor.u32 %v4668_v33, %v3734_v6  ;;  %v3928_v52 = vld [vmem:[#allocation8 + $0x1d8] sm:$0xf0]  ;;  %v4710_v0 = vld [vmem:[#allocation8 + $0x1ac] sm:$0xf] }
 0x188   :  { %v1252_v5 = vadd.f32 %v5368_v59, %v1238_v24  ;;  %v3931_v44 = vor.u32 %v4714_v51, %v3928_v52  ;;  %v3915_v9 = vor.u32 %v4710_v0, %v3912_v1  ;;  %v4698_v24 = vld [vmem:[#allocation8 + $0x14c] sm:$0xf]  ;;  %v4748_v52 = vld [vmem:[#allocation8 + $0x2d4] sm:$0xf0]  ;;  %v4166_v1 = vld [vmem:[#allocation8 + $0x3a8] sm:$0xf] }
 0x189   :  { %v1292_v22 = vadd.f32 %v1291_v12, %v1278_v10  ;;  %v3768_v10 = vld [vmem:[#allocation8 + $0x98] sm:$0xf0]  ;;  %v4744_v0 = vld [vmem:[#allocation8 + $0x2b4] sm:$0xf0] }
 0x18a   :  { %2275 = vmatpush.bf16.msra.mxu0 %v3799_v61  ;;  %2289 = vmatpush.bf16.msra.mxu1 %v3927_v20  ;;  %v3846_v61 = vld [vmem:[#allocation8 + $0x128] sm:$0xf]  ;;  %v4696_v20 = vld [vmem:[#allocation8 + $0x134] sm:$0xf0]  ;;  %v1266_v59 = vadd.f32 %v5370_v2, %v1252_v5  ;;  %v3896_v12 = vld [vmem:[#allocation8 + $0x198] sm:$0xf0] }
 0x18b   :  { %2267 = vmatpush.bf16.msrb.mxu3 %v4083_v7  ;;  %v3847_v11 = vor.u32 %v4696_v20, %v3846_v61  ;;  %v4674_v7 = vld [vmem:[#allocation8 + $0x8c] sm:$0xf]  ;;  %v3899_v20 = vor.u32 %v4706_v50, %v3896_v12  ;;  %v4182_v5 = vld [vmem:[#allocation8 + $0x3c8] sm:$0xf]  ;;  %v4740_v12 = vld [vmem:[#allocation8 + $0x294] sm:$0xf0] }
 0x18c   :  { %v3771_v61 = vor.u32 %v4674_v7, %v3768_v10  ;;  %v3704_v7 = vld [vmem:[#allocation8 + $0x18] sm:$0xf0]  ;;  %v4022_v50 = vld [vmem:[#allocation8 + $0x288] sm:$0xf]  ;;  %v4772_v2 = vld [vmem:[#allocation8 + $0x394] sm:$0xf0] }
 0x18e   :  { %2276 = vmatpush.bf16.msra.mxu0 %v3783_v31  ;;  %2290 = vmatpush.bf16.msra.mxu1 %v3911_v32  ;;  %v1279_v63 = vpop.f32.mrf.mxu0  ;;  %v3830_v31 = vld [vmem:[#allocation8 + $0x108] sm:$0xf]  ;;  %v4692_v32 = vld [vmem:[#allocation8 + $0x114] sm:$0xf0] }
 0x18f   :  { %v1280_v37 = vadd.f32 %v1279_v63, %v435_v42  ;;  %v3831_v39 = vor.u32 %v4692_v32, %v3830_v31  ;;  %v4752_v31 = vld [vmem:[#allocation8 + $0x2f4] sm:$0xf0]  ;;  %v4198_v32 = vld [vmem:[#allocation8 + $0x3e8] sm:$0xf] }
 0x192   :  { %2277 = vmatpush.bf16.msra.mxu0 %v3767_v48  ;;  %2291 = vmatpush.bf16.msra.mxu1 %v3895_v49  ;;  %v4682_v48 = vld [vmem:[#allocation8 + $0xcc] sm:$0xf]  ;;  %v1293_v49 = vpop.f32.mrf.mxu1 }
 0x193   :  { %v1294_v53 = vadd.f32 %v1293_v49, %v1280_v37  ;;  %v3803_v41 = vor.u32 %v4682_v48, %v3800_v25  ;;  %v4199_v48 = vor.u32 %v4784_v16, %v4198_v32  ;;  %v4054_v49 = vld [vmem:[#allocation8 + $0x2c8] sm:$0xf]  ;;  %v4728_v32 = vld [vmem:[#allocation8 + $0x234] sm:$0xf0] }
 0x194   :  { %v4055_v56 = vor.u32 %v4748_v52, %v4054_v49  ;;  %v4102_v16 = vld [vmem:[#allocation8 + $0x328] sm:$0xf]  ;;  %v4746_v49 = vld [vmem:[#allocation8 + $0x2cc] sm:$0xf]  ;;  %v4056_v52 = vld [vmem:[#allocation8 + $0x2d8] sm:$0xf0] }
 0x195   :  { %2226 = vmatmul.bf16.vlgmr.msrb.gmra.mxu0 %v5349_v47  ;;  %2240 = vmatmul.bf16.vlgmr.msrb.gmra.mxu1 %v5351_v60 }
 0x196   :  { %2278 = vmatpush.bf16.msra.mxu0 %v3751_v3  ;;  %2292 = vmatpush.bf16.msra.mxu1 %v3879_v4 }
 0x19a   :  { %2279 = vmatpush.bf16.msra.mxu0 %v3735_v13  ;;  %2293 = vmatpush.bf16.msra.mxu1 %v3863_v14  ;;  %v4150_v13 = vld [vmem:[#allocation8 + $0x388] sm:$0xf] }
 0x19d   :  { %v1305_v62 = vpop.f32.mrf.mxu2  ;;  %v1319_v26 = vpop.f32.mrf.mxu3 }
 0x19e   :  { %v1306_v15 = vadd.f32 %v1305_v62, %v1292_v22  ;;  %2280 = vmatpush.bf16.msra.mxu0 %v3719_v27  ;;  %2294 = vmatpush.bf16.msra.mxu1 %v3847_v11  ;;  %v4702_v27 = vld [vmem:[#allocation8 + $0x16c] sm:$0xf]  ;;  %v3880_v11 = vld [vmem:[#allocation8 + $0x178] sm:$0xf0]  ;;  %v4134_v22 = vld [vmem:[#allocation8 + $0x368] sm:$0xf] }
 0x19f   :  { %v3883_v23 = vor.u32 %v4702_v27, %v3880_v11  ;;  %v4768_v62 = vld [vmem:[#allocation8 + $0x374] sm:$0xf0]  ;;  %v4118_v11 = vld [vmem:[#allocation8 + $0x348] sm:$0xf] }
 0x1a0   :  { %v1320_v35 = vadd.f32 %v1319_v26, %v1306_v15  ;;  %v3752_v26 = vld [vmem:[#allocation8 + $0x78] sm:$0xf0]  ;;  %v4732_v27 = vld [vmem:[#allocation8 + $0x254] sm:$0xf0] }
 0x1a2   :  { %v5382_v45 = vpack.c.bf16 %v1320_v35, %v1264_v34  ;;  %2281 = vmatpush.bf16.msra.mxu0 %v3703_v46  ;;  %2295 = vmatpush.bf16.msra.mxu1 %v3831_v39  ;;  %v3755_v35 = vor.u32 %v4670_v21, %v3752_v26  ;;  %v3736_v39 = vld [vmem:[#allocation8 + $0x58] sm:$0xf0]  ;;  %v4736_v21 = vld [vmem:[#allocation8 + $0x274] sm:$0xf0]  ;;  %v3990_v26 = vld [vmem:[#allocation8 + $0x248] sm:$0xf] }
 0x1a4   :  { %v1330_v43 = vunpack.c.l.bf16 %v5382_v45  ;;  %v1331_v42 = vunpack.c.h.bf16 %v5382_v45 }
 0x1a5   :  { %v1307_v54 = vpop.f32.mrf.mxu2  ;;  %v1321_v57 = vpop.f32.mrf.mxu3  ;;  %2282 = vmatmul.bf16.vlgmr.msra.gmra.mxu0 %v5349_v47  ;;  %2296 = vmatmul.bf16.vlgmr.msra.gmra.mxu1 %v5351_v60 }
 0x1a6   :  { %v1308_v55 = vadd.f32 %v1307_v54, %v1294_v53  ;;  %2330 = vmatpush.bf16.msrb.mxu0 %v3819_v38  ;;  %2344 = vmatpush.bf16.msrb.mxu1 %v3947_v40  ;;  %v1346_v3 = vmul.f32 0.010009766, %v1330_v43  ;;  %v1347_v4 = vmul.f32 0.010009766, %v1331_v42  ;;  %vm5391_vm3 = vcmp.ge.f32.partialorder %v1330_v43, 0.0  ;;  %v3864_v38 = vld [vmem:[#allocation8 + $0x158] sm:$0xf0] }
 0x1a7   :  { %vm5395_vm4 = vcmp.ge.f32.partialorder %v1331_v42, 0.0  ;;  %v4071_v40 = vor.u32 %v4752_v31, %v4070_v30  ;;  %v4780_v53 = vld [vmem:[#allocation8 + $0x3d4] sm:$0xf0]  ;;  %v3739_v43 = vor.u32 %v4666_v19, %v3736_v39  ;;  %v3867_v42 = vor.u32 %v4698_v24, %v3864_v38  ;;  %v4662_v54 = vld [vmem:[#allocation8 + $0x2c] sm:$0xf] }
 0x1a8   :  { %v1322_v6 = vadd.f32 %v1321_v57, %v1308_v55  ;;  %v1353_v14 = vpack.c.bf16 %v1347_v4, %v1346_v3  ;;  %vm1357_vm7 = vmpackc.low %vm5395_vm4, %vm5391_vm3  ;;  %v3720_v55 = vld [vmem:[#allocation8 + $0x38] sm:$0xf0]  ;;  %v4183_v57 = vor.u32 %v4780_v53, %v4182_v5  ;;  %v3974_v31 = vld [vmem:[#allocation8 + $0x228] sm:$0xf] }
 0x1a9   :  { %v3723_v3 = vor.u32 %v4662_v54, %v3720_v55  ;;  %v4086_v19 = vld [vmem:[#allocation8 + $0x308] sm:$0xf]  ;;  %v4200_v39 = vld [vmem:[#allocation8 + $0x3f8] sm:$0xf0]  ;;  %v4778_v5 = vld [vmem:[#allocation8 + $0x3cc] sm:$0xf] }
 0x1aa   :  { %v1327_v33 = vpack.c.bf16 %v1322_v6, %v1266_v59  ;;  %2331 = vmatpush.bf16.msrb.mxu0 %v3803_v41  ;;  %2345 = vmatpush.bf16.msrb.mxu1 %v3931_v44  ;;  %v1361_v28 = vsel %vm1357_vm7, %v5382_v45, %v1353_v14  ;;  %v4694_v41 = vld [vmem:[#allocation8 + $0x12c] sm:$0xf]  ;;  %v3848_v44 = vld [vmem:[#allocation8 + $0x138] sm:$0xf0]  ;;  %v4776_v59 = vld [vmem:[#allocation8 + $0x3b4] sm:$0xf0] }
 0x1ab   :  { %v1508_v36 = vunpack.c.l.b16 %v1361_v28  ;;  %v1509_v37 = vunpack.c.h.b16 %v1361_v28  ;;  %v3851_v4 = vor.u32 %v4694_v41, %v3848_v44  ;;  %v4658_v6 = vld [vmem:[#allocation8 + $0xc] sm:$0xf]  ;;  %v4167_v10 = vor.u32 %v4776_v59, %v4166_v1  ;;  %v4764_v28 = vld [vmem:[#allocation8 + $0x354] sm:$0xf0]  ;;  %v4184_v53 = vld [vmem:[#allocation8 + $0x3d8] sm:$0xf0] }
 0x1ac   :  { %v1334_v17 = vunpack.c.l.bf16 %v1327_v33  ;;  %v1335_v18 = vunpack.c.h.bf16 %v1327_v33  ;;  %v3707_v14 = vor.u32 %v4658_v6, %v3704_v7  ;;  %v4119_v30 = vor.u32 %v4764_v28, %v4118_v11  ;;  %v4742_v54 = vld [vmem:[#allocation8 + $0x2ac] sm:$0xf]  ;;  %v4040_v55 = vld [vmem:[#allocation8 + $0x2b8] sm:$0xf0] }
 0x1ad   :  { %v4774_v41 = vld [vmem:[#allocation8 + $0x3ac] sm:$0xf]  ;;  %v4168_v44 = vld [vmem:[#allocation8 + $0x3b8] sm:$0xf0] }
 0x1ae   :  { %vm5399_vm5 = vcmp.ge.f32.partialorder %v1334_v17, 0.0  ;;  %vm5403_vm6 = vcmp.ge.f32.partialorder %v1335_v18, 0.0  ;;  %v1350_v63 = vmul.f32 0.010009766, %v1334_v17  ;;  %v1351_v15 = vmul.f32 0.010009766, %v1335_v18  ;;  %2332 = vmatpush.bf16.msrb.mxu0 %v3787_v8  ;;  %2346 = vmatpush.bf16.msrb.mxu1 %v3915_v9  ;;  %v3832_v8 = vld [vmem:[#allocation8 + $0x118] sm:$0xf0] }
 0x1af   :  { %vm1359_vm8 = vmpackc.low %vm5403_vm6, %vm5399_vm5  ;;  %v4039_v9 = vor.u32 %v4744_v0, %v4038_v58  ;;  %v4023_v18 = vor.u32 %v4740_v12, %v4022_v50  ;;  %v4738_v58 = vld [vmem:[#allocation8 + $0x28c] sm:$0xf]  ;;  %v4024_v0 = vld [vmem:[#allocation8 + $0x298] sm:$0xf0] }
 0x1b0   :  { %v1355_v29 = vpack.c.bf16 %v1351_v15, %v1350_v63  ;;  %v4135_v15 = vor.u32 %v4768_v62, %v4134_v22  ;;  %v4770_v1 = vld [vmem:[#allocation8 + $0x38c] sm:$0xf]  ;;  %v4152_v59 = vld [vmem:[#allocation8 + $0x398] sm:$0xf0] }
 0x1b1   :  { %v4734_v6 = vld [vmem:[#allocation8 + $0x26c] sm:$0xf]  ;;  %v4008_v7 = vld [vmem:[#allocation8 + $0x278] sm:$0xf0] }
 0x1b2   :  { %v1363_v34 = vsel %vm1359_vm8, %v1327_v33, %v1355_v29  ;;  %2333 = vmatpush.bf16.msrb.mxu0 %v3771_v61  ;;  %2347 = vmatpush.bf16.msrb.mxu1 %v3899_v20  ;;  %v4690_v33 = vld [vmem:[#allocation8 + $0x10c] sm:$0xf]  ;;  %v4151_v61 = vor.u32 %v4772_v2, %v4150_v13  ;;  %v4006_v20 = vld [vmem:[#allocation8 + $0x268] sm:$0xf]  ;;  %v3991_v29 = vor.u32 %v4732_v27, %v3990_v26  ;;  %v3992_v12 = vld [vmem:[#allocation8 + $0x258] sm:$0xf0] }
 0x1b3   :  { %v1512_v46 = vunpack.c.l.b16 %v1363_v34  ;;  %v1513_v45 = vunpack.c.h.b16 %v1363_v34  ;;  %v3835_v17 = vor.u32 %v4690_v33, %v3832_v8  ;;  %v4007_v63 = vor.u32 %v4736_v21, %v4006_v20  ;;  %v4760_v34 = vld [vmem:[#allocation8 + $0x334] sm:$0xf0]  ;;  %v4766_v33 = vld [vmem:[#allocation8 + $0x36c] sm:$0xf]  ;;  %v4136_v8 = vld [vmem:[#allocation8 + $0x378] sm:$0xf0] }
 0x1b4   :  { %v4730_v50 = vld [vmem:[#allocation8 + $0x24c] sm:$0xf]  ;;  %v4120_v2 = vld [vmem:[#allocation8 + $0x358] sm:$0xf0] }
 0x1b5   :  { %v5416_v25 = vpack.c.b16 %v1512_v46, %v1508_v36  ;;  %v5418_v51 = vpack.c.b16 %v1513_v45, %v1509_v37  ;;  %v4756_v36 = vld [vmem:[#allocation8 + $0x314] sm:$0xf0]  ;;  %v4750_v37 = vld [vmem:[#allocation8 + $0x2ec] sm:$0xf]  ;;  %v4072_v46 = vld [vmem:[#allocation8 + $0x2f8] sm:$0xf0] }
 0x1b6   :  { %2334 = vmatpush.bf16.msrb.mxu0 %v3755_v35  ;;  %2348 = vmatpush.bf16.msrb.mxu1 %v3883_v23  ;;  %v4103_v35 = vor.u32 %v4760_v34, %v4102_v16  ;;  %v4724_v23 = vld [vmem:[#allocation8 + $0x214] sm:$0xf0]  ;;  %v4782_v45 = vld [vmem:[#allocation8 + $0x3ec] sm:$0xf]  ;;  %v4087_v38 = vor.u32 %v4756_v36, %v4086_v19  ;;  %v4104_v21 = vld [vmem:[#allocation8 + $0x338] sm:$0xf0] }
 0x1b7   :  { %2198 = vmatmul.bf16.vlgmr.msra.gmra.mxu2 %v5416_v25  ;;  %2212 = vmatmul.bf16.vlgmr.msra.gmra.mxu3 %v5418_v51  ;;  %v4762_v13 = vld [vmem:[#allocation8 + $0x34c] sm:$0xf]  ;;  %v4088_v27 = vld [vmem:[#allocation8 + $0x318] sm:$0xf0] }
 0x1b8   :  { %2302 = vmatpush.bf16.msra.mxu2 %v4071_v40  ;;  %2316 = vmatpush.bf16.msra.mxu3 %v4199_v48  ;;  %v4075_v40 = vor.u32 %v4750_v37, %v4072_v46  ;;  %v4203_v48 = vor.u32 %v4782_v45, %v4200_v39  ;;  %v4758_v20 = vld [vmem:[#allocation8 + $0x32c] sm:$0xf]  ;;  %v4816_v16 = vld [vmem:[#allocation11 + $0xf4] sm:$0xf0]  ;;  %v4246_v37 = vld [vmem:[#allocation11 + $0x50] sm:$0xf] }
 0x1b9   :  { %v4107_v62 = vor.u32 %v4758_v20, %v4104_v21  ;;  %v4754_v26 = vld [vmem:[#allocation8 + $0x30c] sm:$0xf]  ;;  %v4796_v46 = vld [vmem:[#allocation11 + $0x54] sm:$0xf0]  ;;  %v4328_v20 = vld [vmem:[#allocation11 + $0xf8] sm:$0xf0] }
 0x1ba   :  { %2335 = vmatpush.bf16.msrb.mxu0 %v3739_v43  ;;  %2349 = vmatpush.bf16.msrb.mxu1 %v3867_v42  ;;  %v4059_v43 = vor.u32 %v4746_v49, %v4056_v52  ;;  %v4187_v42 = vor.u32 %v4778_v5, %v4184_v53  ;;  %v4091_v28 = vor.u32 %v4754_v26, %v4088_v27  ;;  %v4814_v19 = vld [vmem:[#allocation11 + $0xe4] sm:$0xf0]  ;;  %v4812_v45 = vld [vmem:[#allocation11 + $0xd4] sm:$0xf0]  ;;  %v4230_v5 = vld [vmem:[#allocation11 + $0x30] sm:$0xf] }
 0x1bb   :  { %v4810_v49 = vld [vmem:[#allocation11 + $0xc4] sm:$0xf0]  ;;  %v4792_v53 = vld [vmem:[#allocation11 + $0x34] sm:$0xf0]  ;;  %v4320_v27 = vld [vmem:[#allocation11 + $0xe8] sm:$0xf0] }
 0x1bc   :  { %2303 = vmatpush.bf16.msra.mxu2 %v4055_v56  ;;  %2317 = vmatpush.bf16.msra.mxu3 %v4183_v57  ;;  %v4043_v56 = vor.u32 %v4742_v54, %v4040_v55  ;;  %v4171_v57 = vor.u32 %v4774_v41, %v4168_v44  ;;  %v4808_v54 = vld [vmem:[#allocation11 + $0xb4] sm:$0xf0]  ;;  %v4222_v41 = vld [vmem:[#allocation11 + $0x20] sm:$0xf]  ;;  %v4790_v44 = vld [vmem:[#allocation11 + $0x24] sm:$0xf0] }
 0x1be   :  { %2336 = vmatpush.bf16.msrb.mxu0 %v3723_v3  ;;  %2350 = vmatpush.bf16.msrb.mxu1 %v3851_v4  ;;  %v4027_v3 = vor.u32 %v4738_v58, %v4024_v0  ;;  %v4155_v4 = vor.u32 %v4770_v1, %v4152_v59  ;;  %v4806_v58 = vld [vmem:[#allocation11 + $0xa4] sm:$0xf0]  ;;  %v4214_v59 = vld [vmem:[#allocation11 + $0x10] sm:$0xf] }
 0x1c0   :  { %2304 = vmatpush.bf16.msra.mxu2 %v4039_v9  ;;  %2318 = vmatpush.bf16.msra.mxu3 %v4167_v10  ;;  %v4011_v9 = vor.u32 %v4734_v6, %v4008_v7  ;;  %v4139_v10 = vor.u32 %v4766_v33, %v4136_v8  ;;  %v4804_v7 = vld [vmem:[#allocation11 + $0x94] sm:$0xf0]  ;;  %v4206_v8 = vld [vmem:[#allocation11] sm:$0xf] }
 0x1c2   :  { %2337 = vmatpush.bf16.msrb.mxu0 %v3707_v14  ;;  %2351 = vmatpush.bf16.msrb.mxu1 %v3835_v17  ;;  %v3995_v14 = vor.u32 %v4730_v50, %v3992_v12  ;;  %v4123_v17 = vor.u32 %v4762_v13, %v4120_v2  ;;  %v4802_v13 = vld [vmem:[#allocation11 + $0x84] sm:$0xf0]  ;;  %v4799_v2 = vld [vmem:[#allocation11 + $0x74] sm:$0xf] }
 0x1c4   :  { %2305 = vmatpush.bf16.msra.mxu2 %v4023_v18  ;;  %2319 = vmatpush.bf16.msra.mxu3 %v4151_v61  ;;  %v4726_v18 = vld [vmem:[#allocation8 + $0x22c] sm:$0xf]  ;;  %v3976_v61 = vld [vmem:[#allocation8 + $0x238] sm:$0xf0] }
 0x1c5   :  { %2338 = vmatmul.bf16.vlgmr.msrb.gmra.mxu0 %v5349_v47  ;;  %2352 = vmatmul.bf16.vlgmr.msrb.gmra.mxu1 %v5351_v60  ;;  %v3975_v47 = vor.u32 %v4728_v32, %v3974_v31  ;;  %v3958_v60 = vld [vmem:[#allocation8 + $0x208] sm:$0xf]  ;;  %v3979_v22 = vor.u32 %v4726_v18, %v3976_v61  ;;  %v4326_v31 = vld [vmem:[#allocation11 + $0xf0] sm:$0xf]  ;;  %v4815_v61 = vld [vmem:[#allocation11 + $0xf4] sm:$0xf] }
 0x1c6   :  { %v3959_v24 = vor.u32 %v4724_v23, %v3958_v60  ;;  %v4327_v34 = vor.u32 %v4816_v16, %v4326_v31  ;;  %v4318_v60 = vld [vmem:[#allocation11 + $0xe0] sm:$0xf]  ;;  %v4331_v21 = vor.u32 %v4815_v61, %v4328_v20  ;;  %v4795_v31 = vld [vmem:[#allocation11 + $0x54] sm:$0xf] }
 0x1c7   :  { %2254 = vmatmul.bf16.vlgmr.msrb.gmra.mxu2 %v5416_v25  ;;  %2268 = vmatmul.bf16.vlgmr.msrb.gmra.mxu3 %v5418_v51  ;;  %v4319_v36 = vor.u32 %v4814_v19, %v4318_v60  ;;  %v4811_v16 = vld [vmem:[#allocation11 + $0xd4] sm:$0xf]  ;;  %v4793_v19 = vld [vmem:[#allocation11 + $0x44] sm:$0xf] }
 0x1c8   :  { %2306 = vmatpush.bf16.msra.mxu2 %v4007_v63  ;;  %2320 = vmatpush.bf16.msra.mxu3 %v4135_v15  ;;  %v4722_v63 = vld [vmem:[#allocation8 + $0x20c] sm:$0xf]  ;;  %v3960_v15 = vld [vmem:[#allocation8 + $0x218] sm:$0xf0] }
 0x1c9   :  { %v3963_v11 = vor.u32 %v4722_v63, %v3960_v15  ;;  %2850 = vmatpush.bf16.msra.mxu1 %v4327_v34  ;;  %v4256_v63 = vld [vmem:[#allocation11 + $0x68] sm:$0xf0]  ;;  %v4813_v15 = vld [vmem:[#allocation11 + $0xe4] sm:$0xf] }
 0x1cc   :  { %2307 = vmatpush.bf16.msra.mxu2 %v3991_v29  ;;  %2321 = vmatpush.bf16.msra.mxu3 %v4119_v30  ;;  %v4262_v29 = vld [vmem:[#allocation11 + $0x70] sm:$0xf]  ;;  %v4800_v30 = vld [vmem:[#allocation11 + $0x74] sm:$0xf0] }
 0x1cd   :  { %v4263_v32 = vor.u32 %v4800_v30, %v4262_v29  ;;  %2851 = vmatpush.bf16.msra.mxu1 %v4319_v36  ;;  %v4240_v36 = vld [vmem:[#allocation11 + $0x48] sm:$0xf0] }
 0x1cf   :  { %2836 = vmatpush.bf16.msra.mxu0 %v4263_v32  ;;  %v4248_v32 = vld [vmem:[#allocation11 + $0x58] sm:$0xf0] }
 0x1d0   :  { %2308 = vmatpush.bf16.msra.mxu2 %v3975_v47  ;;  %2322 = vmatpush.bf16.msra.mxu3 %v4103_v35  ;;  %v4254_v47 = vld [vmem:[#allocation11 + $0x60] sm:$0xf]  ;;  %v4798_v35 = vld [vmem:[#allocation11 + $0x64] sm:$0xf0]  ;;  %v4251_v34 = vor.u32 %v4795_v31, %v4248_v32 }
 0x1d1   :  { %v4255_v23 = vor.u32 %v4798_v35, %v4254_v47  ;;  %v4312_v47 = vld [vmem:[#allocation11 + $0xd8] sm:$0xf0]  ;;  %v4366_v31 = vld [vmem:[#allocation11 + $0x140] sm:$0xf]  ;;  %v4826_v32 = vld [vmem:[#allocation11 + $0x144] sm:$0xf0] }
 0x1d2   :  { %v4315_v60 = vor.u32 %v4811_v16, %v4312_v47 }
 0x1d3   :  { %2837 = vmatpush.bf16.msra.mxu0 %v4255_v23 }
 0x1d4   :  { %2309 = vmatpush.bf16.msra.mxu2 %v3959_v24  ;;  %2323 = vmatpush.bf16.msra.mxu3 %v4087_v38  ;;  %v4238_v24 = vld [vmem:[#allocation11 + $0x40] sm:$0xf]  ;;  %v4794_v38 = vld [vmem:[#allocation11 + $0x44] sm:$0xf0] }
 0x1d7   :  { %2310 = vmatmul.bf16.vlgmr.msra.gmra.mxu2 %v5416_v25  ;;  %2324 = vmatmul.bf16.vlgmr.msra.gmra.mxu3 %v5418_v51 }
 0x1d8   :  { %2358 = vmatpush.bf16.msrb.mxu2 %v4075_v40  ;;  %2372 = vmatpush.bf16.msrb.mxu3 %v4203_v48  ;;  %v4302_v40 = vld [vmem:[#allocation11 + $0xc0] sm:$0xf]  ;;  %v4239_v48 = vor.u32 %v4794_v38, %v4238_v24 }
 0x1d9   :  { %v4303_v52 = vor.u32 %v4810_v49, %v4302_v40  ;;  %v4390_v40 = vld [vmem:[#allocation11 + $0x170] sm:$0xf] }
 0x1da   :  { %v4454_v49 = vld [vmem:[#allocation11 + $0x1f0] sm:$0xf] }
 0x1dc   :  { %2359 = vmatpush.bf16.msrb.mxu2 %v4059_v43  ;;  %2373 = vmatpush.bf16.msrb.mxu3 %v4187_v42  ;;  %v4294_v43 = vld [vmem:[#allocation11 + $0xb0] sm:$0xf]  ;;  %v4231_v42 = vor.u32 %v4792_v53, %v4230_v5  ;;  %v4848_v53 = vld [vmem:[#allocation11 + $0x1f4] sm:$0xf0] }
 0x1dd   :  { %v4295_v55 = vor.u32 %v4808_v54, %v4294_v43  ;;  %v4791_v43 = vld [vmem:[#allocation11 + $0x34] sm:$0xf]  ;;  %v4455_v54 = vor.u32 %v4848_v53, %v4454_v49  ;;  %v4358_v53 = vld [vmem:[#allocation11 + $0x130] sm:$0xf] }
 0x1e0   :  { %2360 = vmatpush.bf16.msrb.mxu2 %v4043_v56  ;;  %2374 = vmatpush.bf16.msrb.mxu3 %v4171_v57  ;;  %v4286_v56 = vld [vmem:[#allocation11 + $0xa0] sm:$0xf]  ;;  %v4223_v57 = vor.u32 %v4790_v44, %v4222_v41  ;;  %v4807_v41 = vld [vmem:[#allocation11 + $0xb4] sm:$0xf]  ;;  %v4296_v44 = vld [vmem:[#allocation11 + $0xb8] sm:$0xf0] }
 0x1e1   :  { %v4287_v0 = vor.u32 %v4806_v58, %v4286_v56  ;;  %v4382_v58 = vld [vmem:[#allocation11 + $0x160] sm:$0xf] }
 0x1e4   :  { %2361 = vmatpush.bf16.msrb.mxu2 %v4027_v3  ;;  %2375 = vmatpush.bf16.msrb.mxu3 %v4155_v4  ;;  %v4788_v3 = vld [vmem:[#allocation11 + $0x14] sm:$0xf0]  ;;  %v4278_v4 = vld [vmem:[#allocation11 + $0x90] sm:$0xf] }
 0x1e5   :  { %v4215_v6 = vor.u32 %v4788_v3, %v4214_v59  ;;  %v4279_v33 = vor.u32 %v4804_v7, %v4278_v4  ;;  %v4446_v59 = vld [vmem:[#allocation11 + $0x1e0] sm:$0xf]  ;;  %v4846_v3 = vld [vmem:[#allocation11 + $0x1e4] sm:$0xf0]  ;;  %v4789_v4 = vld [vmem:[#allocation11 + $0x24] sm:$0xf] }
 0x1e8   :  { %2362 = vmatpush.bf16.msrb.mxu2 %v4011_v9  ;;  %2376 = vmatpush.bf16.msrb.mxu3 %v4139_v10  ;;  %v4786_v9 = vld [vmem:[#allocation11 + $0x4] sm:$0xf0]  ;;  %v4270_v10 = vld [vmem:[#allocation11 + $0x80] sm:$0xf] }
 0x1e9   :  { %v4207_v12 = vor.u32 %v4786_v9, %v4206_v8  ;;  %v4447_v8 = vor.u32 %v4846_v3, %v4446_v59 }
 0x1ec   :  { %2363 = vmatpush.bf16.msrb.mxu2 %v3995_v14  ;;  %2377 = vmatpush.bf16.msrb.mxu3 %v4123_v17  ;;  %v4264_v14 = vld [vmem:[#allocation11 + $0x78] sm:$0xf0]  ;;  %v4271_v17 = vor.u32 %v4802_v13, %v4270_v10  ;;  %v4805_v10 = vld [vmem:[#allocation11 + $0xa4] sm:$0xf]  ;;  %v4374_v13 = vld [vmem:[#allocation11 + $0x150] sm:$0xf] }
 0x1ed   :  { %v4267_v18 = vor.u32 %v4799_v2, %v4264_v14  ;;  %v4828_v14 = vld [vmem:[#allocation11 + $0x154] sm:$0xf0] }
 0x1f0   :  { %2364 = vmatpush.bf16.msrb.mxu2 %v3979_v22  ;;  %2378 = vmatpush.bf16.msrb.mxu3 %v4107_v62  ;;  %v4797_v62 = vld [vmem:[#allocation11 + $0x64] sm:$0xf] }
 0x1f1   :  { %v4259_v26 = vor.u32 %v4797_v62, %v4256_v63  ;;  %v4787_v62 = vld [vmem:[#allocation11 + $0x14] sm:$0xf]  ;;  %v4216_v63 = vld [vmem:[#allocation11 + $0x18] sm:$0xf0] }
 0x1f4   :  { %2365 = vmatpush.bf16.msrb.mxu2 %v3963_v11  ;;  %2379 = vmatpush.bf16.msrb.mxu3 %v4091_v28  ;;  %v4323_v11 = vor.u32 %v4813_v15, %v4320_v27  ;;  %v5436_v28 = vld [vmem:[#allocation10] sm:$0xf]  ;;  %v4803_v15 = vld [vmem:[#allocation11 + $0x94] sm:$0xf]  ;;  %v4219_v27 = vor.u32 %v4787_v62, %v4216_v63  ;;  %v4836_v62 = vld [vmem:[#allocation11 + $0x194] sm:$0xf0] }
 0x1f5   :  { %v1494_v23 = vperm.slane %v5436_v28, 0 }
 0x1f7   :  { %2366 = vmatmul.bf16.vlgmr.msrb.gmra.mxu2 %v5416_v25  ;;  %2380 = vmatmul.bf16.vlgmr.msrb.gmra.mxu3 %v5418_v51  ;;  %v4310_v25 = vld [vmem:[#allocation11 + $0xd0] sm:$0xf]  ;;  %v4247_v51 = vor.u32 %v4796_v46, %v4246_v37  ;;  %v4809_v37 = vld [vmem:[#allocation11 + $0xc4] sm:$0xf]  ;;  %v4243_v46 = vor.u32 %v4793_v19, %v4240_v36  ;;  %v4430_v19 = vld [vmem:[#allocation11 + $0x1c0] sm:$0xf] }
 0x1f8   :  { %v4311_v39 = vor.u32 %v4812_v45, %v4310_v25  ;;  %v4304_v25 = vld [vmem:[#allocation11 + $0xc8] sm:$0xf0]  ;;  %2878 = vmatpush.bf16.msra.mxu3 %v4455_v54  ;;  %v4785_v36 = vld [vmem:[#allocation11 + $0x4] sm:$0xf]  ;;  %v4840_v54 = vld [vmem:[#allocation11 + $0x1b4] sm:$0xf0] }
 0x1f9   :  { %2838 = vmatpush.bf16.msra.mxu0 %v4247_v51  ;;  %v1495_v51 = vperm.slane %v5436_v28, 1 }
 0x1fa   :  { %2852 = vmatpush.bf16.msra.mxu1 %v4311_v39  ;;  %v4307_v39 = vor.u32 %v4809_v37, %v4304_v25  ;;  %v4801_v25 = vld [vmem:[#allocation11 + $0x84] sm:$0xf] }
 0x1fc   :  { %2879 = vmatpush.bf16.msra.mxu3 %v4447_v8  ;;  %v4414_v8 = vld [vmem:[#allocation11 + $0x1a0] sm:$0xf] }
 0x1fd   :  { %2839 = vmatpush.bf16.msra.mxu0 %v4239_v48  ;;  %v4832_v48 = vld [vmem:[#allocation11 + $0x174] sm:$0xf0] }
 0x1fe   :  { %2853 = vmatpush.bf16.msra.mxu1 %v4303_v52  ;;  %v4391_v5 = vor.u32 %v4832_v48, %v4390_v40  ;;  %v4367_v48 = vor.u32 %v4826_v32, %v4366_v31  ;;  %v4334_v32 = vld [vmem:[#allocation11 + $0x100] sm:$0xf] }
 0x200   :  { %2864 = vmatpush.bf16.msra.mxu2 %v4391_v5 }
 0x201   :  { %2840 = vmatpush.bf16.msra.mxu0 %v4231_v42  ;;  %v4232_v42 = vld [vmem:[#allocation11 + $0x38] sm:$0xf0] }
 0x202   :  { %2854 = vmatpush.bf16.msra.mxu1 %v4295_v55  ;;  %v5430_v1 = vpop.f32.mrf.mxu0  ;;  %v5432_v50 = vpop.f32.mrf.mxu1  ;;  %v4235_v55 = vor.u32 %v4791_v43, %v4232_v42  ;;  %v4824_v43 = vld [vmem:[#allocation11 + $0x134] sm:$0xf0] }
 0x203   :  { %v2172_v52 = vadd.f32 %v5430_v1, %v1494_v23 }
 0x205   :  { %2841 = vmatpush.bf16.msra.mxu0 %v4223_v57  ;;  %v4299_v57 = vor.u32 %v4807_v41, %v4296_v44  ;;  %v2186_v7 = vadd.f32 %v5432_v50, %v2172_v52 }
 0x206   :  { %2855 = vmatpush.bf16.msra.mxu1 %v4287_v0  ;;  %v4830_v0 = vld [vmem:[#allocation11 + $0x164] sm:$0xf0] }
 0x207   :  { %v4383_v1 = vor.u32 %v4830_v0, %v4382_v58 }
 0x209   :  { %2842 = vmatpush.bf16.msra.mxu0 %v4215_v6  ;;  %v4224_v6 = vld [vmem:[#allocation11 + $0x28] sm:$0xf0]  ;;  %2865 = vmatpush.bf16.msra.mxu2 %v4383_v1 }
 0x20a   :  { %2856 = vmatpush.bf16.msra.mxu1 %v4279_v33  ;;  %v5434_v22 = vpop.f32.mrf.mxu0  ;;  %v5442_v35 = vpop.f32.mrf.mxu1  ;;  %v4227_v9 = vor.u32 %v4789_v4, %v4224_v6 }
 0x20b   :  { %v2174_v37 = vadd.f32 %v5434_v22, %v1494_v23  ;;  %v4422_v23 = vld [vmem:[#allocation11 + $0x1b0] sm:$0xf] }
 0x20c   :  { %v4423_v0 = vor.u32 %v4840_v54, %v4422_v23  ;;  %v4845_v23 = vld [vmem:[#allocation11 + $0x1e4] sm:$0xf] }
 0x20d   :  { %2843 = vmatpush.bf16.msra.mxu0 %v4207_v12  ;;  %v4288_v12 = vld [vmem:[#allocation11 + $0xa8] sm:$0xf0] }
 0x20e   :  { %2857 = vmatpush.bf16.msra.mxu1 %v4271_v17  ;;  %v4291_v2 = vor.u32 %v4805_v10, %v4288_v12  ;;  %v4438_v17 = vld [vmem:[#allocation11 + $0x1d0] sm:$0xf]  ;;  %v4838_v10 = vld [vmem:[#allocation11 + $0x1a4] sm:$0xf0] }
 0x20f   :  { %v4415_v12 = vor.u32 %v4838_v10, %v4414_v8  ;;  %v4432_v8 = vld [vmem:[#allocation11 + $0x1c8] sm:$0xf0] }
 0x211   :  { %2892 = vmatpush.bf16.msrb.mxu0 %v4267_v18  ;;  %v4844_v18 = vld [vmem:[#allocation11 + $0x1d4] sm:$0xf0] }
 0x212   :  { %2906 = vmatpush.bf16.msrb.mxu1 %v4331_v21  ;;  %v2227_v45 = vpop.f32.mrf.mxu0  ;;  %v2241_v33 = vpop.f32.mrf.mxu1  ;;  %v4375_v21 = vor.u32 %v4828_v14, %v4374_v13 }
 0x213   :  { %v2228_v56 = vadd.f32 %v2227_v45, %v1495_v51  ;;  %v4272_v45 = vld [vmem:[#allocation11 + $0x88] sm:$0xf0] }
 0x214   :  { %2866 = vmatpush.bf16.msra.mxu2 %v4375_v21  ;;  %v4275_v22 = vor.u32 %v4801_v25, %v4272_v45 }
 0x215   :  { %2893 = vmatpush.bf16.msrb.mxu0 %v4259_v26  ;;  %v2242_v61 = vadd.f32 %v2241_v33, %v2228_v56  ;;  %v4439_v26 = vor.u32 %v4844_v18, %v4438_v17  ;;  %v4359_v56 = vor.u32 %v4824_v43, %v4358_v53  ;;  %v4822_v33 = vld [vmem:[#allocation11 + $0x124] sm:$0xf0]  ;;  %v4342_v18 = vld [vmem:[#allocation11 + $0x110] sm:$0xf] }
 0x216   :  { %2907 = vmatpush.bf16.msrb.mxu1 %v4323_v11  ;;  %v4280_v11 = vld [vmem:[#allocation11 + $0x98] sm:$0xf0] }
 0x217   :  { %2880 = vmatpush.bf16.msra.mxu3 %v4439_v26 }
 0x218   :  { %2867 = vmatpush.bf16.msra.mxu2 %v4367_v48  ;;  %v4847_v48 = vld [vmem:[#allocation11 + $0x1f4] sm:$0xf] }
 0x219   :  { %2894 = vmatpush.bf16.msrb.mxu0 %v4251_v34 }
 0x21a   :  { %2908 = vmatpush.bf16.msrb.mxu1 %v4315_v60  ;;  %v2229_v16 = vpop.f32.mrf.mxu0  ;;  %v4283_v60 = vor.u32 %v4803_v15, %v4280_v11  ;;  %v4352_v15 = vld [vmem:[#allocation11 + $0x128] sm:$0xf0] }
 0x21b   :  { %v2230_v49 = vadd.f32 %v2229_v16, %v1495_v51  ;;  %v4818_v16 = vld [vmem:[#allocation11 + $0x104] sm:$0xf0] }
 0x21c   :  { %2868 = vmatpush.bf16.msra.mxu2 %v4359_v56 }
 0x21d   :  { %2895 = vmatpush.bf16.msrb.mxu0 %v4243_v46  ;;  %v4208_v46 = vld [vmem:[#allocation11 + $0x8] sm:$0xf0] }
 0x21e   :  { %2909 = vmatpush.bf16.msrb.mxu1 %v4307_v39  ;;  %v4211_v5 = vor.u32 %v4785_v36, %v4208_v46  ;;  %v4834_v36 = vld [vmem:[#allocation11 + $0x184] sm:$0xf0]  ;;  %v4392_v46 = vld [vmem:[#allocation11 + $0x178] sm:$0xf0] }
 0x221   :  { %2896 = vmatpush.bf16.msrb.mxu0 %v4235_v55  ;;  %v2188_v55 = vadd.f32 %v5442_v35, %v2174_v37  ;;  %v4831_v37 = vld [vmem:[#allocation11 + $0x174] sm:$0xf] }
 0x222   :  { %2910 = vmatpush.bf16.msrb.mxu1 %v4299_v57  ;;  %v5474_v63 = vpop.f32.mrf.mxu0 }
 0x225   :  { %2897 = vmatpush.bf16.msrb.mxu0 %v4227_v9 }
 0x226   :  { %2911 = vmatpush.bf16.msrb.mxu1 %v4291_v2 }
 0x229   :  { %2898 = vmatpush.bf16.msrb.mxu0 %v4219_v27 }
 0x22a   :  { %2912 = vmatpush.bf16.msrb.mxu1 %v4283_v60 }
 0x22d   :  { %2899 = vmatpush.bf16.msrb.mxu0 %v4211_v5 }
 0x22e   :  { %2913 = vmatpush.bf16.msrb.mxu1 %v4275_v22  ;;  %v4384_v22 = vld [vmem:[#allocation11 + $0x168] sm:$0xf0] }
 0x23a   :  { %v5438_v29 = vpop.f32.mrf.mxu2  ;;  %v5440_v30 = vpop.f32.mrf.mxu3 }
 0x23b   :  { %v2200_v20 = vadd.f32 %v5438_v29, %v2186_v7  ;;  %v4842_v29 = vld [vmem:[#allocation11 + $0x1c4] sm:$0xf0]  ;;  %v4350_v7 = vld [vmem:[#allocation11 + $0x120] sm:$0xf] }
 0x23c   :  { %v4431_v52 = vor.u32 %v4842_v29, %v4430_v19  ;;  %v4351_v9 = vor.u32 %v4822_v33, %v4350_v7  ;;  %v4335_v29 = vor.u32 %v4818_v16, %v4334_v32  ;;  %v4841_v7 = vld [vmem:[#allocation11 + $0x1c4] sm:$0xf]  ;;  %v4344_v32 = vld [vmem:[#allocation11 + $0x118] sm:$0xf0]  ;;  %v4835_v16 = vld [vmem:[#allocation11 + $0x194] sm:$0xf] }
 0x23d   :  { %v2214_v39 = vadd.f32 %v5440_v30, %v2200_v20  ;;  %v2243_v30 = vpop.f32.mrf.mxu1  ;;  %v4406_v20 = vld [vmem:[#allocation11 + $0x190] sm:$0xf] }
 0x23e   :  { %v2244_v57 = vadd.f32 %v2243_v30, %v2230_v49  ;;  %2881 = vmatpush.bf16.msra.mxu3 %v4431_v52  ;;  %2869 = vmatpush.bf16.msra.mxu2 %v4351_v9  ;;  %v4407_v11 = vor.u32 %v4836_v62, %v4406_v20  ;;  %v4456_v49 = vld [vmem:[#allocation11 + $0x1f8] sm:$0xf0]  ;;  %v4448_v30 = vld [vmem:[#allocation11 + $0x1e8] sm:$0xf0]  ;;  %v1497_v9 = vperm.slane %v5436_v28, 3 }
 0x23f   :  { %v4459_v5 = vor.u32 %v4847_v48, %v4456_v49  ;;  %v4451_v56 = vor.u32 %v4845_v23, %v4448_v30  ;;  %v4821_v62 = vld [vmem:[#allocation11 + $0x124] sm:$0xf]  ;;  %v4400_v49 = vld [vmem:[#allocation11 + $0x188] sm:$0xf0] }
 0x240   :  { %v4833_v48 = vld [vmem:[#allocation11 + $0x184] sm:$0xf] }
 0x242   :  { %v5446_v24 = vpop.f32.mrf.mxu2  ;;  %v5448_v38 = vpop.f32.mrf.mxu3  ;;  %2882 = vmatpush.bf16.msra.mxu3 %v4423_v0 }
 0x243   :  { %v2202_v51 = vadd.f32 %v5446_v24, %v2188_v55 }
 0x245   :  { %v2216_v35 = vadd.f32 %v5448_v38, %v2202_v51  ;;  %v2297_v52 = vpop.f32.mrf.mxu1  ;;  %v4376_v51 = vld [vmem:[#allocation11 + $0x158] sm:$0xf0] }
 0x246   :  { %2883 = vmatpush.bf16.msra.mxu3 %v4415_v12 }
 0x24a   :  { %v2255_v50 = vpop.f32.mrf.mxu2  ;;  %v2269_v47 = vpop.f32.mrf.mxu3  ;;  %2884 = vmatpush.bf16.msra.mxu3 %v4407_v11 }
 0x24b   :  { %v2256_v34 = vadd.f32 %v2255_v50, %v2242_v61  ;;  %v4820_v61 = vld [vmem:[#allocation11 + $0x114] sm:$0xf0] }
 0x24c   :  { %v4343_v21 = vor.u32 %v4820_v61, %v4342_v18  ;;  %v4424_v61 = vld [vmem:[#allocation11 + $0x1b8] sm:$0xf0] }
 0x24d   :  { %v2270_v40 = vadd.f32 %v2269_v47, %v2256_v34  ;;  %v4398_v34 = vld [vmem:[#allocation11 + $0x180] sm:$0xf] }
 0x24e   :  { %2870 = vmatpush.bf16.msra.mxu2 %v4343_v21 }
 0x24f   :  { %v2386_v42 = vpack.c.bf16 %v2270_v40, %v2214_v39  ;;  %v4399_v39 = vor.u32 %v4834_v36, %v4398_v34  ;;  %v4395_v40 = vor.u32 %v4831_v37, %v4392_v46  ;;  %v4408_v34 = vld [vmem:[#allocation11 + $0x198] sm:$0xf0] }
 0x251   :  { %v2390_v41 = vunpack.c.l.bf16 %v2386_v42  ;;  %v2391_v44 = vunpack.c.h.bf16 %v2386_v42  ;;  %2885 = vmatpush.bf16.msra.mxu3 %v4399_v39  ;;  %v4336_v39 = vld [vmem:[#allocation11 + $0x108] sm:$0xf0] }
 0x252   :  { %v2257_v58 = vpop.f32.mrf.mxu2  ;;  %v2271_v4 = vpop.f32.mrf.mxu3  ;;  %2871 = vmatpush.bf16.msra.mxu2 %v4335_v29 }
 0x253   :  { %v2258_v59 = vadd.f32 %v2257_v58, %v2244_v57  ;;  %v2406_v1 = vmul.f32 0.010009766, %v2390_v41  ;;  %v2407_v3 = vmul.f32 0.010009766, %v2391_v44  ;;  %vm5466_vm9 = vcmp.ge.f32.partialorder %v2390_v41, 0.0  ;;  %v5486_v41 = vpop.f32.mrf.mxu0  ;;  %v4827_v57 = vld [vmem:[#allocation11 + $0x154] sm:$0xf] }
 0x254   :  { %vm5470_vm10 = vcmp.ge.f32.partialorder %v2391_v44, 0.0  ;;  %v4843_v58 = vld [vmem:[#allocation11 + $0x1d4] sm:$0xf]  ;;  %v4379_v0 = vor.u32 %v4827_v57, %v4376_v51 }
 0x255   :  { %v2272_v6 = vadd.f32 %v2271_v4, %v2258_v59  ;;  %v2414_v14 = vpack.c.bf16 %v2407_v3, %v2406_v1  ;;  %vm2418_vm11 = vmpackc.low %vm5470_vm10, %vm5466_vm9  ;;  %2934 = vmatpush.bf16.msrb.mxu3 %v4459_v5  ;;  %v4440_v59 = vld [vmem:[#allocation11 + $0x1d8] sm:$0xf0]  ;;  %v1496_v3 = vperm.slane %v5436_v28, 2  ;;  %v2299_v4 = vpop.f32.mrf.mxu1  ;;  %v4355_v28 = vor.u32 %v4821_v62, %v4352_v15  ;;  %v4862_v62 = vld [vmem:[#allocation14 + $0x68] sm:$0xff] }
 0x256   :  { %2920 = vmatpush.bf16.msrb.mxu2 %v4395_v40  ;;  %v4443_v1 = vor.u32 %v4843_v58, %v4440_v59 }
 0x257   :  { %v2388_v24 = vpack.c.bf16 %v2272_v6, %v2216_v35  ;;  %v2422_v27 = vsel %vm2418_vm11, %v2386_v42, %v2414_v14  ;;  %v4829_v42 = vld [vmem:[#allocation11 + $0x164] sm:$0xf]  ;;  %v4368_v6 = vld [vmem:[#allocation11 + $0x148] sm:$0xf0]  ;;  %v2284_v13 = vadd.f32 %v5474_v63, %v1496_v3  ;;  %v4823_v14 = vld [vmem:[#allocation11 + $0x134] sm:$0xf]  ;;  %v2286_v40 = vadd.f32 %v5486_v41, %v1496_v3 }
 0x258   :  { %v2500_v47 = vunpack.c.l.b16 %v2422_v27  ;;  %v2501_v60 = vunpack.c.h.b16 %v2422_v27  ;;  %v4387_v55 = vor.u32 %v4829_v42, %v4384_v22  ;;  %v4825_v35 = vld [vmem:[#allocation11 + $0x144] sm:$0xf]  ;;  %v4819_v63 = vld [vmem:[#allocation11 + $0x114] sm:$0xf]  ;;  %v4403_v22 = vor.u32 %v4833_v48, %v4400_v49 }
 0x259   :  { %v2394_v38 = vunpack.c.l.bf16 %v2388_v24  ;;  %v2395_v17 = vunpack.c.h.bf16 %v2388_v24  ;;  %2935 = vmatpush.bf16.msrb.mxu3 %v4451_v56  ;;  %v4371_v33 = vor.u32 %v4825_v35, %v4368_v6  ;;  %v2298_v27 = vadd.f32 %v2297_v52, %v2284_v13 }
 0x25a   :  { %v2311_v54 = vpop.f32.mrf.mxu2  ;;  %v5488_v44 = vpop.f32.mrf.mxu3  ;;  %2921 = vmatpush.bf16.msrb.mxu2 %v4387_v55  ;;  %v4347_v29 = vor.u32 %v4819_v63, %v4344_v32  ;;  %v2300_v23 = vadd.f32 %v2299_v4, %v2286_v40  ;;  %v4851_v63 = vld [vmem:[#allocation14 + $0x10] sm:$0xff] }
 0x25b   :  { %vm5480_vm12 = vcmp.ge.f32.partialorder %v2394_v38, 0.0  ;;  %vm2403_vm13 = vcmp.ge.f32.partialorder %v2395_v17, 0.0  ;;  %v2410_v50 = vmul.f32 0.010009766, %v2394_v38  ;;  %v2411_v26 = vmul.f32 0.010009766, %v2395_v17  ;;  %v2339_v10 = vpop.f32.mrf.mxu0  ;;  %v4360_v38 = vld [vmem:[#allocation11 + $0x138] sm:$0xf0] }
 0x25c   :  { %vm2420_vm14 = vmpackc.low %vm2403_vm13, %vm5480_vm12  ;;  %v4839_v17 = vld [vmem:[#allocation11 + $0x1b4] sm:$0xf]  ;;  %v4363_v18 = vor.u32 %v4823_v14, %v4360_v38  ;;  %v2340_v20 = vadd.f32 %v2339_v10, %v1497_v9 }
 0x25d   :  { %v2416_v31 = vpack.c.bf16 %v2411_v26, %v2410_v50  ;;  %2936 = vmatpush.bf16.msrb.mxu3 %v4443_v1  ;;  %v4427_v21 = vor.u32 %v4839_v17, %v4424_v61  ;;  %v4837_v50 = vld [vmem:[#allocation11 + $0x1a4] sm:$0xf]  ;;  %v4416_v26 = vld [vmem:[#allocation11 + $0x1a8] sm:$0xf0]  ;;  %v2353_v11 = vpop.f32.mrf.mxu1  ;;  %v4856_v17 = vld [vmem:[#allocation14 + $0x38] sm:$0xff] }
 0x25e   :  { %2922 = vmatpush.bf16.msrb.mxu2 %v4379_v0  ;;  %v4855_v61 = vld [vmem:[#allocation14 + $0x30] sm:$0xff] }
 0x25f   :  { %v2424_v19 = vsel %vm2420_vm14, %v2388_v24, %v2416_v31  ;;  %v4435_v24 = vor.u32 %v4841_v7, %v4432_v8  ;;  %v4419_v31 = vor.u32 %v4837_v50, %v4416_v26  ;;  %v4853_v50 = vld [vmem:[#allocation14 + $0x20] sm:$0xff]  ;;  %v4859_v32 = vld [vmem:[#allocation14 + $0x50] sm:$0xff] }
 0x260   :  { %v2504_v25 = vunpack.c.l.b16 %v2424_v19  ;;  %v2505_v45 = vunpack.c.h.b16 %v2424_v19 }
 0x261   :  { %2937 = vmatpush.bf16.msrb.mxu3 %v4435_v24 }
 0x262   :  { %v2508_v53 = vpack.c.b16 %v2504_v25, %v2500_v47  ;;  %v2509_v43 = vpack.c.b16 %v2505_v45, %v2501_v60  ;;  %v2313_v12 = vpop.f32.mrf.mxu2  ;;  %2923 = vmatpush.bf16.msrb.mxu2 %v4371_v33  ;;  %v2327_v2 = vpop.f32.mrf.mxu3  ;;  %v2354_v47 = vadd.f32 %v2353_v11, %v2340_v20  ;;  %v2312_v60 = vadd.f32 %v2311_v54, %v2298_v27  ;;  %v4817_v45 = vld [vmem:[#allocation11 + $0x104] sm:$0xf]  ;;  %v4863_v20 = vld [vmem:[#allocation14 + $0x70] sm:$0xff]  ;;  %v4852_v27 = vld [vmem:[#allocation14 + $0x18] sm:$0xff] }
 0x263   :  { %v2341_v36 = vpop.f32.mrf.mxu0  ;;  %v4411_v25 = vor.u32 %v4835_v16, %v4408_v34  ;;  %v2314_v30 = vadd.f32 %v2313_v12, %v2300_v23  ;;  %v4860_v11 = vld [vmem:[#allocation14 + $0x58] sm:$0xff] }
 0x264   :  { %2844 = vmatmul.bf16.vlgmr.msra.gmra.mxu0 %v2508_v53  ;;  %2858 = vmatmul.bf16.vlgmr.msra.gmra.mxu1 %v2509_v43  ;;  %v2326_v52 = vadd.f32 %v5488_v44, %v2312_v60  ;;  %v4850_v60 = vld [vmem:[#allocation14 + $0x8] sm:$0xff] }
 0x265   :  { %2938 = vmatpush.bf16.msrb.mxu3 %v4427_v21  ;;  %v2355_v54 = vpop.f32.mrf.mxu1  ;;  %v2328_v0 = vadd.f32 %v2327_v2, %v2314_v30  ;;  %3110 = vmatpush.bf16.msra.mxu0 %v4856_v17  ;;  %v4854_v21 = vld [vmem:[#allocation14 + $0x28] sm:$0xff] }
 0x266   :  { %2924 = vmatpush.bf16.msrb.mxu2 %v4363_v18  ;;  %v4864_v18 = vld [vmem:[#allocation14 + $0x78] sm:$0xff] }
 0x267   :  { %3124 = vmatpush.bf16.msra.mxu1 %v4864_v18 }
 0x269   :  { %2939 = vmatpush.bf16.msrb.mxu3 %v4419_v31  ;;  %3111 = vmatpush.bf16.msra.mxu0 %v4855_v61 }
 0x26a   :  { %2925 = vmatpush.bf16.msrb.mxu2 %v4355_v28  ;;  %v4861_v28 = vld [vmem:[#allocation14 + $0x60] sm:$0xff] }
 0x26b   :  { %3125 = vmatpush.bf16.msra.mxu1 %v4863_v20 }
 0x26d   :  { %2940 = vmatpush.bf16.msrb.mxu3 %v4411_v25  ;;  %3112 = vmatpush.bf16.msra.mxu0 %v4854_v21 }
 0x26e   :  { %2926 = vmatpush.bf16.msrb.mxu2 %v4347_v29 }
 0x26f   :  { %3126 = vmatpush.bf16.msra.mxu1 %v4862_v62 }
 0x271   :  { %2941 = vmatpush.bf16.msrb.mxu3 %v4403_v22  ;;  %3113 = vmatpush.bf16.msra.mxu0 %v4853_v50  ;;  %v4884_v50 = vld [vmem:[%s5515_s11] ss:$0 sm:$0xff] }
 0x273   :  { %3127 = vmatpush.bf16.msra.mxu1 %v4861_v28 }
 0x274   :  { %2900 = vmatmul.bf16.vlgmr.msrb.gmra.mxu0 %v2508_v53  ;;  %2914 = vmatmul.bf16.vlgmr.msrb.gmra.mxu1 %v2509_v43  ;;  %v2342_v53 = vadd.f32 %v2341_v36, %v1497_v9  ;;  %v4339_v43 = vor.u32 %v4817_v45, %v4336_v39 }
 0x275   :  { %3114 = vmatpush.bf16.msra.mxu0 %v4852_v27 }
 0x276   :  { %v2356_v55 = vadd.f32 %v2355_v54, %v2342_v53  ;;  %2927 = vmatpush.bf16.msrb.mxu2 %v4339_v43 }
 0x277   :  { %3128 = vmatpush.bf16.msra.mxu1 %v4860_v11 }
 0x279   :  { %3115 = vmatpush.bf16.msra.mxu0 %v4851_v63 }
 0x27a   :  { %v2367_v19 = vpop.f32.mrf.mxu2  ;;  %v2381_v46 = vpop.f32.mrf.mxu3 }
 0x27b   :  { %v2368_v37 = vadd.f32 %v2367_v19, %v2354_v47  ;;  %3129 = vmatpush.bf16.msra.mxu1 %v4859_v32  ;;  %v2490_v47 = vld [vmem:[#allocation13] sm:$0x3]  ;;  %v4858_v19 = vld [vmem:[#allocation14 + $0x48] sm:$0xff] }
 0x27c   :  { %v2492_v36 = vperm.slane %v2490_v47, 0  ;;  %v2493_v25 = vperm.slane %v2490_v47, 1  ;;  %v3140_v47 = vstv %s5504_s0 }
 0x27d   :  { %v2382_v5 = vadd.f32 %v2381_v46, %v2368_v37  ;;  %3116 = vmatpush.bf16.msra.mxu0 %v4850_v60  ;;  %v4849_v37 = vld [vmem:[#allocation14] sm:$0xff] }
 0x27e   :  { %v4857_v46 = vld [vmem:[#allocation14 + $0x40] sm:$0xff] }
 0x27f   :  { %v2387_v42 = vpack.c.bf16 %v2382_v5, %v2326_v52  ;;  %3130 = vmatpush.bf16.msra.mxu1 %v4858_v19 }
 0x281   :  { %v2392_v56 = vunpack.c.l.bf16 %v2387_v42  ;;  %v2393_v57 = vunpack.c.h.bf16 %v2387_v42  ;;  %3117 = vmatpush.bf16.msra.mxu0 %v4849_v37 }
 0x282   :  { %v2369_v51 = vpop.f32.mrf.mxu2  ;;  %v2383_v58 = vpop.f32.mrf.mxu3 }
 0x283   :  { %v2370_v41 = vadd.f32 %v2369_v51, %v2356_v55  ;;  %v2408_v44 = vmul.f32 0.010009766, %v2392_v56  ;;  %v2409_v59 = vmul.f32 0.010009766, %v2393_v57  ;;  %vm2400_vm15 = vcmp.ge.f32.partialorder %v2392_v56, 0.0  ;;  %3131 = vmatpush.bf16.msra.mxu1 %v4857_v46 }
 0x284   :  { %vm2401_vm0 = vcmp.ge.f32.partialorder %v2393_v57, 0.0 }
 0x285   :  { %v2384_v1 = vadd.f32 %v2383_v58, %v2370_v41  ;;  %v2415_v35 = vpack.c.bf16 %v2409_v59, %v2408_v44  ;;  %vm2419_vm3 = vmpackc.low %vm2401_vm0, %vm2400_vm15 }
 0x287   :  { %v2389_v3 = vpack.c.bf16 %v2384_v1, %v2328_v0  ;;  %v2423_v8 = vsel %vm2419_vm3, %v2387_v42, %v2415_v35 }
 0x288   :  { %v2502_v24 = vunpack.c.l.b16 %v2423_v8  ;;  %v2503_v12 = vunpack.c.h.b16 %v2423_v8 }
 0x289   :  { %v2396_v6 = vunpack.c.l.bf16 %v2389_v3  ;;  %v2397_v4 = vunpack.c.h.bf16 %v2389_v3 }
 0x28b   :  { %vm2404_vm1 = vcmp.ge.f32.partialorder %v2396_v6, 0.0  ;;  %vm2405_vm2 = vcmp.ge.f32.partialorder %v2397_v4, 0.0  ;;  %v2412_v7 = vmul.f32 0.010009766, %v2396_v6  ;;  %v2413_v33 = vmul.f32 0.010009766, %v2397_v4 }
 0x28c   :  { %vm2421_vm4 = vmpackc.low %vm2405_vm2, %vm2404_vm1 }
 0x28d   :  { %v2417_v9 = vpack.c.bf16 %v2413_v33, %v2412_v7 }
 0x28f   :  { %v2425_v10 = vsel %vm2421_vm4, %v2389_v3, %v2417_v9 }
 0x290   :  { %v2506_v13 = vunpack.c.l.b16 %v2425_v10  ;;  %v2507_v2 = vunpack.c.h.b16 %v2425_v10 }
 0x292   :  { %v2510_v14 = vpack.c.b16 %v2506_v13, %v2502_v24  ;;  %v2511_v38 = vpack.c.b16 %v2507_v2, %v2503_v12 }
 0x294   :  { %2872 = vmatmul.bf16.vlgmr.msra.gmra.mxu2 %v2510_v14  ;;  %2886 = vmatmul.bf16.vlgmr.msra.gmra.mxu3 %v2511_v38 }
 0x2a4   :  { %2928 = vmatmul.bf16.vlgmr.msrb.gmra.mxu2 %v2510_v14  ;;  %2942 = vmatmul.bf16.vlgmr.msrb.gmra.mxu3 %v2511_v38 }
 0x2e1   :  { %v2845_v15 = vpop.f32.mrf.mxu0  ;;  %v2859_v26 = vpop.f32.mrf.mxu1 }
 0x2e2   :  { %v2846_v48 = vadd.f32 %v2845_v15, %v2492_v36 }
 0x2e4   :  { %v2860_v52 = vadd.f32 %v2859_v26, %v2846_v48 }
 0x2e9   :  { %v2847_v31 = vpop.f32.mrf.mxu0  ;;  %v2861_v29 = vpop.f32.mrf.mxu1 }
 0x2ea   :  { %v2848_v55 = vadd.f32 %v2847_v31, %v2492_v36 }
 0x2ec   :  { %v2862_v41 = vadd.f32 %v2861_v29, %v2848_v55 }
 0x2f1   :  { %v2901_v45 = vpop.f32.mrf.mxu0  ;;  %v2915_v5 = vpop.f32.mrf.mxu1 }
 0x2f2   :  { %v2902_v49 = vadd.f32 %v2901_v45, %v2493_v25 }
 0x2f4   :  { %v2916_v53 = vadd.f32 %v2915_v5, %v2902_v49 }
 0x2f9   :  { %v2903_v22 = vpop.f32.mrf.mxu0  ;;  %v2917_v58 = vpop.f32.mrf.mxu1 }
 0x2fa   :  { %v2904_v57 = vadd.f32 %v2903_v22, %v2493_v25 }
 0x2fc   :  { %v2918_v0 = vadd.f32 %v2917_v58, %v2904_v57 }
 0x317   :  { %v2873_v16 = vpop.f32.mrf.mxu2  ;;  %v2887_v34 = vpop.f32.mrf.mxu3 }
 0x318   :  { %v2874_v43 = vadd.f32 %v2873_v16, %v2860_v52 }
 0x31a   :  { %v2888_v30 = vadd.f32 %v2887_v34, %v2874_v43 }
 0x31f   :  { %v2875_v39 = vpop.f32.mrf.mxu2  ;;  %v2889_v40 = vpop.f32.mrf.mxu3 }
 0x320   :  { %v2876_v44 = vadd.f32 %v2875_v39, %v2862_v41 }
 0x322   :  { %v2890_v4 = vadd.f32 %v2889_v40, %v2876_v44 }
 0x327   :  { %v2929_v42 = vpop.f32.mrf.mxu2  ;;  %v2943_v54 = vpop.f32.mrf.mxu3 }
 0x328   :  { %v2930_v23 = vadd.f32 %v2929_v42, %v2916_v53 }
 0x32a   :  { %v2944_v56 = vadd.f32 %v2943_v54, %v2930_v23 }
 0x32c   :  { %v2948_v51 = vpack.c.bf16 %v2944_v56, %v2888_v30 }
 0x32e   :  { %v2950_v59 = vunpack.c.l.bf16 %v2948_v51  ;;  %v2951_v1 = vunpack.c.h.bf16 %v2948_v51 }
 0x32f   :  { %v2931_v3 = vpop.f32.mrf.mxu2  ;;  %v2945_v6 = vpop.f32.mrf.mxu3 }
 0x330   :  { %v2932_v35 = vadd.f32 %v2931_v3, %v2918_v0  ;;  %v2958_v7 = vmul.f32 0.010009766, %v2950_v59  ;;  %v2959_v33 = vmul.f32 0.010009766, %v2951_v1  ;;  %vm2954_vm5 = vcmp.ge.f32.partialorder %v2950_v59, 0.0 }
 0x331   :  { %vm2955_vm6 = vcmp.ge.f32.partialorder %v2951_v1, 0.0 }
 0x332   :  { %v2946_v8 = vadd.f32 %v2945_v6, %v2932_v35  ;;  %v2962_v10 = vpack.c.bf16 %v2959_v33, %v2958_v7  ;;  %vm2964_vm9 = vmpackc.low %vm2955_vm6, %vm2954_vm5 }
 0x334   :  { %v2949_v9 = vpack.c.bf16 %v2946_v8, %v2890_v4  ;;  %v2966_v14 = vsel %vm2964_vm9, %v2948_v51, %v2962_v10 }
 0x335   :  { %v3006_v18 = vunpack.c.l.b16 %v2966_v14  ;;  %v3007_v61 = vunpack.c.h.b16 %v2966_v14 }
 0x336   :  { %v2952_v24 = vunpack.c.l.bf16 %v2949_v9  ;;  %v2953_v12 = vunpack.c.h.bf16 %v2949_v9 }
 0x338   :  { %vm2956_vm7 = vcmp.ge.f32.partialorder %v2952_v24, 0.0  ;;  %vm2957_vm8 = vcmp.ge.f32.partialorder %v2953_v12, 0.0  ;;  %v2960_v13 = vmul.f32 0.010009766, %v2952_v24  ;;  %v2961_v2 = vmul.f32 0.010009766, %v2953_v12 }
 0x339   :  { %vm2965_vm10 = vmpackc.low %vm2957_vm8, %vm2956_vm7 }
 0x33a   :  { %v2963_v38 = vpack.c.bf16 %v2961_v2, %v2960_v13 }
 0x33c   :  { %v2967_v17 = vsel %vm2965_vm10, %v2949_v9, %v2963_v38 }
 0x33d   :  { %v3008_v20 = vunpack.c.l.b16 %v2967_v17  ;;  %v3009_v21 = vunpack.c.h.b16 %v2967_v17 }
 0x33f   :  { %v3010_v62 = vpack.c.b16 %v3008_v20, %v3006_v18  ;;  %v3011_v15 = vpack.c.b16 %v3009_v21, %v3007_v61 }
 0x341   :  { %3118 = vmatmul.bf16.vlgmr.msra.gmra.mxu0 %v3010_v62  ;;  %3132 = vmatmul.bf16.vlgmr.msra.gmra.mxu1 %v3011_v15 }
 0x3be   :  { %v3119_v28 = vpop.f32.mrf.mxu0  ;;  %v3133_v26 = vpop.f32.mrf.mxu1 }
 0x3bf   :  { %v3120_v27 = vadd.f32 %v4884_v50, %v3119_v28 }
 0x3c1   :  { %v3134_v11 = vadd.f32 %v3133_v26, %v3120_v27 }
 0x3c3   :  { %4885 = vtanh.f32 %v3134_v11 }
 0x3c6   :  { %v3121_v31 = vpop.f32.mrf.mxu0  ;;  %v3135_v32 = vpop.f32.mrf.mxu1 }
 0x3c7   :  { %v3122_v63 = vadd.f32 %v4884_v50, %v3121_v31 }
 0x3c9   :  { %v3136_v16 = vadd.f32 %v3135_v32, %v3122_v63  ;;  %v4886_v34 = vpop.eup %4885 }
 0x3ca   :  { %v3141_v19 = vmul.f32 %v4886_v34, %v3140_v47 }
 0x3cb   :  { %4887 = vtanh.f32 %v3136_v16 }
 0x3d1   :  { %v4888_v60 = vpop.eup %4887 }
 0x3d2   :  { %v3142_v29 = vmul.f32 %v4888_v60, %v3140_v47 }
 0x3d4   :  { %v4868_v36 = vpack.c.bf16 %v3142_v29, %v3141_v19 }
 0x3d6   :  { %4869 = vst [vmem:[%s5516_s12] sm:$0xff] %v4868_v36  }
 0x3d7   :  { %3151 = vsyncpa [#allocation4], 1 }
 0x3d8   :  { %3152 = vsyncpa [#allocation6], 1 }
 0x3d9   :  { %3153 = vsyncpa [#allocation9], 1 }
 0x3da   :  { %3154 = vsyncpa [#allocation12], 1 }
 0x3db   :  { %3155 = vsyncpa [#allocation15], 1 }

</bundles_post_ra>
